<compile_context>
chip_gen: v6e
topology: v6e:2x2x1
jax: 0.10.0
libtpu: 0.0.40
codegen_flags: <defaults>
</compile_context>

<pallas_src>
import jax
import jax.numpy as jnp
import numpy as np
from jax import lax
from jax.experimental import pallas as pl
from jax.experimental.pallas import tpu as pltpu


def da_module_pallas(x_nchw, params):
    """x_nchw: (B, C, H, W) float32 (PyTorch layout). Returns (B, C, H, W)."""
    B, C, H, W = x_nchw.shape
    N = H * W
    (wp, bp, wq, bq, wk, bk, wv, bv, wo, bo, wc, bc, wco, bco) = params

    inv_sqrt_c = float(1.0 / np.sqrt(C))
    inv_sqrt_n = float(1.0 / np.sqrt(N))

    tap_offsets = tuple((dh, dw) for dh in (-1, 0, 1) for dw in (-1, 0, 1))

    def softmax_lastdim(z):
        m = jnp.max(z, axis=-1, keepdims=True)
        e = jnp.exp(z - m)
        return e * pl.reciprocal(jnp.sum(e, axis=-1, keepdims=True), approx=True)

    def kernel(x_ref, mask_ref, wpc_ref, bpc_ref,
               wqkv_ref, bqkv_ref, wo_ref, bo_ref,
               wcoT_ref, bco_ref, o_ref):
        x = x_ref[...].astype(jnp.float32)                 # (C, N), N on lanes

        # im2col for a 3x3 'same' conv on the flattened spatial axis:
        # 9 rolled taps, edge-invalid positions zeroed by precomputed masks.
        taps = []
        for t, (dh, dw) in enumerate(tap_offsets):
            s = dh * W + dw
            if s == 0:
                taps.append(x)
            else:
                rolled = pltpu.roll(x, shift=(-s) % N, axis=1)
                taps.append(rolled * mask_ref[t:t + 1, :])
        x9 = jnp.concatenate(taps, axis=0)                 # (9C, N), shared

        # Both branch convs as a single fused matmul.
        ypc = jnp.dot(wpc_ref[...], x9,
                      preferred_element_type=jnp.float32) + bpc_ref[...]   # (2C, N)
        yp = ypc[:C, :]                                    # position conv out
        yc = ypc[C:, :]                                    # channel  conv out

        # ---- position attention (tokens = spatial positions) ----
        qkv = jnp.dot(wqkv_ref[...], yp,
                      preferred_element_type=jnp.float32) + bqkv_ref[...]  # (3C, N)
        q = qkv[:C, :]
        k = qkv[C:2 * C, :]
        v = qkv[2 * C:, :]

        logits = jnp.dot(q.T, k, preferred_element_type=jnp.float32) * inv_sqrt_c
        att = softmax_lastdim(logits)                      # (N, N)
        # dropout omitted (eval mode)
        ctx = jnp.dot(att, v.T, preferred_element_type=jnp.float32).T      # (C, N)
        p_out = jnp.dot(wo_ref[...], ctx,
                        preferred_element_type=jnp.float32) + bo_ref[...]

        # ---- channel attention (tokens = channels) ----
        logits_c = jnp.dot(yc, yc.T, preferred_element_type=jnp.float32) * inv_sqrt_n
        att_c = softmax_lastdim(logits_c)                  # (C, C)
        ctx_c = jnp.dot(att_c, yc, preferred_element_type=jnp.float32)     # (C, N)
        c_out = jnp.dot(ctx_c, wcoT_ref[...],
                        preferred_element_type=jnp.float32) + bco_ref[...]

        o_ref[...] = (p_out + c_out).astype(o_ref.dtype)

    # ---- operand repacking (free reshapes / one-time weight transposes) ----
    x_flat = x_nchw.reshape(B, C, N)

    def conv_w(w):  # (C_out, C_in, 3, 3) -> (C_out, 9*C_in), tap-major (dh, dw)
        return jnp.transpose(w, (0, 2, 3, 1)).reshape(C, 9 * C)

    col = lambda b: b.reshape(-1, 1)    # bias broadcast along lanes
    rowv = lambda b: b.reshape(1, -1)   # bias broadcast along sublanes

    wpc = jnp.concatenate([conv_w(wp), conv_w(wc)], axis=0)        # (2C, 9C)
    bpc = jnp.concatenate([col(bp), col(bc)], axis=0)              # (2C, 1)
    wqkv = jnp.concatenate([wq, wk, wv], axis=0)                   # (3C, C)
    bqkv = jnp.concatenate([col(bq), col(bk), col(bv)], axis=0)    # (3C, 1)

    # Precomputed multiplicative edge masks for the 9 taps (9, N).
    pos = np.arange(N)
    r_i, c_i = pos // W, pos % W
    mask_np = np.stack(
        [((r_i + dh >= 0) & (r_i + dh < H) &
          (c_i + dw >= 0) & (c_i + dw < W)).astype(np.float32)
         for dh in (-1, 0, 1) for dw in (-1, 0, 1)], axis=0)
    mask = jnp.asarray(mask_np)                                    # (9, N)

    operands = (x_flat, mask, wpc, bpc, wqkv, bqkv, wo, col(bo),
                wco.T, rowv(bco))

    def full_spec(a):
        zero_idx = (0,) * a.ndim

        def imap(b):
            return zero_idx
        return pl.BlockSpec(a.shape, imap)

    io_spec = pl.BlockSpec((None, C, N), lambda b: (b, 0, 0))

    grid_spec = pltpu.PrefetchScalarGridSpec(
        num_scalar_prefetch=0,
        grid=(B,),
        in_specs=[io_spec] + [full_spec(a) for a in operands[1:]],
        out_specs=io_spec,
    )

    out = pl.pallas_call(
        kernel,
        out_shape=jax.ShapeDtypeStruct((B, C, N), x_nchw.dtype),
        grid_spec=grid_spec,
        compiler_params=pltpu.CompilerParams(
            dimension_semantics=("parallel",)),   # batch is independent (v7x 2 TCs)
    )(*operands)

    return out.reshape(B, C, H, W)


# ---------------- pure-JAX reference (f32, HIGHEST) for validation ----------------
def da_module_ref(x, params):
    (wp, bp, wq, bq, wk, bk, wv, bv, wo, bo, wc, bc, wco, bco) = params
    B, C, H, W = x.shape
    N = H * W
    hp = lax.Precision.HIGHEST

    def conv3x3(inp, w, b):
        y = lax.conv_general_dilated(
            inp, w, window_strides=(1, 1), padding=((1, 1), (1, 1)),
            dimension_numbers=('NCHW', 'OIHW', 'NCHW'), precision=hp)
        return y + b.reshape(1, C, 1, 1)

    # position attention branch
    yp = conv3x3(x, wp, bp).reshape(B, C, N).transpose(0, 2, 1)        # (B, N, C)
    q = jnp.einsum('bnc,dc->bnd', yp, wq, precision=hp) + bq
    k = jnp.einsum('bnc,dc->bnd', yp, wk, precision=hp) + bk
    v = jnp.einsum('bnc,dc->bnd', yp, wv, precision=hp) + bv
    att = jax.nn.softmax(
        jnp.einsum('bnd,bmd->bnm', q, k, precision=hp) / np.sqrt(C), axis=-1)
    ctx = jnp.einsum('bnm,bmd->bnd', att, v, precision=hp)
    p = jnp.einsum('bnd,ed->bne', ctx, wo, precision=hp) + bo          # (B, N, C)
    p_out = p.transpose(0, 2, 1).reshape(B, C, H, W)

    # channel attention branch
    yc = conv3x3(x, wc, bc).reshape(B, C, N)                           # (B, C, N)
    att_c = jax.nn.softmax(
        jnp.einsum('bcn,bdn->bcd', yc, yc, precision=hp) / np.sqrt(N), axis=-1)
    ctx_c = jnp.einsum('bcd,bdn->bcn', att_c, yc, precision=hp)
    c = jnp.einsum('bcn,mn->bcm', ctx_c, wco, precision=hp) + bco      # (B, C, N)
    c_out = c.reshape(B, C, H, W)

    return p_out + c_out


if __name__ == "__main__":
    # small shapes consistent with DAModule: d_model=C, H=W spatial, N=H*W
    B, C, H, W = 2, 32, 16, 16
    N = H * W

    key = jax.random.PRNGKey(0)
    ks = jax.random.split(key, 16)
    x = jax.random.normal(ks[0], (B, C, H, W), jnp.float32)

    def winit(k, shape, scale):
        return jax.random.normal(k, shape, jnp.float32) * scale

    params = (
        winit(ks[1], (C, C, 3, 3), 0.06), winit(ks[2], (C,), 0.05),    # position conv
        winit(ks[3], (C, C), 0.15),       winit(ks[4], (C,), 0.05),    # fc_q
        winit(ks[5], (C, C), 0.15),       winit(ks[6], (C,), 0.05),    # fc_k
        winit(ks[7], (C, C), 0.15),       winit(ks[8], (C,), 0.05),    # fc_v
        winit(ks[9], (C, C), 0.15),       winit(ks[10], (C,), 0.05),   # fc_o (position)
        winit(ks[11], (C, C, 3, 3), 0.06), winit(ks[12], (C,), 0.05),  # channel conv
        winit(ks[13], (N, N), 0.06),      winit(ks[14], (N,), 0.05),   # fc_o (channel)
    )

    out = jax.block_until_ready(da_module_pallas(x, params))
    ref = jax.block_until_ready(da_module_ref(x, params))

    np.testing.assert_allclose(np.asarray(out), np.asarray(ref),
                               rtol=2e-2, atol=2e-2)
    print("KERNEL_OK")
</pallas_src>

<mosaic_0001>
module attributes {stable_mosaic.version = 11 : i64} {
  func.func @kernel(%arg0: i32, %arg1: memref<1x32x256xf32, #tpu.memory_space<vmem>>, %arg2: memref<9x256xf32, #tpu.memory_space<vmem>>, %arg3: memref<64x288xf32, #tpu.memory_space<vmem>>, %arg4: memref<64x1xf32, #tpu.memory_space<vmem>>, %arg5: memref<96x32xf32, #tpu.memory_space<vmem>>, %arg6: memref<96x1xf32, #tpu.memory_space<vmem>>, %arg7: memref<32x32xf32, #tpu.memory_space<vmem>>, %arg8: memref<32x1xf32, #tpu.memory_space<vmem>>, %arg9: memref<256x256xf32, #tpu.memory_space<vmem>>, %arg10: memref<1x256xf32, #tpu.memory_space<vmem>>, %arg11: memref<1x32x256xf32, #tpu.memory_space<vmem>>) attributes {dimension_semantics = [#tpu.dimension_semantics<parallel>], iteration_bounds = array<i64: 2>, scalar_prefetch = 0 : i64, scratch_operands = 0 : i64, tpu.core_type = #tpu.core_type<tc>, window_params = [{transform_indices = @transform_0, window_bounds = array<i64: 1, 32, 256>}, {pipeline_mode = #tpu.pipeline_mode<synchronous>, transform_indices = @transform_1, window_bounds = array<i64: 9, 256>}, {pipeline_mode = #tpu.pipeline_mode<synchronous>, transform_indices = @transform_2, window_bounds = array<i64: 64, 288>}, {pipeline_mode = #tpu.pipeline_mode<synchronous>, transform_indices = @transform_3, window_bounds = array<i64: 64, 1>}, {pipeline_mode = #tpu.pipeline_mode<synchronous>, transform_indices = @transform_4, window_bounds = array<i64: 96, 32>}, {pipeline_mode = #tpu.pipeline_mode<synchronous>, transform_indices = @transform_5, window_bounds = array<i64: 96, 1>}, {pipeline_mode = #tpu.pipeline_mode<synchronous>, transform_indices = @transform_6, window_bounds = array<i64: 32, 32>}, {pipeline_mode = #tpu.pipeline_mode<synchronous>, transform_indices = @transform_7, window_bounds = array<i64: 32, 1>}, {pipeline_mode = #tpu.pipeline_mode<synchronous>, transform_indices = @transform_8, window_bounds = array<i64: 256, 256>}, {pipeline_mode = #tpu.pipeline_mode<synchronous>, transform_indices = @transform_9, window_bounds = array<i64: 1, 256>}, {transform_indices = @transform_10, window_bounds = array<i64: 1, 32, 256>}]} {
    %c0 = arith.constant 0 : index
    %c0_0 = arith.constant 0 : index
    %c0_1 = arith.constant 0 : index
    %0 = vector.load %arg1[%c0, %c0_0, %c0_1] : memref<1x32x256xf32, #tpu.memory_space<vmem>>, vector<1x32x256xf32>
    %1 = vector.shape_cast %0 : vector<1x32x256xf32> to vector<32x256xf32>
    %c17_i32 = arith.constant 17 : i32
    %2 = tpu.dynamic_rotate %1 by %c17_i32 dim 1 : vector<32x256xf32>, i32 -> vector<32x256xf32>
    %c0_2 = arith.constant 0 : index
    %c0_3 = arith.constant 0 : index
    %3 = vector.load %arg2[%c0_2, %c0_3] : memref<9x256xf32, #tpu.memory_space<vmem>>, vector<1x256xf32>
    %4 = vector.broadcast %3 : vector<1x256xf32> to vector<32x256xf32>
    %5 = arith.mulf %2, %4 : vector<32x256xf32>
    %c16_i32 = arith.constant 16 : i32
    %6 = tpu.dynamic_rotate %1 by %c16_i32 dim 1 : vector<32x256xf32>, i32 -> vector<32x256xf32>
    %c1 = arith.constant 1 : index
    %c0_4 = arith.constant 0 : index
    %7 = vector.load %arg2[%c1, %c0_4] : memref<9x256xf32, #tpu.memory_space<vmem>>, vector<1x256xf32>
    %8 = vector.broadcast %7 : vector<1x256xf32> to vector<32x256xf32>
    %9 = arith.mulf %6, %8 : vector<32x256xf32>
    %c15_i32 = arith.constant 15 : i32
    %10 = tpu.dynamic_rotate %1 by %c15_i32 dim 1 : vector<32x256xf32>, i32 -> vector<32x256xf32>
    %c2 = arith.constant 2 : index
    %c0_5 = arith.constant 0 : index
    %11 = vector.load %arg2[%c2, %c0_5] : memref<9x256xf32, #tpu.memory_space<vmem>>, vector<1x256xf32>
    %12 = vector.broadcast %11 : vector<1x256xf32> to vector<32x256xf32>
    %13 = arith.mulf %10, %12 : vector<32x256xf32>
    %c1_i32 = arith.constant 1 : i32
    %14 = tpu.dynamic_rotate %1 by %c1_i32 dim 1 : vector<32x256xf32>, i32 -> vector<32x256xf32>
    %c3 = arith.constant 3 : index
    %c0_6 = arith.constant 0 : index
    %15 = vector.load %arg2[%c3, %c0_6] : memref<9x256xf32, #tpu.memory_space<vmem>>, vector<1x256xf32>
    %16 = vector.broadcast %15 : vector<1x256xf32> to vector<32x256xf32>
    %17 = arith.mulf %14, %16 : vector<32x256xf32>
    %c255_i32 = arith.constant 255 : i32
    %18 = tpu.dynamic_rotate %1 by %c255_i32 dim 1 : vector<32x256xf32>, i32 -> vector<32x256xf32>
    %c5 = arith.constant 5 : index
    %c0_7 = arith.constant 0 : index
    %19 = vector.load %arg2[%c5, %c0_7] : memref<9x256xf32, #tpu.memory_space<vmem>>, vector<1x256xf32>
    %20 = vector.broadcast %19 : vector<1x256xf32> to vector<32x256xf32>
    %21 = arith.mulf %18, %20 : vector<32x256xf32>
    %c241_i32 = arith.constant 241 : i32
    %22 = tpu.dynamic_rotate %1 by %c241_i32 dim 1 : vector<32x256xf32>, i32 -> vector<32x256xf32>
    %c6 = arith.constant 6 : index
    %c0_8 = arith.constant 0 : index
    %23 = vector.load %arg2[%c6, %c0_8] : memref<9x256xf32, #tpu.memory_space<vmem>>, vector<1x256xf32>
    %24 = vector.broadcast %23 : vector<1x256xf32> to vector<32x256xf32>
    %25 = arith.mulf %22, %24 : vector<32x256xf32>
    %c240_i32 = arith.constant 240 : i32
    %26 = tpu.dynamic_rotate %1 by %c240_i32 dim 1 : vector<32x256xf32>, i32 -> vector<32x256xf32>
    %c7 = arith.constant 7 : index
    %c0_9 = arith.constant 0 : index
    %27 = vector.load %arg2[%c7, %c0_9] : memref<9x256xf32, #tpu.memory_space<vmem>>, vector<1x256xf32>
    %28 = vector.broadcast %27 : vector<1x256xf32> to vector<32x256xf32>
    %29 = arith.mulf %26, %28 : vector<32x256xf32>
    %c239_i32 = arith.constant 239 : i32
    %30 = tpu.dynamic_rotate %1 by %c239_i32 dim 1 : vector<32x256xf32>, i32 -> vector<32x256xf32>
    %c8 = arith.constant 8 : index
    %c0_10 = arith.constant 0 : index
    %31 = vector.load %arg2[%c8, %c0_10] : memref<9x256xf32, #tpu.memory_space<vmem>>, vector<1x256xf32>
    %32 = vector.broadcast %31 : vector<1x256xf32> to vector<32x256xf32>
    %33 = arith.mulf %30, %32 : vector<32x256xf32>
    %34 = tpu.concatenate %5, %9, %13, %17, %1, %21, %25, %29, %33 in 0 : vector<32x256xf32>, vector<32x256xf32>, vector<32x256xf32>, vector<32x256xf32>, vector<32x256xf32>, vector<32x256xf32>, vector<32x256xf32>, vector<32x256xf32>, vector<32x256xf32> -> vector<288x256xf32>
    %c0_11 = arith.constant 0 : index
    %c0_12 = arith.constant 0 : index
    %35 = vector.load %arg3[%c0_11, %c0_12] : memref<64x288xf32, #tpu.memory_space<vmem>>, vector<64x288xf32>
    %cst = arith.constant dense<0.000000e+00> : vector<64x256xf32>
    %36 = tpu.matmul %35, %34, %cst {dimension_numbers = #tpu.dot_dimension_numbers<[1], [0], [0], [1], [0, 0, 1, 1], [], []>} : vector<64x288xf32>, vector<288x256xf32>, vector<64x256xf32> -> vector<64x256xf32>
    %c0_13 = arith.constant 0 : index
    %c0_14 = arith.constant 0 : index
    %37 = vector.load %arg4[%c0_13, %c0_14] : memref<64x1xf32, #tpu.memory_space<vmem>>, vector<64x1xf32>
    %38 = vector.broadcast %37 : vector<64x1xf32> to vector<64x256xf32>
    %39 = arith.addf %36, %38 : vector<64x256xf32>
    %40 = vector.extract_strided_slice %39 {offsets = [0, 0], sizes = [32, 256], strides = [1, 1]} : vector<64x256xf32> to vector<32x256xf32>
    %41 = vector.extract_strided_slice %39 {offsets = [32, 0], sizes = [32, 256], strides = [1, 1]} : vector<64x256xf32> to vector<32x256xf32>
    %c0_15 = arith.constant 0 : index
    %c0_16 = arith.constant 0 : index
    %42 = vector.load %arg5[%c0_15, %c0_16] : memref<96x32xf32, #tpu.memory_space<vmem>>, vector<96x32xf32>
    %cst_17 = arith.constant dense<0.000000e+00> : vector<96x256xf32>
    %43 = tpu.matmul %42, %40, %cst_17 {dimension_numbers = #tpu.dot_dimension_numbers<[1], [0], [0], [1], [0, 0, 1, 1], [], []>} : vector<96x32xf32>, vector<32x256xf32>, vector<96x256xf32> -> vector<96x256xf32>
    %c0_18 = arith.constant 0 : index
    %c0_19 = arith.constant 0 : index
    %44 = vector.load %arg6[%c0_18, %c0_19] : memref<96x1xf32, #tpu.memory_space<vmem>>, vector<96x1xf32>
    %45 = vector.broadcast %44 : vector<96x1xf32> to vector<96x256xf32>
    %46 = arith.addf %43, %45 : vector<96x256xf32>
    %47 = vector.extract_strided_slice %46 {offsets = [0, 0], sizes = [32, 256], strides = [1, 1]} : vector<96x256xf32> to vector<32x256xf32>
    %48 = vector.extract_strided_slice %46 {offsets = [32, 0], sizes = [32, 256], strides = [1, 1]} : vector<96x256xf32> to vector<32x256xf32>
    %49 = vector.extract_strided_slice %46 {offsets = [64, 0], sizes = [32, 256], strides = [1, 1]} : vector<96x256xf32> to vector<32x256xf32>
    %50 = tpu.transpose %47, [1, 0] : vector<32x256xf32> -> vector<256x32xf32>
    %cst_20 = arith.constant dense<0.000000e+00> : vector<256x256xf32>
    %51 = tpu.matmul %50, %48, %cst_20 {dimension_numbers = #tpu.dot_dimension_numbers<[1], [0], [0], [1], [0, 0, 1, 1], [], []>} : vector<256x32xf32>, vector<32x256xf32>, vector<256x256xf32> -> vector<256x256xf32>
    %cst_21 = arith.constant 0.176776692 : f32
    %52 = vector.broadcast %cst_21 : f32 to vector<256x256xf32>
    %53 = arith.mulf %51, %52 : vector<256x256xf32>
    %cst_22 = arith.constant dense<0xFF800000> : vector<256xf32>
    %54 = vector.multi_reduction <maximumf>, %53, %cst_22 [1] : vector<256x256xf32> to vector<256xf32>
    %55 = vector.shape_cast %54 : vector<256xf32> to vector<256x1xf32>
    %56 = vector.broadcast %55 : vector<256x1xf32> to vector<256x256xf32>
    %57 = arith.subf %53, %56 : vector<256x256xf32>
    %58 = math.exp %57 : vector<256x256xf32>
    %cst_23 = arith.constant dense<0.000000e+00> : vector<256xf32>
    %59 = vector.multi_reduction <add>, %58, %cst_23 [1] : vector<256x256xf32> to vector<256xf32>
    %60 = vector.shape_cast %59 : vector<256xf32> to vector<256x1xf32>
    %61 = tpu.reciprocal %60 {approx = true} : vector<256x1xf32> -> vector<256x1xf32>
    %62 = vector.broadcast %61 : vector<256x1xf32> to vector<256x256xf32>
    %63 = arith.mulf %58, %62 : vector<256x256xf32>
    %64 = tpu.transpose %49, [1, 0] : vector<32x256xf32> -> vector<256x32xf32>
    %cst_24 = arith.constant dense<0.000000e+00> : vector<256x32xf32>
    %65 = tpu.matmul %63, %64, %cst_24 {dimension_numbers = #tpu.dot_dimension_numbers<[1], [0], [0], [1], [0, 0, 1, 1], [], []>} : vector<256x256xf32>, vector<256x32xf32>, vector<256x32xf32> -> vector<256x32xf32>
    %66 = tpu.transpose %65, [1, 0] : vector<256x32xf32> -> vector<32x256xf32>
    %c0_25 = arith.constant 0 : index
    %c0_26 = arith.constant 0 : index
    %67 = vector.load %arg7[%c0_25, %c0_26] : memref<32x32xf32, #tpu.memory_space<vmem>>, vector<32x32xf32>
    %cst_27 = arith.constant dense<0.000000e+00> : vector<32x256xf32>
    %68 = tpu.matmul %67, %66, %cst_27 {dimension_numbers = #tpu.dot_dimension_numbers<[1], [0], [0], [1], [0, 0, 1, 1], [], []>} : vector<32x32xf32>, vector<32x256xf32>, vector<32x256xf32> -> vector<32x256xf32>
    %c0_28 = arith.constant 0 : index
    %c0_29 = arith.constant 0 : index
    %69 = vector.load %arg8[%c0_28, %c0_29] : memref<32x1xf32, #tpu.memory_space<vmem>>, vector<32x1xf32>
    %70 = vector.broadcast %69 : vector<32x1xf32> to vector<32x256xf32>
    %71 = arith.addf %68, %70 : vector<32x256xf32>
    %72 = tpu.transpose %41, [1, 0] : vector<32x256xf32> -> vector<256x32xf32>
    %cst_30 = arith.constant dense<0.000000e+00> : vector<32x32xf32>
    %73 = tpu.matmul %41, %72, %cst_30 {dimension_numbers = #tpu.dot_dimension_numbers<[1], [0], [0], [1], [0, 0, 1, 1], [], []>} : vector<32x256xf32>, vector<256x32xf32>, vector<32x32xf32> -> vector<32x32xf32>
    %cst_31 = arith.constant 6.250000e-02 : f32
    %74 = vector.broadcast %cst_31 : f32 to vector<32x32xf32>
    %75 = arith.mulf %73, %74 : vector<32x32xf32>
    %cst_32 = arith.constant dense<0xFF800000> : vector<32xf32>
    %76 = vector.multi_reduction <maximumf>, %75, %cst_32 [1] : vector<32x32xf32> to vector<32xf32>
    %77 = vector.shape_cast %76 : vector<32xf32> to vector<32x1xf32>
    %78 = vector.broadcast %77 : vector<32x1xf32> to vector<32x32xf32>
    %79 = arith.subf %75, %78 : vector<32x32xf32>
    %80 = math.exp %79 : vector<32x32xf32>
    %cst_33 = arith.constant dense<0.000000e+00> : vector<32xf32>
    %81 = vector.multi_reduction <add>, %80, %cst_33 [1] : vector<32x32xf32> to vector<32xf32>
    %82 = vector.shape_cast %81 : vector<32xf32> to vector<32x1xf32>
    %83 = tpu.reciprocal %82 {approx = true} : vector<32x1xf32> -> vector<32x1xf32>
    %84 = vector.broadcast %83 : vector<32x1xf32> to vector<32x32xf32>
    %85 = arith.mulf %80, %84 : vector<32x32xf32>
    %cst_34 = arith.constant dense<0.000000e+00> : vector<32x256xf32>
    %86 = tpu.matmul %85, %41, %cst_34 {dimension_numbers = #tpu.dot_dimension_numbers<[1], [0], [0], [1], [0, 0, 1, 1], [], []>} : vector<32x32xf32>, vector<32x256xf32>, vector<32x256xf32> -> vector<32x256xf32>
    %c0_35 = arith.constant 0 : index
    %c0_36 = arith.constant 0 : index
    %87 = vector.load %arg9[%c0_35, %c0_36] : memref<256x256xf32, #tpu.memory_space<vmem>>, vector<256x256xf32>
    %cst_37 = arith.constant dense<0.000000e+00> : vector<32x256xf32>
    %88 = tpu.matmul %86, %87, %cst_37 {dimension_numbers = #tpu.dot_dimension_numbers<[1], [0], [0], [1], [0, 0, 1, 1], [], []>} : vector<32x256xf32>, vector<256x256xf32>, vector<32x256xf32> -> vector<32x256xf32>
    %c0_38 = arith.constant 0 : index
    %c0_39 = arith.constant 0 : index
    %89 = vector.load %arg10[%c0_38, %c0_39] : memref<1x256xf32, #tpu.memory_space<vmem>>, vector<1x256xf32>
    %90 = vector.broadcast %89 : vector<1x256xf32> to vector<32x256xf32>
    %91 = arith.addf %88, %90 : vector<32x256xf32>
    %92 = arith.addf %71, %91 : vector<32x256xf32>
    %c0_40 = arith.constant 0 : index
    %c0_41 = arith.constant 0 : index
    %c0_42 = arith.constant 0 : index
    %93 = vector.load %arg11[%c0_40, %c0_41, %c0_42] : memref<1x32x256xf32, #tpu.memory_space<vmem>>, vector<1x32x256xf32>
    %94 = vector.shape_cast %93 : vector<1x32x256xf32> to vector<32x256xf32>
    %95 = vector.shape_cast %92 : vector<32x256xf32> to vector<1x32x256xf32>
    tpu.vector_store %arg11[%c0_40, %c0_41, %c0_42], %95 {strides = array<i32>} : memref<1x32x256xf32, #tpu.memory_space<vmem>>, vector<1x32x256xf32>,
    return
  }
  func.func @transform_0(%arg0: i32) -> (i32, i32, i32) {
    %c0_i32 = arith.constant 0 : i32
    %c0_i32_0 = arith.constant 0 : i32
    %c0_i32_1 = arith.constant 0 : i32
    return %arg0, %c0_i32, %c0_i32_0 : i32, i32, i32
  }
  func.func @transform_1(%arg0: i32) -> (i32, i32) {
    %c0_i32 = arith.constant 0 : i32
    %c0_i32_0 = arith.constant 0 : i32
    %c0_i32_1 = arith.constant 0 : i32
    return %c0_i32, %c0_i32_0 : i32, i32
  }
  func.func @transform_2(%arg0: i32) -> (i32, i32) {
    %c0_i32 = arith.constant 0 : i32
    %c0_i32_0 = arith.constant 0 : i32
    %c0_i32_1 = arith.constant 0 : i32
    return %c0_i32, %c0_i32_0 : i32, i32
  }
  func.func @transform_3(%arg0: i32) -> (i32, i32) {
    %c0_i32 = arith.constant 0 : i32
    %c0_i32_0 = arith.constant 0 : i32
    %c0_i32_1 = arith.constant 0 : i32
    return %c0_i32, %c0_i32_0 : i32, i32
  }
  func.func @transform_4(%arg0: i32) -> (i32, i32) {
    %c0_i32 = arith.constant 0 : i32
    %c0_i32_0 = arith.constant 0 : i32
    %c0_i32_1 = arith.constant 0 : i32
    return %c0_i32, %c0_i32_0 : i32, i32
  }
  func.func @transform_5(%arg0: i32) -> (i32, i32) {
    %c0_i32 = arith.constant 0 : i32
    %c0_i32_0 = arith.constant 0 : i32
    %c0_i32_1 = arith.constant 0 : i32
    return %c0_i32, %c0_i32_0 : i32, i32
  }
  func.func @transform_6(%arg0: i32) -> (i32, i32) {
    %c0_i32 = arith.constant 0 : i32
    %c0_i32_0 = arith.constant 0 : i32
    %c0_i32_1 = arith.constant 0 : i32
    return %c0_i32, %c0_i32_0 : i32, i32
  }
  func.func @transform_7(%arg0: i32) -> (i32, i32) {
    %c0_i32 = arith.constant 0 : i32
    %c0_i32_0 = arith.constant 0 : i32
    %c0_i32_1 = arith.constant 0 : i32
    return %c0_i32, %c0_i32_0 : i32, i32
  }
  func.func @transform_8(%arg0: i32) -> (i32, i32) {
    %c0_i32 = arith.constant 0 : i32
    %c0_i32_0 = arith.constant 0 : i32
    %c0_i32_1 = arith.constant 0 : i32
    return %c0_i32, %c0_i32_0 : i32, i32
  }
  func.func @transform_9(%arg0: i32) -> (i32, i32) {
    %c0_i32 = arith.constant 0 : i32
    %c0_i32_0 = arith.constant 0 : i32
    %c0_i32_1 = arith.constant 0 : i32
    return %c0_i32, %c0_i32_0 : i32, i32
  }
  func.func @transform_10(%arg0: i32) -> (i32, i32, i32) {
    %c0_i32 = arith.constant 0 : i32
    %c0_i32_0 = arith.constant 0 : i32
    %c0_i32_1 = arith.constant 0 : i32
    return %arg0, %c0_i32, %c0_i32_0 : i32, i32, i32
  }
}

</mosaic_0001>

<bundles_post_ra>
// kernel: tpu_custom_call.1
= control target key start
LH: loop header
LB: loop body
LE: loop exit
PB: predicated region body
PF: predicated region fallthrough
CT: control target
= control target key end

     0   :  { %15 = vsyncpa [#allocation3], 0  ;;  %s5381_s0 = inlined_call_operand.vmem [shape: f32[2,32,256], index: 0, kind: input, shape index: {}]   ;;  %s5382_s1 = inlined_call_operand.hbm [shape: f32[9,256], index: 1, kind: input, shape index: {}]   ;;  %s5383_s2 = inlined_call_operand.vmem [shape: f32[64,288], index: 2, kind: input, shape index: {}]   ;;  %s5384_s3 = inlined_call_operand.vmem [shape: f32[64,1], index: 3, kind: input, shape index: {}]   ;;  %s5385_s4 = inlined_call_operand.vmem [shape: f32[96,32], index: 4, kind: input, shape index: {}]   ;;  %s5386_s5 = inlined_call_operand.vmem [shape: f32[96,1], index: 5, kind: input, shape index: {}]   ;;  %s5387_s6 = inlined_call_operand.hbm [shape: f32[32,32], index: 6, kind: input, shape index: {}]   ;;  %s5388_s7 = inlined_call_operand.vmem [shape: f32[32,1], index: 7, kind: input, shape index: {}]   ;;  %s5389_s8 = inlined_call_operand.hbm [shape: f32[256,256], index: 8, kind: input, shape index: {}]   ;;  %s5390_s9 = inlined_call_operand.vmem [shape: f32[1,256], index: 9, kind: input, shape index: {}]   ;;  %s5391_s10 = inlined_call_operand.hbm [shape: f32[2,32,256], index: 10, kind: output, shape index: {}]  }
   0x1   :  { %16 = vsyncpa [#allocation6], 0 }
   0x2   :  { %17 = vsyncpa [#allocation4], 0 }
   0x3   :  { %19 = vsyncpa [#allocation4 + $0x1], 0  ;;  %s3961_s13 = smov 0   ;;  %s3963_s14 = smov 0  }
   0x4   :  { %s3965_s15 = smov 0   ;;  %s3967_s16 = smov 0  }
   0x5 LB: > { %5417 = sst [smem:[#allocation12_spill]] %s3881_s15  ;;  %s3982_s17 = sadd.s32 4294967295, %s3885_s16   ;;  %s3885_s16 = sphi %s3967_s16, %s5499_s16   ;;  %s3881_s15 = sphi %s3965_s15, %s5496_s15   ;;  %s3877_s14 = sphi %s3963_s14, %s5498_s14   ;;  %s3873_s13 = sphi %s3961_s13, %s5497_s13  }
   0x6   : > { %s3292_s18 = sadd.s32 4294967294, %s3885_s16   ;;  %s3986_s19 = sadd.s32 1, %s3885_s16  }
   0x7   : > { %s247_s20 = sadd.s32 1, %s3881_s15  ;;  %s244_s21 = ssub.s32 %s3885_s16, %s3986_s19 }
   0x8   : > { %p257_p0 = scmp.ne.s32.totalorder %s3881_s15, %s3877_s14  ;;  %p245_p1 = scmp.eq.s32.totalorder %s244_s21, 0 }
   0x9   : > { %p258_p2 = scmp.eq.s32.totalorder %s3982_s17, 1  ;;  %p263_p3 = scmp.ne.s32.totalorder %s3877_s14, %s3873_s13 }
   0xa   : > { %p264_p4 = scmp.eq.s32.totalorder %s3292_s18, 1  ;;  %p3293_p7 = scmp.ge.s32.totalorder %s3885_s16, 1 }
   0xb   : > { %s3997_s22 = scalar_select %p245_p1, %s3881_s15, %s247_s20  }
   0xc   : > { %p3999_p5 = por %p258_p2, %p257_p0  ;;  %p4003_p6 = por %p264_p4, %p263_p3 }
   0xd   : > { %5418 = sst [smem:[#allocation13_spill]] %s3997_s22  ;;  %p271_p8 = scmp.lt.s32.totalorder %s3885_s16, 3 }
   0xe   : > { %s5420_s24 = scalar_select %p4003_p6, 1, 0 }
   0xf   : > { %p5392_p9 = scmp.eq.s32.totalorder %s3982_s17, 0  ;;  %p4010_p10 = pnand %p3293_p7, %p271_p8 }
  0x10   : > { %s3887_s26 = smov [#allocation5]   ;;  %s3888_s29 = smov [#allocation2]  }
  0x11   : > { %s308_s27 = sshll.u32 %s3887_s26, 4  ;;  %p3458_p11 = pneg %p4010_p10  ;;  %s309_s27 = int_to_ptr.vmem [resolvable:$true] %s308_s27 }
  0x12   : > { %s283_s30 = sshll.u32 %s3888_s29, 4  ;;  %s3750_s11 = scalar_lea.vmem %s309_s27, 512  ;;  %s284_s30 = int_to_ptr.vmem [resolvable:$true] %s283_s30 }
  0x13   : > { %p4018_p12 = pnand %p5392_p9, %p3458_p11  ;;  %p3751_p0 = scmp.ne.s32.totalorder %s309_s27, %s3750_s11 }
  0x14   : > { %p3758_p3 = scmp.lt.s32.totalorder %s309_s27, %s309_s27  ;;  %p3759_p4 = scmp.lt.s32.totalorder %s3750_s11, %s3750_s11 }
  0x15   : > { %p3741_p13 = pneg %p4018_p12 }
  0x16   : > { %p3760_p7 = por %p3759_p4, %p3758_p3 }
  0x17   : > { %p3753_p1 = pnand %p3751_p0, %p3741_p13 }
  0x19   : > { %p3754_p2 = pneg %p3753_p1 }
  0x1b   : > { %p3761_p8 = pnand %p3760_p7, %p3754_p2 }
  0x1d   : > { %3764 = shalt.err (!%p3761_p8)
}
  0x1e   : > { %s3889_s12 = smov 128   ;;  %s3890_s18 = smov 8  }
  0x1f   : > { %3464 = dma.hbm_to_vmem [thread:$0]  (!%p4018_p12), %s5387_s6, 512, %s309_s27, [#allocation6], %s3889_s12, %s3889_s12, %s3890_s18  }
  0x20   : > { %s3776_s26 = scalar_lea.vmem %s284_s30, 512  ;;  %p3784_p9 = scmp.lt.s32.totalorder %s284_s30, %s284_s30 }
  0x21   : > { %p3777_p11 = scmp.ne.s32.totalorder %s284_s30, %s3776_s26  ;;  %p3785_p6 = scmp.lt.s32.totalorder %s3776_s26, %s3776_s26 }
  0x23   : > { %p3779_p0 = pnand %p3777_p11, %p3741_p13  ;;  %p3786_p3 = por %p3785_p6, %p3784_p9 }
  0x25   : > { %p3780_p1 = pneg %p3779_p0 }
  0x27   : > { %p3787_p2 = pnand %p3786_p3, %p3780_p1 }
  0x29   : > { %3790 = shalt.err (!%p3787_p2)
}
  0x2a   : > { %s3891_s29 = smov 256   ;;  %s3892_s11 = smov 16  }
  0x2b   : > { %3461 = dma.hbm_to_vmem [thread:$0]  (!%p4018_p12), %s5382_s1, 512, %s284_s30, [#allocation3], %s3891_s29, %s3891_s29, %s3892_s11  }
  0x2c   : > { %s3893_s27 = smov [#allocation7]  }
  0x2d   : > { %s324_s12 = sshll.u32 %s3893_s27, 4  ;;  %s325_s12 = int_to_ptr.vmem [resolvable:$true] %s324_s12 }
  0x2e   : > { %s3802_s18 = scalar_lea.vmem %s325_s12, 8192  ;;  %p3810_p9 = scmp.lt.s32.totalorder %s325_s12, %s325_s12 }
  0x2f   : > { %p3803_p4 = scmp.ne.s32.totalorder %s325_s12, %s3802_s18  ;;  %p3811_p8 = scmp.lt.s32.totalorder %s3802_s18, %s3802_s18 }
  0x31   : > { %p3805_p7 = pnand %p3803_p4, %p3741_p13  ;;  %p3812_p11 = por %p3811_p8, %p3810_p9 }
  0x33   : > { %p3806_p6 = pneg %p3805_p7 }
  0x35   : > { %p3813_p0 = pnand %p3812_p11, %p3806_p6 }
  0x37   : > { %3816 = shalt.err (!%p3813_p0)
}
  0x38   : > { %3467 = dma.hbm_to_vmem [thread:$0]  (!%p4018_p12), %s5389_s8, 8192, %s325_s12, [#allocation6], %s3891_s29, %s3891_s29, %s3892_s11  }
  0x39   : > { %351 = sbr.rel (%p4010_p10) target bundleno = 2766 (0xace), region = 60 }
  0x3e   : > { %p5423_p1 = scmp.eq.s32.totalorder %s3982_s17, 0 }
  0x40   : > { %3860 = dma.done.wait (%p5423_p1), [#allocation3], 512   ;;  %p5424_p13 = pmov %p5423_p1 }
  0x41   : > { %p5425_p3 = pmov %p5423_p1 }
  0x42   : > { %3862 = vsyncadd (%p5424_p13), [#allocation3], 4294966784 }
  0x43   : > { %3864 = dma.done.wait (%p5425_p3), [#allocation6], 8704   ;;  %p5426_p2 = pmov %p5423_p1 }
  0x44   : > { %p397_p4 = scmp.lt.s32.totalorder %s3982_s17, 1  ;;  %s3894_s26 = smov 1   ;;  %v426_v8 = vlaneseq  ;;  %v780_v10 = vld [vmem:[%s5383_s2 + $0x8] sm:$0xff]  ;;  %v5394_v19 = vmov 0.0   ;;  %v805_v45 = vld [vmem:[%s5384_s3 + $0x10] sm:$0xff]  ;;  %v806_v46 = vld [vmem:[%s5384_s3 + $0x18] sm:$0xff] }
  0x45   : > { %3866 = vsyncadd (%p5426_p2), [#allocation6], 4294958592  ;;  %s3895_s29 = smov 15   ;;  %s3896_s11 = smov 16   ;;  %940 = vmatprep.mubr.f32.mxu0 %v780_v10  ;;  %1053 = vmatprep.mubr.f32.mxu1 %v5394_v19  ;;  %v3903_v49 = vmov 0   ;;  %v804_v54 = vld [vmem:[%s5384_s3 + $0x8] sm:$0xff] }
  0x46   : > { %s398_s15 = scalar_select %p397_p4, %s3982_s17, 1  ;;  %v440_v9 = vshrl.u32 %v426_v8, 7  ;;  %v4150_v11 = vand.u32 127, %v426_v8  ;;  %v575_v14 = vld [vmem:[#allocation2 + $0x3] ss:$8 sm:$0x3]  ;;  %3530 = vset.pattern.permute.xlu1 %v3903_v49  ;;  %3529 = vset.pattern.permute.xlu0 %v3903_v49 }
  0x47   : > { %s3897_s27 = smov 17   ;;  %s3898_s12 = smov 112   ;;  %v529_v36 = vld [vmem:[#allocation2 + $0x2] ss:$8 sm:$0x3]  ;;  %vm851_vm8 = vcmask 261120  }
  0x48   : > { %s3402_s22 = sshll.u32 %s398_s15, 6  ;;  %s3899_s18 = smov 113   ;;  %v4152_v12 = vsub.s32 1, %v440_v9  ;;  %v4154_v13 = vsub.s32 0, %v440_v9  ;;  %vm565_vm0 = vcmp.lt.s32.totalorder %v4150_v11, 1  ;;  %vm519_vm1 = vcmp.lt.s32.totalorder %v4150_v11, 15 }
  0x49   : > { %s401_s30 = scalar_lea.vmem %s5381_s0, %s3402_s22  ;;  %s3900_s20 = smov 127   ;;  %v803_v55 = vld [vmem:[%s5384_s3] sm:$0xff]  ;;  %v1115_v63 = vld [vmem:[%s5386_s5 + $0x8] sm:$0xff]  ;;  %vm473_vm2 = vcmp.lt.s32.totalorder %v4150_v11, 16  ;;  %vm428_vm3 = vcmp.lt.s32.totalorder %v4150_v11, 17  ;;  %vm703_vm4 = vcmp.lt.s32.totalorder %v4150_v11, 112 }
  0x4a   : > { %v4063_v0 = vld [vmem:[%s401_s30 + $0x30] sm:$0xff]  ;;  %v4065_v1 = vld [vmem:[%s401_s30 + $0x20] sm:$0xff]  ;;  %v4069_v2 = vld [vmem:[%s401_s30 + $0x38] sm:$0xff]  ;;  %s3901_s22 = smov 111   ;;  %5427 = vst [vmem:[#allocation14_spill] sm:$0xff] %v4152_v12  ;;  %v584_v17 = vrot.slane %v575_v14, %v4152_v12  ;;  %v580_v18 = vrot.slane %v575_v14, %v4154_v13  ;;  %v538_v43 = vrot.slane %v529_v36, %v4152_v12  ;;  %v534_v44 = vrot.slane %v529_v36, %v4154_v13  ;;  %s394_s28 = sand.u32 1, %s3877_s14  }
  0x4b   : > { %555 = vrot.lane.b32.xlu0 %v4063_v0, %s3894_s26  ;;  %553 = vrot.lane.b32.xlu1 %v4065_v1, %s3894_s26  ;;  %v4071_v3 = vld [vmem:[%s401_s30 + $0x28] sm:$0xff]  ;;  %v4075_v4 = vld [vmem:[%s401_s30 + $0x18] sm:$0xff]  ;;  %5428 = vst [vmem:[#allocation15_spill] sm:$0xff] %v4154_v13  ;;  %vm657_vm5 = vcmp.lt.s32.totalorder %v4150_v11, 113  ;;  %vm611_vm6 = vcmp.lt.s32.totalorder %v4150_v11, 127  ;;  %vm749_vm7 = vcmp.lt.s32.totalorder %v4150_v11, 111 }
  0x4c   : > { %v4077_v5 = vld [vmem:[%s401_s30 + $0x10] sm:$0xff]  ;;  %v4081_v6 = vld [vmem:[%s401_s30 + $0x8] sm:$0xff]  ;;  %v4083_v7 = vld [vmem:[%s401_s30] sm:$0xff]  ;;  %s3302_s25 = sshll.u32 %s394_s28, 6  ;;  %s3904_s21 = smov [#allocation8]  }
  0x4d   : > { %v1114_v62 = vld [vmem:[%s5386_s5] sm:$0xff]  ;;  %v788_v11 = vld [vmem:[%s5383_s2 + $0x48] sm:$0xff]  ;;  %s5314_s30 = scalar_lea.vmem [#allocation8], %s3302_s25  ;;  %s3821_s15 = sshll.u32 %s3904_s21, 4  ;;  %s3822_s15 = int_to_ptr.vmem [resolvable:$false] %s3821_s15 }
  0x4f   : > { %563 = vrot.lane.b32.xlu0 %v4069_v2, %s3894_s26  ;;  %561 = vrot.lane.b32.xlu1 %v4071_v3, %s3894_s26 }
  0x53   : > { %559 = vrot.lane.b32.xlu1 %v4075_v4, %s3894_s26  ;;  %551 = vrot.lane.b32.xlu0 %v4077_v5, %s3894_s26 }
  0x57   : > { %557 = vrot.lane.b32.xlu1 %v4081_v6, %s3894_s26  ;;  %549 = vrot.lane.b32.xlu0 %v4083_v7, %s3894_s26  ;;  %s3199_s26 = sshll.u32 %s5314_s30, 4  ;;  %s5329_s26 = int_to_ptr.vmem [resolvable:$true] %s3199_s26 }
  0x58   : > { %p3824_p6 = scmp.lt.s32.totalorder %s5329_s26, %s3822_s15 }
  0x5b   : > { %517 = vrot.lane.b32.xlu1 %v4069_v2, %s3895_s29  ;;  %509 = vrot.lane.b32.xlu0 %v4063_v0, %s3895_s29 }
  0x5f   : > { %515 = vrot.lane.b32.xlu1 %v4071_v3, %s3895_s29  ;;  %507 = vrot.lane.b32.xlu0 %v4065_v1, %s3895_s29 }
  0x63   : > { %513 = vrot.lane.b32.xlu1 %v4075_v4, %s3895_s29  ;;  %505 = vrot.lane.b32.xlu0 %v4077_v5, %s3895_s29 }
  0x67   : > { %511 = vrot.lane.b32.xlu1 %v4081_v6, %s3895_s29  ;;  %503 = vrot.lane.b32.xlu0 %v4083_v7, %s3895_s29  ;;  %s3403_s29 = sshll.u32 %s3982_s17, 10  ;;  %s5340_s17 = scalar_lea.sflag [#allocation4], %s394_s28 }
  0x6b   : > { %471 = vrot.lane.b32.xlu1 %v4069_v2, %s3896_s11  ;;  %463 = vrot.lane.b32.xlu0 %v4063_v0, %s3896_s11 }
  0x6f   : > { %469 = vrot.lane.b32.xlu1 %v4071_v3, %s3896_s11  ;;  %461 = vrot.lane.b32.xlu0 %v4065_v1, %s3896_s11 }
  0x73   : > { %467 = vrot.lane.b32.xlu1 %v4075_v4, %s3896_s11  ;;  %459 = vrot.lane.b32.xlu0 %v4077_v5, %s3896_s11 }
  0x77   : > { %465 = vrot.lane.b32.xlu1 %v4081_v6, %s3896_s11  ;;  %457 = vrot.lane.b32.xlu0 %v4083_v7, %s3896_s11 }
  0x7b   : > { %424 = vrot.lane.b32.xlu1 %v4069_v2, %s3897_s27  ;;  %416 = vrot.lane.b32.xlu0 %v4063_v0, %s3897_s27 }
  0x7f   : > { %422 = vrot.lane.b32.xlu1 %v4071_v3, %s3897_s27  ;;  %414 = vrot.lane.b32.xlu0 %v4065_v1, %s3897_s27 }
  0x83   : > { %420 = vrot.lane.b32.xlu1 %v4075_v4, %s3897_s27  ;;  %412 = vrot.lane.b32.xlu0 %v4077_v5, %s3897_s27 }
  0x87   : > { %418 = vrot.lane.b32.xlu1 %v4081_v6, %s3897_s27  ;;  %410 = vrot.lane.b32.xlu0 %v4083_v7, %s3897_s27 }
  0x8b   : > { %701 = vrot.lane.b32.xlu1 %v4069_v2, %s3898_s12  ;;  %693 = vrot.lane.b32.xlu0 %v4063_v0, %s3898_s12 }
  0x8f   : > { %699 = vrot.lane.b32.xlu1 %v4071_v3, %s3898_s12  ;;  %691 = vrot.lane.b32.xlu0 %v4065_v1, %s3898_s12 }
  0x93   : > { %697 = vrot.lane.b32.xlu1 %v4075_v4, %s3898_s12  ;;  %689 = vrot.lane.b32.xlu0 %v4077_v5, %s3898_s12 }
  0x97   : > { %695 = vrot.lane.b32.xlu1 %v4081_v6, %s3898_s12  ;;  %687 = vrot.lane.b32.xlu0 %v4083_v7, %s3898_s12 }
  0x9b   : > { %655 = vrot.lane.b32.xlu1 %v4069_v2, %s3899_s18  ;;  %647 = vrot.lane.b32.xlu0 %v4063_v0, %s3899_s18 }
  0x9f   : > { %653 = vrot.lane.b32.xlu1 %v4071_v3, %s3899_s18  ;;  %645 = vrot.lane.b32.xlu0 %v4065_v1, %s3899_s18 }
  0xa3   : > { %651 = vrot.lane.b32.xlu1 %v4075_v4, %s3899_s18  ;;  %643 = vrot.lane.b32.xlu0 %v4077_v5, %s3899_s18 }
  0xa7   : > { %649 = vrot.lane.b32.xlu1 %v4081_v6, %s3899_s18  ;;  %641 = vrot.lane.b32.xlu0 %v4083_v7, %s3899_s18  ;;  %s5335_s18 = scalar_lea.hbm %s5391_s10, %s3403_s29 }
  0xab   : > { %609 = vrot.lane.b32.xlu1 %v4069_v2, %s3900_s20  ;;  %601 = vrot.lane.b32.xlu0 %v4063_v0, %s3900_s20 }
  0xaf   : > { %607 = vrot.lane.b32.xlu1 %v4071_v3, %s3900_s20  ;;  %599 = vrot.lane.b32.xlu0 %v4065_v1, %s3900_s20 }
  0xb3   : > { %605 = vrot.lane.b32.xlu1 %v4075_v4, %s3900_s20  ;;  %597 = vrot.lane.b32.xlu0 %v4077_v5, %s3900_s20 }
  0xb7   : > { %603 = vrot.lane.b32.xlu1 %v4081_v6, %s3900_s20  ;;  %595 = vrot.lane.b32.xlu0 %v4083_v7, %s3900_s20  ;;  %s3817_s20 = scalar_lea.vmem %s5329_s26, 1024 }
  0xb8   : > { %p3818_p10 = scmp.ne.s32.totalorder %s5329_s26, %s3817_s20 }
  0xba   : > { %p3819_p12 = pnand %p3818_p10, %p3999_p5 }
  0xbb   : > { %747 = vrot.lane.b32.xlu1 %v4069_v2, %s3901_s22  ;;  %739 = vrot.lane.b32.xlu0 %v4063_v0, %s3901_s22 }
  0xbc   : > { %p3820_p7 = pneg %p3819_p12 }
  0xbd   : > { %v556_v15 = vpop.permute.xlu0 %555  ;;  %v554_v16 = vpop.permute.xlu1 %553 }
  0xbf   : > { %745 = vrot.lane.b32.xlu1 %v4071_v3, %s3901_s22  ;;  %737 = vrot.lane.b32.xlu0 %v4065_v1, %s3901_s22 }
  0xc1   : > { %v564_v20 = vpop.permute.xlu0 %563  ;;  %v562_v21 = vpop.permute.xlu1 %561 }
  0xc2   : > { %v573_v22 = vsel %vm565_vm0, %v564_v20, %v556_v15  ;;  %v568_v23 = vsel %vm565_vm0, %v554_v16, %v562_v21  ;;  %v569_v24 = vsel %vm565_vm0, %v556_v15, %v564_v20  ;;  %v572_v25 = vsel %vm565_vm0, %v562_v21, %v554_v16  ;;  %v1117_v20 = vld [vmem:[%s5386_s5 + $0x18] sm:$0xff] }
  0xc3   : > { %743 = vrot.lane.b32.xlu1 %v4075_v4, %s3901_s22  ;;  %735 = vrot.lane.b32.xlu0 %v4077_v5, %s3901_s22  ;;  %v594_v26 = vmul.f32 %v584_v17, %v569_v24  ;;  %v593_v27 = vmul.f32 %v580_v18, %v573_v22  ;;  %v592_v28 = vmul.f32 %v584_v17, %v568_v23 }
  0xc4   : > { %v591_v31 = vmul.f32 %v580_v18, %v572_v25 }
  0xc5   : > { %876 = vmatprep.subr.mxu0 %v594_v26  ;;  %v560_v29 = vpop.permute.xlu1 %559  ;;  %v552_v30 = vpop.permute.xlu0 %551 }
  0xc6   : > { %v567_v32 = vsel %vm565_vm0, %v552_v30, %v560_v29  ;;  %v571_v33 = vsel %vm565_vm0, %v560_v29, %v552_v30  ;;  %877 = vmatpush1.msra.mxu0 %v593_v27  ;;  %v1121_v29 = vld [vmem:[%s5386_s5 + $0x38] sm:$0xff]  ;;  %v1120_v30 = vld [vmem:[%s5386_s5 + $0x30] sm:$0xff] }
  0xc7   : > { %v589_v34 = vmul.f32 %v580_v18, %v571_v33  ;;  %v590_v35 = vmul.f32 %v584_v17, %v567_v32  ;;  %878 = vmatprep.subr.mxu0 %v592_v28  ;;  %741 = vrot.lane.b32.xlu1 %v4081_v6, %s3901_s22 }
  0xc8   : > { %733 = vrot.lane.b32.xlu0 %v4083_v7, %s3901_s22  ;;  %879 = vmatpush1.msra.mxu0 %v591_v31  ;;  %s3823_s22 = scalar_lea.vmem %s3822_s15, 2048 }
  0xc9   : > { %880 = vmatprep.subr.mxu0 %v590_v35  ;;  %v558_v37 = vpop.permute.xlu1 %557  ;;  %v550_v38 = vpop.permute.xlu0 %549  ;;  %p3825_p9 = scmp.lt.s32.totalorder %s3823_s22, %s3817_s20 }
  0xca   : > { %v566_v39 = vsel %vm565_vm0, %v550_v38, %v558_v37  ;;  %v570_v40 = vsel %vm565_vm0, %v558_v37, %v550_v38  ;;  %881 = vmatpush1.msra.mxu0 %v589_v34  ;;  %v1119_v37 = vld [vmem:[%s5386_s5 + $0x28] sm:$0xff]  ;;  %v1118_v38 = vld [vmem:[%s5386_s5 + $0x20] sm:$0xff] }
  0xcb   : > { %v587_v41 = vmul.f32 %v580_v18, %v570_v40  ;;  %v588_v42 = vmul.f32 %v584_v17, %v566_v39  ;;  %823 = vperm.xlu1 %3530, %v805_v45   ;;  %v483_v17 = vld [vmem:[#allocation2 + $0x1] ss:$8 sm:$0x3]  ;;  %v1116_v18 = vld [vmem:[%s5386_s5 + $0x10] sm:$0xff]  ;;  %p3826_p8 = por %p3825_p9, %p3824_p6 }
  0xcc   : > { %828 = vperm.xlu0 %3529, %v806_v46   ;;  %v492_v25 = vrot.slane %v483_v17, %v4152_v12  ;;  %v488_v28 = vrot.slane %v483_v17, %v4154_v13 }
  0xcd   : > { %v518_v47 = vpop.permute.xlu1 %517  ;;  %882 = vmatprep.subr.mxu0 %v588_v42  ;;  %v510_v48 = vpop.permute.xlu0 %509  ;;  %p3827_p11 = pnand %p3826_p8, %p3820_p7 }
  0xce   : > { %v523_v50 = vsel %vm519_vm1, %v510_v48, %v518_v47  ;;  %v527_v51 = vsel %vm519_vm1, %v518_v47, %v510_v48  ;;  %883 = vmatpush1.msra.mxu0 %v587_v41 }
  0xcf   : > { %v548_v52 = vmul.f32 %v538_v43, %v523_v50  ;;  %v547_v53 = vmul.f32 %v534_v44, %v527_v51  ;;  %818 = vperm.xlu1 %3530, %v804_v54   ;;  %v437_v51 = vld [vmem:[#allocation2] ss:$8 sm:$0x3] }
  0xd0   : > { %813 = vperm.xlu0 %3529, %v803_v55  }
  0xd1   : > { %v516_v56 = vpop.permute.xlu1 %515  ;;  %884 = vmatprep.subr.mxu0 %v548_v52  ;;  %v508_v57 = vpop.permute.xlu0 %507 }
  0xd2   : > { %v522_v58 = vsel %vm519_vm1, %v508_v57, %v516_v56  ;;  %v526_v59 = vsel %vm519_vm1, %v516_v56, %v508_v57  ;;  %885 = vmatpush1.msra.mxu0 %v547_v53 }
  0xd3   : > { %v546_v60 = vmul.f32 %v538_v43, %v522_v58  ;;  %v545_v61 = vmul.f32 %v534_v44, %v526_v59  ;;  %1128 = vperm.xlu1 %3530, %v1114_v62   ;;  %v446_v58 = vrot.slane %v437_v51, %v4152_v12  ;;  %v442_v59 = vrot.slane %v437_v51, %v4154_v13 }
  0xd4   : > { %1133 = vperm.xlu0 %3529, %v1115_v63  }
  0xd5   : > { %v514_v8 = vpop.permute.xlu1 %513  ;;  %886 = vmatprep.subr.mxu0 %v546_v60  ;;  %v506_v9 = vpop.permute.xlu0 %505 }
  0xd6   : > { %v521_v10 = vsel %vm519_vm1, %v506_v9, %v514_v8  ;;  %v525_v14 = vsel %vm519_vm1, %v514_v8, %v506_v9  ;;  %887 = vmatpush1.msra.mxu0 %v545_v61 }
  0xd7   : > { %v544_v15 = vmul.f32 %v538_v43, %v521_v10  ;;  %v543_v16 = vmul.f32 %v534_v44, %v525_v14  ;;  %1138 = vperm.xlu1 %3530, %v1116_v18  }
  0xd8   : > { %1143 = vperm.xlu0 %3529, %v1117_v20  }
  0xd9   : > { %v512_v21 = vpop.permute.xlu1 %511  ;;  %888 = vmatprep.subr.mxu0 %v544_v15  ;;  %v504_v22 = vpop.permute.xlu0 %503 }
  0xda   : > { %v520_v23 = vsel %vm519_vm1, %v504_v22, %v512_v21  ;;  %v524_v24 = vsel %vm519_vm1, %v512_v21, %v504_v22  ;;  %889 = vmatpush1.msra.mxu0 %v543_v16 }
  0xdb   : > { %v542_v26 = vmul.f32 %v538_v43, %v520_v23  ;;  %v541_v27 = vmul.f32 %v534_v44, %v524_v24  ;;  %1163 = vperm.xlu1 %3530, %v1121_v29  }
  0xdc   : > { %1158 = vperm.xlu0 %3529, %v1120_v30  }
  0xdd   : > { %v472_v31 = vpop.permute.xlu1 %471  ;;  %890 = vmatprep.subr.mxu0 %v542_v26  ;;  %v464_v32 = vpop.permute.xlu0 %463  ;;  %v713_v26 = vld [vmem:[#allocation2 + $0x7] ss:$8 sm:$0x3] }
  0xde   : > { %v477_v33 = vsel %vm473_vm2, %v464_v32, %v472_v31  ;;  %v481_v34 = vsel %vm473_vm2, %v472_v31, %v464_v32  ;;  %891 = vmatpush1.msra.mxu0 %v541_v27 }
  0xdf   : > { %v502_v35 = vmul.f32 %v492_v25, %v477_v33  ;;  %v501_v36 = vmul.f32 %v488_v28, %v481_v34  ;;  %1153 = vperm.xlu1 %3530, %v1119_v37   ;;  %v722_v33 = vrot.slane %v713_v26, %v4152_v12  ;;  %v718_v34 = vrot.slane %v713_v26, %v4154_v13 }
  0xe0   : > { %1148 = vperm.xlu0 %3529, %v1118_v38  }
  0xe1   : > { %v470_v39 = vpop.permute.xlu1 %469  ;;  %892 = vmatprep.subr.mxu0 %v502_v35  ;;  %v462_v40 = vpop.permute.xlu0 %461 }
  0xe2   : > { %v476_v41 = vsel %vm473_vm2, %v462_v40, %v470_v39  ;;  %v480_v42 = vsel %vm473_vm2, %v470_v39, %v462_v40  ;;  %893 = vmatpush1.msra.mxu0 %v501_v36 }
  0xe3   : > { %v500_v43 = vmul.f32 %v492_v25, %v476_v41  ;;  %v499_v44 = vmul.f32 %v488_v28, %v480_v42 }
  0xe5   : > { %v468_v45 = vpop.permute.xlu1 %467  ;;  %894 = vmatprep.subr.mxu0 %v500_v43  ;;  %v460_v46 = vpop.permute.xlu0 %459 }
  0xe6   : > { %v475_v47 = vsel %vm473_vm2, %v460_v46, %v468_v45  ;;  %v479_v48 = vsel %vm473_vm2, %v468_v45, %v460_v46  ;;  %895 = vmatpush1.msra.mxu0 %v499_v44 }
  0xe7   : > { %v498_v49 = vmul.f32 %v492_v25, %v475_v47  ;;  %v497_v50 = vmul.f32 %v488_v28, %v479_v48 }
  0xe9   : > { %v466_v52 = vpop.permute.xlu1 %465  ;;  %896 = vmatprep.subr.mxu0 %v498_v49  ;;  %v458_v53 = vpop.permute.xlu0 %457 }
  0xea   : > { %v474_v54 = vsel %vm473_vm2, %v458_v53, %v466_v52  ;;  %v478_v55 = vsel %vm473_vm2, %v466_v52, %v458_v53  ;;  %897 = vmatpush1.msra.mxu0 %v497_v50  ;;  %v667_v53 = vld [vmem:[#allocation2 + $0x6] ss:$8 sm:$0x3] }
  0xeb   : > { %v496_v56 = vmul.f32 %v492_v25, %v474_v54  ;;  %v495_v57 = vmul.f32 %v488_v28, %v478_v55 }
  0xed   : > { %v425_v60 = vpop.permute.xlu1 %424  ;;  %898 = vmatprep.subr.mxu0 %v496_v56  ;;  %v417_v61 = vpop.permute.xlu0 %416 }
  0xee   : > { %v432_v62 = vsel %vm428_vm3, %v417_v61, %v425_v60  ;;  %v436_v63 = vsel %vm428_vm3, %v425_v60, %v417_v61  ;;  %899 = vmatpush1.msra.mxu0 %v495_v57  ;;  %v676_v60 = vrot.slane %v667_v53, %v4152_v12  ;;  %v672_v61 = vrot.slane %v667_v53, %v4154_v13 }
  0xef   : > { %v456_v8 = vmul.f32 %v446_v58, %v432_v62  ;;  %v455_v9 = vmul.f32 %v442_v59, %v436_v63 }
  0xf1   : > { %v423_v10 = vpop.permute.xlu1 %422  ;;  %900 = vmatprep.subr.mxu0 %v456_v8  ;;  %v415_v14 = vpop.permute.xlu0 %414 }
  0xf2   : > { %v431_v15 = vsel %vm428_vm3, %v415_v14, %v423_v10  ;;  %v435_v16 = vsel %vm428_vm3, %v423_v10, %v415_v14  ;;  %901 = vmatpush1.msra.mxu0 %v455_v9 }
  0xf3   : > { %v454_v17 = vmul.f32 %v446_v58, %v431_v15  ;;  %v453_v18 = vmul.f32 %v442_v59, %v435_v16 }
  0xf5   : > { %v421_v20 = vpop.permute.xlu1 %420  ;;  %902 = vmatprep.subr.mxu0 %v454_v17  ;;  %v413_v21 = vpop.permute.xlu0 %412 }
  0xf6   : > { %v430_v22 = vsel %vm428_vm3, %v413_v21, %v421_v20  ;;  %v434_v23 = vsel %vm428_vm3, %v421_v20, %v413_v21  ;;  %903 = vmatpush1.msra.mxu0 %v453_v18 }
  0xf7   : > { %v452_v24 = vmul.f32 %v446_v58, %v430_v22  ;;  %v451_v25 = vmul.f32 %v442_v59, %v434_v23 }
  0xf9   : > { %v419_v27 = vpop.permute.xlu1 %418  ;;  %904 = vmatprep.subr.mxu0 %v452_v24  ;;  %v411_v28 = vpop.permute.xlu0 %410 }
  0xfa   : > { %v429_v29 = vsel %vm428_vm3, %v411_v28, %v419_v27  ;;  %v433_v30 = vsel %vm428_vm3, %v419_v27, %v411_v28  ;;  %905 = vmatpush1.msra.mxu0 %v451_v25  ;;  %v621_v28 = vld [vmem:[#allocation2 + $0x5] ss:$8 sm:$0x3] }
  0xfb   : > { %v450_v31 = vmul.f32 %v446_v58, %v429_v29  ;;  %v449_v32 = vmul.f32 %v442_v59, %v433_v30 }
  0xfd   : > { %v702_v35 = vpop.permute.xlu1 %701  ;;  %906 = vmatprep.subr.mxu0 %v450_v31  ;;  %v694_v36 = vpop.permute.xlu0 %693 }
  0xfe   : > { %v707_v37 = vsel %vm703_vm4, %v694_v36, %v702_v35  ;;  %v711_v38 = vsel %vm703_vm4, %v702_v35, %v694_v36  ;;  %907 = vmatpush1.msra.mxu0 %v449_v32  ;;  %v630_v35 = vrot.slane %v621_v28, %v4152_v12  ;;  %v626_v36 = vrot.slane %v621_v28, %v4154_v13 }
  0xff   : > { %v732_v39 = vmul.f32 %v722_v33, %v711_v38  ;;  %v731_v40 = vmul.f32 %v718_v34, %v707_v37 }
 0x101   : > { %v700_v41 = vpop.permute.xlu1 %699  ;;  %908 = vmatprep.subr.mxu0 %v732_v39  ;;  %v692_v42 = vpop.permute.xlu0 %691 }
 0x102   : > { %v706_v43 = vsel %vm703_vm4, %v692_v42, %v700_v41  ;;  %v710_v44 = vsel %vm703_vm4, %v700_v41, %v692_v42  ;;  %909 = vmatpush2.msra.mxu0 %v731_v40 }
 0x103   : > { %v730_v45 = vmul.f32 %v722_v33, %v710_v44  ;;  %v729_v46 = vmul.f32 %v718_v34, %v706_v43 }
 0x105   : > { %v698_v47 = vpop.permute.xlu1 %697  ;;  %910 = vmatprep.subr.mxu0 %v730_v45  ;;  %v690_v48 = vpop.permute.xlu0 %689 }
 0x106   : > { %v705_v49 = vsel %vm703_vm4, %v690_v48, %v698_v47  ;;  %v709_v50 = vsel %vm703_vm4, %v698_v47, %v690_v48  ;;  %911 = vmatpush2.msra.mxu0 %v729_v46 }
 0x107   : > { %v728_v51 = vmul.f32 %v722_v33, %v709_v50  ;;  %v727_v52 = vmul.f32 %v718_v34, %v705_v49 }
 0x109   : > { %v696_v54 = vpop.permute.xlu1 %695  ;;  %912 = vmatprep.subr.mxu0 %v728_v51  ;;  %v688_v55 = vpop.permute.xlu0 %687 }
 0x10a   : > { %v704_v56 = vsel %vm703_vm4, %v688_v55, %v696_v54  ;;  %v708_v57 = vsel %vm703_vm4, %v696_v54, %v688_v55  ;;  %913 = vmatpush2.msra.mxu0 %v727_v52  ;;  %v759_v55 = vld [vmem:[#allocation2 + $0x10] ss:$8 sm:$0x3] }
 0x10b   : > { %v726_v58 = vmul.f32 %v722_v33, %v708_v57  ;;  %v725_v59 = vmul.f32 %v718_v34, %v704_v56 }
 0x10d   : > { %v656_v62 = vpop.permute.xlu1 %655  ;;  %914 = vmatprep.subr.mxu0 %v726_v58  ;;  %v648_v63 = vpop.permute.xlu0 %647 }
 0x10e   : > { %v661_v8 = vsel %vm657_vm5, %v648_v63, %v656_v62  ;;  %v665_v9 = vsel %vm657_vm5, %v656_v62, %v648_v63  ;;  %915 = vmatpush2.msra.mxu0 %v725_v59  ;;  %v768_v62 = vrot.slane %v759_v55, %v4152_v12  ;;  %v764_v63 = vrot.slane %v759_v55, %v4154_v13 }
 0x10f   : > { %v686_v10 = vmul.f32 %v676_v60, %v665_v9  ;;  %v685_v14 = vmul.f32 %v672_v61, %v661_v8 }
 0x111   : > { %v654_v15 = vpop.permute.xlu1 %653  ;;  %916 = vmatprep.subr.mxu0 %v686_v10  ;;  %v646_v16 = vpop.permute.xlu0 %645 }
 0x112   : > { %v660_v17 = vsel %vm657_vm5, %v646_v16, %v654_v15  ;;  %v664_v18 = vsel %vm657_vm5, %v654_v15, %v646_v16  ;;  %917 = vmatpush2.msra.mxu0 %v685_v14 }
 0x113   : > { %v684_v20 = vmul.f32 %v676_v60, %v664_v18  ;;  %v683_v21 = vmul.f32 %v672_v61, %v660_v17 }
 0x115   : > { %v652_v22 = vpop.permute.xlu1 %651  ;;  %918 = vmatprep.subr.mxu0 %v684_v20  ;;  %v644_v23 = vpop.permute.xlu0 %643 }
 0x116   : > { %v659_v24 = vsel %vm657_vm5, %v644_v23, %v652_v22  ;;  %v663_v25 = vsel %vm657_vm5, %v652_v22, %v644_v23  ;;  %919 = vmatpush2.msra.mxu0 %v683_v21 }
 0x117   : > { %v682_v26 = vmul.f32 %v676_v60, %v663_v25  ;;  %v681_v27 = vmul.f32 %v672_v61, %v659_v24  ;;  %v783_v24 = vld [vmem:[%s5383_s2 + $0x20] sm:$0xff] }
 0x119   : > { %v650_v29 = vpop.permute.xlu1 %649  ;;  %920 = vmatprep.subr.mxu0 %v682_v26  ;;  %v642_v30 = vpop.permute.xlu0 %641 }
 0x11a   : > { %v658_v31 = vsel %vm657_vm5, %v642_v30, %v650_v29  ;;  %v662_v32 = vsel %vm657_vm5, %v650_v29, %v642_v30  ;;  %921 = vmatpush2.msra.mxu0 %v681_v27  ;;  %v786_v27 = vld [vmem:[%s5383_s2 + $0x38] sm:$0xff] }
 0x11b   : > { %v680_v33 = vmul.f32 %v676_v60, %v662_v32  ;;  %v679_v34 = vmul.f32 %v672_v61, %v658_v31  ;;  %v785_v32 = vld [vmem:[%s5383_s2 + $0x30] sm:$0xff] }
 0x11d   : > { %v610_v37 = vpop.permute.xlu1 %609  ;;  %922 = vmatprep.subr.mxu0 %v680_v33  ;;  %v602_v38 = vpop.permute.xlu0 %601  ;;  %v781_v33 = vld [vmem:[%s5383_s2 + $0x10] sm:$0xff] }
 0x11e   : > { %v615_v39 = vsel %vm611_vm6, %v602_v38, %v610_v37  ;;  %v619_v40 = vsel %vm611_vm6, %v610_v37, %v602_v38  ;;  %923 = vmatpush2.msra.mxu0 %v679_v34  ;;  %v789_v34 = vld [vmem:[%s5383_s2 + $0x50] sm:$0xff]  ;;  %v790_v37 = vld [vmem:[%s5383_s2 + $0x58] sm:$0xff] }
 0x11f   : > { %v640_v41 = vmul.f32 %v630_v35, %v619_v40  ;;  %v639_v42 = vmul.f32 %v626_v36, %v615_v39  ;;  %v793_v38 = vld [vmem:[%s5383_s2 + $0x70] sm:$0xff]  ;;  %v796_v39 = vld [vmem:[%s5383_s2 + $0x88] sm:$0xff]  ;;  %v799_v40 = vld [vmem:[%s5383_s2 + $0xa0] sm:$0xff] }
 0x121   : > { %v608_v43 = vpop.permute.xlu1 %607  ;;  %924 = vmatprep.subr.mxu0 %v640_v41  ;;  %v600_v44 = vpop.permute.xlu0 %599  ;;  %v802_v41 = vld [vmem:[%s5383_s2 + $0xb8] sm:$0xff] }
 0x122   : > { %v614_v45 = vsel %vm611_vm6, %v600_v44, %v608_v43  ;;  %v618_v46 = vsel %vm611_vm6, %v608_v43, %v600_v44  ;;  %925 = vmatpush2.msra.mxu0 %v639_v42 }
 0x123   : > { %v638_v47 = vmul.f32 %v630_v35, %v618_v46  ;;  %v637_v48 = vmul.f32 %v626_v36, %v614_v45 }
 0x125   : > { %v606_v49 = vpop.permute.xlu1 %605  ;;  %926 = vmatprep.subr.mxu0 %v638_v47  ;;  %v598_v50 = vpop.permute.xlu0 %597 }
 0x126   : > { %v613_v51 = vsel %vm611_vm6, %v598_v50, %v606_v49  ;;  %v617_v52 = vsel %vm611_vm6, %v606_v49, %v598_v50  ;;  %927 = vmatpush2.msra.mxu0 %v637_v48 }
 0x127   : > { %v636_v53 = vmul.f32 %v630_v35, %v617_v52  ;;  %v635_v54 = vmul.f32 %v626_v36, %v613_v51 }
 0x129   : > { %v604_v56 = vpop.permute.xlu1 %603  ;;  %928 = vmatprep.subr.mxu0 %v636_v53  ;;  %v596_v57 = vpop.permute.xlu0 %595 }
 0x12a   : > { %v612_v58 = vsel %vm611_vm6, %v596_v57, %v604_v56  ;;  %v616_v59 = vsel %vm611_vm6, %v604_v56, %v596_v57  ;;  %929 = vmatpush2.msra.mxu0 %v635_v54 }
 0x12b   : > { %v634_v60 = vmul.f32 %v630_v35, %v616_v59  ;;  %v633_v61 = vmul.f32 %v626_v36, %v612_v58  ;;  %v784_v35 = vld [vmem:[%s5383_s2 + $0x28] sm:$0xff]  ;;  %v787_v36 = vld [vmem:[%s5383_s2 + $0x40] sm:$0xff] }
 0x12d   : > { %v748_v8 = vpop.permute.xlu1 %747  ;;  %930 = vmatprep.subr.mxu0 %v634_v60  ;;  %v740_v9 = vpop.permute.xlu0 %739 }
 0x12e   : > { %931 = vmatpush2.msra.mxu0 %v633_v61  ;;  %v757_v10 = vsel %vm749_vm7, %v748_v8, %v740_v9  ;;  %v753_v14 = vsel %vm749_vm7, %v740_v9, %v748_v8 }
 0x12f   : > { %v778_v15 = vmul.f32 %v768_v62, %v757_v10  ;;  %v777_v16 = vmul.f32 %v764_v63, %v753_v14  ;;  %932 = vmatprep.subr.mxu0 %v4069_v2 }
 0x130   : > { %933 = vmatpush2.msra.mxu0 %v4063_v0  ;;  %v779_v0 = vld [vmem:[%s5383_s2] sm:$0xff] }
 0x131   : > { %v746_v17 = vpop.permute.xlu1 %745  ;;  %1013 = vmatprep.subr.mxu1 %v778_v15  ;;  %v738_v18 = vpop.permute.xlu0 %737  ;;  %934 = vmatprep.subr.mxu0 %v4071_v3 }
 0x132   : > { %v752_v20 = vsel %vm749_vm7, %v738_v18, %v746_v17  ;;  %v756_v21 = vsel %vm749_vm7, %v746_v17, %v738_v18  ;;  %1014 = vmatpush1.msra.mxu1 %v777_v16  ;;  %935 = vmatpush2.msra.mxu0 %v4065_v1 }
 0x133   : > { %v776_v22 = vmul.f32 %v768_v62, %v756_v21  ;;  %v775_v23 = vmul.f32 %v764_v63, %v752_v20  ;;  %936 = vmatprep.subr.mxu0 %v4075_v4 }
 0x134   : > { %937 = vmatpush2.msra.mxu0 %v4077_v5 }
 0x135   : > { %v744_v2 = vpop.permute.xlu1 %743  ;;  %1015 = vmatprep.subr.mxu1 %v776_v22  ;;  %v736_v3 = vpop.permute.xlu0 %735  ;;  %938 = vmatprep.subr.mxu0 %v4081_v6  ;;  %v782_v6 = vld [vmem:[%s5383_s2 + $0x18] sm:$0xff] }
 0x136   : > { %v751_v1 = vsel %vm749_vm7, %v736_v3, %v744_v2  ;;  %v755_v4 = vsel %vm749_vm7, %v744_v2, %v736_v3  ;;  %1016 = vmatpush1.msra.mxu1 %v775_v23  ;;  %939 = vmatpush2.msra.mxu0 %v4083_v7  ;;  %v1102_v3 = vld [vmem:[%s5385_s4] sm:$0xff] }
 0x137   : > { %v774_v5 = vmul.f32 %v768_v62, %v755_v4  ;;  %v773_v25 = vmul.f32 %v764_v63, %v751_v1  ;;  %941 = vmatmul.mubr.f32.vlgmr.msra.gmra.mxu0 %v779_v0  ;;  %v1104_v1 = vld [vmem:[%s5385_s4 + $0x10] sm:$0xff]  ;;  %v1105_v4 = vld [vmem:[%s5385_s4 + $0x18] sm:$0xff] }
 0x138   : > { %946 = vmatprep.mubr.f32.mxu0 %v783_v24  ;;  %v1103_v24 = vld [vmem:[%s5385_s4 + $0x8] sm:$0xff] }
 0x139   : > { %v742_v26 = vpop.permute.xlu1 %741  ;;  %1017 = vmatprep.subr.mxu1 %v774_v5  ;;  %v1106_v5 = vld [vmem:[%s5385_s4 + $0x20] sm:$0xff] }
 0x13a   : > { %v734_v28 = vpop.permute.xlu0 %733  ;;  %1018 = vmatpush1.msra.mxu1 %v773_v25  ;;  %v1107_v25 = vld [vmem:[%s5385_s4 + $0x28] sm:$0xff] }
 0x13b   : > { %v750_v29 = vsel %vm749_vm7, %v734_v28, %v742_v26  ;;  %v754_v7 = vsel %vm749_vm7, %v742_v26, %v734_v28  ;;  %947 = vmatmul.mubr.f32.gmra.mxu0 %v782_v6  ;;  %v1108_v6 = vld [vmem:[%s5385_s4 + $0x30] sm:$0xff]  ;;  %v1109_v26 = vld [vmem:[%s5385_s4 + $0x38] sm:$0xff]  ;;  %v1111_v28 = vld [vmem:[%s5385_s4 + $0x48] sm:$0xff] }
 0x13c   : > { %v772_v30 = vmul.f32 %v768_v62, %v754_v7  ;;  %v771_v31 = vmul.f32 %v764_v63, %v750_v29  ;;  %952 = vmatprep.mubr.f32.mxu0 %v786_v27  ;;  %v1110_v27 = vld [vmem:[%s5385_s4 + $0x40] sm:$0xff]  ;;  %v1112_v29 = vld [vmem:[%s5385_s4 + $0x50] sm:$0xff]  ;;  %v1113_v7 = vld [vmem:[%s5385_s4 + $0x58] sm:$0xff] }
 0x13e   : > { %1019 = vmatprep.subr.mxu1 %v772_v30 }
 0x13f   : > { %1020 = vmatpush1.msra.mxu1 %v771_v31  ;;  %953 = vmatmul.mubr.f32.gmra.mxu0 %v785_v32 }
 0x140   : > { %3305 = vmatmul.mubr.msk.f32.vlgmr.msra.gmra.mxu1 %vm851_vm8, %v781_v33  ;;  %958 = vmatprep.mubr.f32.mxu0 %v789_v34 }
 0x141   : > { %1059 = vmatprep.mubr.f32.mxu1 %v5394_v19 }
 0x143   : > { %959 = vmatmul.mubr.f32.gmra.mxu0 %v788_v11 }
 0x144   : > { %3306 = vmatmul.mubr.msk.f32.gmra.mxu1 %vm851_vm8, %v784_v35 }
 0x145   : > { %1065 = vmatprep.mubr.f32.mxu1 %v5394_v19 }
 0x146   : > { %v824_v54 = vpop.permute.xlu1 %823 }
 0x147   : > { %v829_v57 = vpop.permute.xlu0 %828 }
 0x148   : > { %3307 = vmatmul.mubr.msk.f32.gmra.mxu1 %vm851_vm8, %v787_v36 }
 0x149   : > { %1071 = vmatprep.mubr.f32.mxu1 %v5394_v19 }
 0x14a   : > { %v819_v63 = vpop.permute.xlu1 %818 }
 0x14b   : > { %v814_v15 = vpop.permute.xlu0 %813 }
 0x14c   : > { %3308 = vmatmul.mubr.msk.f32.gmra.mxu1 %vm851_vm8, %v790_v37 }
 0x14d   : > { %1077 = vmatprep.mubr.f32.mxu1 %v5394_v19 }
 0x14e   : > { %v1129_v37 = vpop.permute.xlu1 %1128 }
 0x150   : > { %3309 = vmatmul.mubr.msk.f32.gmra.mxu1 %vm851_vm8, %v793_v38 }
 0x151   : > { %1083 = vmatprep.mubr.f32.mxu1 %v5394_v19 }
 0x154   : > { %3310 = vmatmul.mubr.msk.f32.gmra.mxu1 %vm851_vm8, %v796_v39 }
 0x155   : > { %1089 = vmatprep.mubr.f32.mxu1 %v5394_v19 }
 0x158   : > { %3311 = vmatmul.mubr.msk.f32.gmra.mxu1 %vm851_vm8, %v799_v40 }
 0x159   : > { %1095 = vmatprep.mubr.f32.mxu1 %v5394_v19 }
 0x15c   : > { %3312 = vmatmul.mubr.msk.f32.gmra.mxu1 %vm851_vm8, %v802_v41 }
 0x15d   : > { %1286 = vmatprep.mubr.f32.mxu1 %v5394_v19 }
 0x1f7   : > { %v942_v42 = vpop.f32.mrf.mxu0 }
 0x1f8   : > { %v943_v18 = vadd.f32 %v942_v42, %v814_v15  ;;  %v1134_v42 = vpop.permute.xlu0 %1133 }
 0x1f9   : > { %v944_v43 = vpop.f32.mrf.mxu0 }
 0x1fa   : > { %v945_v21 = vadd.f32 %v944_v43, %v814_v15 }
 0x1fb   : > { %v948_v44 = vpop.f32.mrf.mxu0 }
 0x1fc   : > { %v949_v10 = vadd.f32 %v948_v44, %v819_v63 }
 0x1fd   : > { %v950_v45 = vpop.f32.mrf.mxu0 }
 0x1fe   : > { %v951_v16 = vadd.f32 %v950_v45, %v819_v63 }
 0x1ff   : > { %v954_v46 = vpop.f32.mrf.mxu0 }
 0x200   : > { %v1055_v47 = vpop.f32.mrf.mxu1  ;;  %v955_v61 = vadd.f32 %v954_v46, %v824_v54 }
 0x201   : > { %v956_v49 = vpop.f32.mrf.mxu0  ;;  %v1056_v2 = vadd.f32 %v1055_v47, %v943_v18  ;;  %v1139_v47 = vpop.permute.xlu1 %1138 }
 0x202   : > { %v1057_v48 = vpop.f32.mrf.mxu1  ;;  %v957_v8 = vadd.f32 %v956_v49, %v824_v54 }
 0x203   : > { %v960_v52 = vpop.f32.mrf.mxu0  ;;  %v1058_v0 = vadd.f32 %v1057_v48, %v945_v21 }
 0x204   : > { %v1061_v50 = vpop.f32.mrf.mxu1  ;;  %v961_v58 = vadd.f32 %v960_v52, %v829_v57  ;;  %v1144_v52 = vpop.permute.xlu0 %1143 }
 0x205   : > { %v962_v55 = vpop.f32.mrf.mxu0  ;;  %v1062_v23 = vadd.f32 %v1061_v50, %v949_v10  ;;  %v1164_v63 = vpop.permute.xlu1 %1163 }
 0x206   : > { %v1063_v51 = vpop.f32.mrf.mxu1  ;;  %v963_v60 = vadd.f32 %v962_v55, %v829_v57 }
 0x207   : > { %v1064_v22 = vadd.f32 %v1063_v51, %v951_v16 }
 0x208   : > { %v1067_v53 = vpop.f32.mrf.mxu1 }
 0x209   : > { %v1068_v20 = vadd.f32 %v1067_v53, %v955_v61 }
 0x20a   : > { %v1069_v56 = vpop.f32.mrf.mxu1 }
 0x20b   : > { %v1070_v17 = vadd.f32 %v1069_v56, %v957_v8 }
 0x20c   : > { %v1073_v59 = vpop.f32.mrf.mxu1 }
 0x20d   : > { %v1074_v14 = vadd.f32 %v1073_v59, %v961_v58 }
 0x20e   : > { %v1075_v62 = vpop.f32.mrf.mxu1 }
 0x20f   : > { %v1076_v9 = vadd.f32 %v1075_v62, %v963_v60 }
 0x210   : > { %v4486_v30 = vpop.f32.mrf.mxu1 }
 0x211   : > { %1246 = vmatprep.subr.mxu1 %v1076_v9  ;;  %5429 = vst [vmem:[#allocation16_spill] sm:$0xff] %v4486_v30  ;;  %v1159_v9 = vpop.permute.xlu0 %1158 }
 0x212   : > { %1247 = vmatpush1.msra.mxu1 %v1074_v14  ;;  %v4488_v31 = vpop.f32.mrf.mxu1 }
 0x213   : > { %1248 = vmatprep.subr.mxu1 %v1070_v17  ;;  %5430 = vst [vmem:[#allocation17_spill] sm:$0xff] %v4488_v31  ;;  %v1154_v17 = vpop.permute.xlu1 %1153 }
 0x214   : > { %1249 = vmatpush1.msra.mxu1 %v1068_v20  ;;  %v4490_v32 = vpop.f32.mrf.mxu1 }
 0x215   : > { %1250 = vmatprep.subr.mxu1 %v1064_v22  ;;  %5431 = vst [vmem:[#allocation18_spill] sm:$0xff] %v4490_v32  ;;  %v1149_v21 = vpop.permute.xlu0 %1148 }
 0x216   : > { %1251 = vmatpush1.msra.mxu1 %v1062_v23  ;;  %v4492_v33 = vpop.f32.mrf.mxu1 }
 0x217   : > { %1252 = vmatprep.subr.mxu1 %v1058_v0  ;;  %5432 = vst [vmem:[#allocation19_spill] sm:$0xff] %v4492_v33 }
 0x218   : > { %1253 = vmatpush1.msra.mxu1 %v1056_v2  ;;  %v4494_v34 = vpop.f32.mrf.mxu1  ;;  %v1124_v2 = vld [vmem:[%s5386_s5 + $0x50] sm:$0xff] }
 0x219   : > { %3313 = vmatmul.mubr.msk.f32.vlgmr.msra.gmra.mxu1 %vm851_vm8, %v1102_v3  ;;  %5433 = vst [vmem:[#allocation20_spill] sm:$0xff] %v4494_v34  ;;  %v1125_v3 = vld [vmem:[%s5386_s5 + $0x58] sm:$0xff] }
 0x21a   : > { %1292 = vmatprep.mubr.f32.mxu1 %v5394_v19  ;;  %v4496_v11 = vpop.f32.mrf.mxu1 }
 0x21b   : > { %5434 = vst [vmem:[#allocation21_spill] sm:$0xff] %v4496_v11 }
 0x21c   : > { %v4498_v35 = vpop.f32.mrf.mxu1 }
 0x21d   : > { %3314 = vmatmul.mubr.msk.f32.gmra.mxu1 %vm851_vm8, %v1103_v24  ;;  %5435 = vst [vmem:[#allocation22_spill] sm:$0xff] %v4498_v35 }
 0x21e   : > { %1298 = vmatprep.mubr.f32.mxu1 %v5394_v19  ;;  %v4500_v36 = vpop.f32.mrf.mxu1 }
 0x21f   : > { %5436 = vst [vmem:[#allocation23_spill] sm:$0xff] %v4500_v36 }
 0x221   : > { %3315 = vmatmul.mubr.msk.f32.gmra.mxu1 %vm851_vm8, %v1104_v1 }
 0x222   : > { %1304 = vmatprep.mubr.f32.mxu1 %v5394_v19 }
 0x225   : > { %3316 = vmatmul.mubr.msk.f32.gmra.mxu1 %vm851_vm8, %v1105_v4 }
 0x226   : > { %1310 = vmatprep.mubr.f32.mxu1 %v5394_v19 }
 0x229   : > { %3317 = vmatmul.mubr.msk.f32.gmra.mxu1 %vm851_vm8, %v1106_v5 }
 0x22a   : > { %1316 = vmatprep.mubr.f32.mxu1 %v5394_v19 }
 0x22d   : > { %3318 = vmatmul.mubr.msk.f32.gmra.mxu1 %vm851_vm8, %v1107_v25 }
 0x22e   : > { %1322 = vmatprep.mubr.f32.mxu1 %v5394_v19 }
 0x231   : > { %3319 = vmatmul.mubr.msk.f32.gmra.mxu1 %vm851_vm8, %v1108_v6 }
 0x232   : > { %1328 = vmatprep.mubr.f32.mxu1 %v5394_v19 }
 0x235   : > { %3320 = vmatmul.mubr.msk.f32.gmra.mxu1 %vm851_vm8, %v1109_v26 }
 0x236   : > { %1334 = vmatprep.mubr.f32.mxu1 %v5394_v19 }
 0x239   : > { %3321 = vmatmul.mubr.msk.f32.gmra.mxu1 %vm851_vm8, %v1110_v27 }
 0x23a   : > { %1340 = vmatprep.mubr.f32.mxu1 %v5394_v19 }
 0x23d   : > { %3322 = vmatmul.mubr.msk.f32.gmra.mxu1 %vm851_vm8, %v1111_v28 }
 0x23e   : > { %1346 = vmatprep.mubr.f32.mxu1 %v5394_v19 }
 0x241   : > { %3323 = vmatmul.mubr.msk.f32.gmra.mxu1 %vm851_vm8, %v1112_v29 }
 0x242   : > { %1352 = vmatprep.mubr.f32.mxu1 %v5394_v19 }
 0x245   : > { %3324 = vmatmul.mubr.msk.f32.gmra.mxu1 %vm851_vm8, %v1113_v7 }
 0x246   : > { %1583 = vmatprep.mubr.f32.mxu1 %v5394_v19 }
 0x2d9   : > { %v1288_v38 = vpop.f32.mrf.mxu1 }
 0x2da   : > { %v1289_v39 = vadd.f32 %v1288_v38, %v1129_v37 }
 0x2db   : > { %v1290_v40 = vpop.f32.mrf.mxu1 }
 0x2dc   : > { %v1291_v41 = vadd.f32 %v1290_v40, %v1129_v37  ;;  %1359 = vxpose.xlu1.b32.start [1/4] (short) %v1289_v39, 128 }
 0x2dd   : > { %v1294_v43 = vpop.f32.mrf.mxu1 }
 0x2de   : > { %v1295_v44 = vadd.f32 %v1294_v43, %v1134_v42  ;;  %1391 = vxpose.xlu0.b32.start [1/4] (short) %v1291_v41, 128 }
 0x2df   : > { %v1296_v45 = vpop.f32.mrf.mxu1 }
 0x2e0   : > { %v1297_v46 = vadd.f32 %v1296_v45, %v1134_v42  ;;  %1360 = vxpose.xlu1.b32.cont [2/4] (short) %v1295_v44, 128 }
 0x2e1   : > { %v1300_v48 = vpop.f32.mrf.mxu1 }
 0x2e2   : > { %v1301_v49 = vadd.f32 %v1300_v48, %v1139_v47  ;;  %1392 = vxpose.xlu0.b32.cont [2/4] (short) %v1297_v46, 128 }
 0x2e3   : > { %v1302_v50 = vpop.f32.mrf.mxu1 }
 0x2e4   : > { %v1303_v51 = vadd.f32 %v1302_v50, %v1139_v47  ;;  %1361 = vxpose.xlu1.b32.cont [3/4] (short) %v1301_v49, 128 }
 0x2e5   : > { %v1306_v53 = vpop.f32.mrf.mxu1 }
 0x2e6   : > { %v1307_v54 = vadd.f32 %v1306_v53, %v1144_v52  ;;  %1393 = vxpose.xlu0.b32.cont [3/4] (short) %v1303_v51, 128 }
 0x2e7   : > { %v1308_v55 = vpop.f32.mrf.mxu1 }
 0x2e8   : > { %v1309_v56 = vadd.f32 %v1308_v55, %v1144_v52  ;;  %1362 = vxpose.xlu1.b32.end [4/4] (short) %v1307_v54, 128 }
 0x2e9   : > { %v1312_v57 = vpop.f32.mrf.mxu1 }
 0x2ea   : > { %1394 = vxpose.xlu0.b32.end [4/4] (short) %v1309_v56, 128  ;;  %v1313_v0 = vadd.f32 %v1312_v57, %v1149_v21 }
 0x2eb   : > { %v1314_v58 = vpop.f32.mrf.mxu1 }
 0x2ec   : > { %v1315_v23 = vadd.f32 %v1314_v58, %v1149_v21 }
 0x2ed   : > { %v1318_v59 = vpop.f32.mrf.mxu1 }
 0x2ee   : > { %v1319_v22 = vadd.f32 %v1318_v59, %v1154_v17 }
 0x2ef   : > { %v1320_v60 = vpop.f32.mrf.mxu1 }
 0x2f0   : > { %v1321_v20 = vadd.f32 %v1320_v60, %v1154_v17 }
 0x2f1   : > { %v1324_v61 = vpop.f32.mrf.mxu1 }
 0x2f2   : > { %v1325_v18 = vadd.f32 %v1324_v61, %v1159_v9 }
 0x2f3   : > { %v1326_v62 = vpop.f32.mrf.mxu1 }
 0x2f4   : > { %v1327_v16 = vadd.f32 %v1326_v62, %v1159_v9 }
 0x2f5   : > { %v1330_v8 = vpop.f32.mrf.mxu1 }
 0x2f6   : > { %v1331_v15 = vadd.f32 %v1330_v8, %v1164_v63 }
 0x2f7   : > { %v1332_v10 = vpop.f32.mrf.mxu1 }
 0x2f8   : > { %v1333_v14 = vadd.f32 %v1332_v10, %v1164_v63 }
 0x2f9   : > { %v4546_v54 = vpop.f32.mrf.mxu1 }
 0x2fa   : > { %1543 = vmatprep.subr.mxu1 %v1333_v14  ;;  %5437 = vst [vmem:[#allocation24_spill] sm:$0xff] %v4546_v54 }
 0x2fb   : > { %1544 = vmatpush1.msra.mxu1 %v1331_v15  ;;  %v4550_v55 = vpop.f32.mrf.mxu1 }
 0x2fc   : > { %1545 = vmatprep.subr.mxu1 %v1327_v16  ;;  %5438 = vst [vmem:[#allocation25_spill] sm:$0xff] %v4550_v55 }
 0x2fd   : > { %1546 = vmatpush1.msra.mxu1 %v1325_v18  ;;  %v4553_v57 = vpop.f32.mrf.mxu1 }
 0x2fe   : > { %1547 = vmatprep.subr.mxu1 %v1321_v20  ;;  %5439 = vst [vmem:[#allocation26_spill] sm:$0xff] %v4553_v57 }
 0x2ff   : > { %1548 = vmatpush1.msra.mxu1 %v1319_v22  ;;  %v4557_v59 = vpop.f32.mrf.mxu1 }
 0x300   : > { %1549 = vmatprep.subr.mxu1 %v1315_v23  ;;  %5440 = vst [vmem:[#allocation27_spill] sm:$0xff] %v4557_v59 }
 0x301   : > { %1550 = vmatpush1.msra.mxu1 %v1313_v0  ;;  %v1348_v60 = vpop.f32.mrf.mxu1 }
 0x303   : > { %v1350_v62 = vpop.f32.mrf.mxu1 }
 0x305   : > { %v1354_v8 = vpop.f32.mrf.mxu1 }
 0x307   : > { %v1356_v9 = vpop.f32.mrf.mxu1 }
 0x336   : > { %1178 = vperm.xlu1 %3530, %v1124_v2  }
 0x343   : > { %1183 = vperm.xlu0 %3529, %v1125_v3  }
 0x358   : > { %v1375_v24 = vpop.trf.xlu1 }
 0x359   : > { %3325 = vmatmul.mubr.msk.f32.vlgmr.msra.gmra.mxu1 %vm851_vm8, %v1375_v24 }
 0x35a   : > { %1589 = vmatprep.mubr.f32.mxu1 %v5394_v19  ;;  %v1407_v4 = vpop.trf.xlu0 }
 0x35c   : > { %v1376_v1 = vpop.trf.xlu1 }
 0x35d   : > { %3326 = vmatmul.mubr.msk.f32.gmra.mxu1 %vm851_vm8, %v1376_v1 }
 0x35e   : > { %1595 = vmatprep.mubr.f32.mxu1 %v5394_v19  ;;  %v1408_v6 = vpop.trf.xlu0 }
 0x360   : > { %v1377_v5 = vpop.trf.xlu1 }
 0x361   : > { %3327 = vmatmul.mubr.msk.f32.gmra.mxu1 %vm851_vm8, %v1377_v5 }
 0x362   : > { %1601 = vmatprep.mubr.f32.mxu1 %v5394_v19  ;;  %v1409_v27 = vpop.trf.xlu0 }
 0x364   : > { %v1378_v25 = vpop.trf.xlu1 }
 0x365   : > { %3328 = vmatmul.mubr.msk.f32.gmra.mxu1 %vm851_vm8, %v1378_v25 }
 0x366   : > { %1607 = vmatprep.mubr.f32.mxu1 %v5394_v19  ;;  %v1410_v7 = vpop.trf.xlu0 }
 0x368   : > { %v1379_v26 = vpop.trf.xlu1 }
 0x369   : > { %3329 = vmatmul.mubr.msk.f32.gmra.mxu1 %vm851_vm8, %v1379_v26 }
 0x36a   : > { %1613 = vmatprep.mubr.f32.mxu1 %v5394_v19  ;;  %v1411_v38 = vpop.trf.xlu0 }
 0x36c   : > { %v1380_v28 = vpop.trf.xlu1 }
 0x36d   : > { %3330 = vmatmul.mubr.msk.f32.gmra.mxu1 %vm851_vm8, %v1380_v28 }
 0x36e   : > { %1619 = vmatprep.mubr.f32.mxu1 %v5394_v19  ;;  %v1412_v41 = vpop.trf.xlu0 }
 0x370   : > { %v1381_v29 = vpop.trf.xlu1 }
 0x371   : > { %3331 = vmatmul.mubr.msk.f32.gmra.mxu1 %vm851_vm8, %v1381_v29 }
 0x372   : > { %1625 = vmatprep.mubr.f32.mxu1 %v5394_v19  ;;  %v1413_v43 = vpop.trf.xlu0 }
 0x374   : > { %v1382_v37 = vpop.trf.xlu1 }
 0x375   : > { %3332 = vmatmul.mubr.msk.f32.gmra.mxu1 %vm851_vm8, %v1382_v37 }
 0x376   : > { %1631 = vmatprep.mubr.f32.mxu1 %v5394_v19  ;;  %v1414_v46 = vpop.trf.xlu0 }
 0x378   : > { %v1383_v39 = vpop.trf.xlu1 }
 0x379   : > { %3333 = vmatmul.mubr.msk.f32.gmra.mxu1 %vm851_vm8, %v1383_v39 }
 0x37a   : > { %1637 = vmatprep.mubr.f32.mxu1 %v5394_v19  ;;  %v1415_v48 = vpop.trf.xlu0 }
 0x37c   : > { %v1384_v40 = vpop.trf.xlu1 }
 0x37d   : > { %3334 = vmatmul.mubr.msk.f32.gmra.mxu1 %vm851_vm8, %v1384_v40 }
 0x37e   : > { %1643 = vmatprep.mubr.f32.mxu1 %v5394_v19  ;;  %v1416_v51 = vpop.trf.xlu0 }
 0x380   : > { %v1385_v42 = vpop.trf.xlu1 }
 0x381   : > { %3335 = vmatmul.mubr.msk.f32.gmra.mxu1 %vm851_vm8, %v1385_v42 }
 0x382   : > { %1649 = vmatprep.mubr.f32.mxu1 %v5394_v19  ;;  %v1417_v52 = vpop.trf.xlu0 }
 0x384   : > { %v1386_v44 = vpop.trf.xlu1 }
 0x385   : > { %3336 = vmatmul.mubr.msk.f32.gmra.mxu1 %vm851_vm8, %v1386_v44 }
 0x386   : > { %1655 = vmatprep.mubr.f32.mxu1 %v5394_v19  ;;  %v1418_v53 = vpop.trf.xlu0 }
 0x388   : > { %v1387_v45 = vpop.trf.xlu1 }
 0x389   : > { %3337 = vmatmul.mubr.msk.f32.gmra.mxu1 %vm851_vm8, %v1387_v45 }
 0x38a   : > { %1661 = vmatprep.mubr.f32.mxu1 %v5394_v19  ;;  %v1419_v56 = vpop.trf.xlu0 }
 0x38c   : > { %v1388_v47 = vpop.trf.xlu1 }
 0x38d   : > { %3338 = vmatmul.mubr.msk.f32.gmra.mxu1 %vm851_vm8, %v1388_v47 }
 0x38e   : > { %1667 = vmatprep.mubr.f32.mxu1 %v5394_v19  ;;  %v1420_v58 = vpop.trf.xlu0 }
 0x390   : > { %v1389_v49 = vpop.trf.xlu1 }
 0x391   : > { %3339 = vmatmul.mubr.msk.f32.gmra.mxu1 %vm851_vm8, %v1389_v49 }
 0x392   : > { %1673 = vmatprep.mubr.f32.mxu1 %v5394_v19  ;;  %v1421_v61 = vpop.trf.xlu0 }
 0x394   : > { %v1390_v50 = vpop.trf.xlu1 }
 0x395   : > { %3340 = vmatmul.mubr.msk.f32.gmra.mxu1 %vm851_vm8, %v1390_v50 }
 0x396   : > { %1679 = vmatprep.mubr.f32.mxu1 %v5394_v19  ;;  %v1422_v63 = vpop.trf.xlu0 }
 0x399   : > { %3341 = vmatmul.mubr.msk.f32.gmra.mxu1 %vm851_vm8, %v1407_v4 }
 0x39a   : > { %1685 = vmatprep.mubr.f32.mxu1 %v5394_v19 }
 0x39d   : > { %3342 = vmatmul.mubr.msk.f32.gmra.mxu1 %vm851_vm8, %v1408_v6 }
 0x39e   : > { %1691 = vmatprep.mubr.f32.mxu1 %v5394_v19 }
 0x3a1   : > { %3343 = vmatmul.mubr.msk.f32.gmra.mxu1 %vm851_vm8, %v1409_v27 }
 0x3a2   : > { %1697 = vmatprep.mubr.f32.mxu1 %v5394_v19 }
 0x3a5   : > { %3344 = vmatmul.mubr.msk.f32.gmra.mxu1 %vm851_vm8, %v1410_v7 }
 0x3a6   : > { %1703 = vmatprep.mubr.f32.mxu1 %v5394_v19 }
 0x3a9   : > { %3345 = vmatmul.mubr.msk.f32.gmra.mxu1 %vm851_vm8, %v1411_v38 }
 0x3aa   : > { %1709 = vmatprep.mubr.f32.mxu1 %v5394_v19 }
 0x3ad   : > { %3346 = vmatmul.mubr.msk.f32.gmra.mxu1 %vm851_vm8, %v1412_v41 }
 0x3ae   : > { %1715 = vmatprep.mubr.f32.mxu1 %v5394_v19 }
 0x3b1   : > { %3347 = vmatmul.mubr.msk.f32.gmra.mxu1 %vm851_vm8, %v1413_v43  ;;  %v1179_v10 = vpop.permute.xlu1 %1178 }
 0x3b2   : > { %1721 = vmatprep.mubr.f32.mxu1 %v5394_v19  ;;  %v1351_v17 = vadd.f32 %v1350_v62, %v1179_v10  ;;  %v1349_v18 = vadd.f32 %v1348_v60, %v1179_v10 }
 0x3b5   : > { %3348 = vmatmul.mubr.msk.f32.gmra.mxu1 %vm851_vm8, %v1414_v46 }
 0x3b6   : > { %1727 = vmatprep.mubr.f32.mxu1 %v5394_v19 }
 0x3b9   : > { %3349 = vmatmul.mubr.msk.f32.gmra.mxu1 %vm851_vm8, %v1415_v48 }
 0x3ba   : > { %1733 = vmatprep.mubr.f32.mxu1 %v5394_v19 }
 0x3bd   : > { %3350 = vmatmul.mubr.msk.f32.gmra.mxu1 %vm851_vm8, %v1416_v51 }
 0x3be   : > { %v1184_v14 = vpop.permute.xlu0 %1183  ;;  %1739 = vmatprep.mubr.f32.mxu1 %v5394_v19 }
 0x3bf   : > { %v1355_v15 = vadd.f32 %v1354_v8, %v1184_v14  ;;  %v1357_v16 = vadd.f32 %v1356_v9, %v1184_v14 }
 0x3c1   : > { %2344 = vmatprep.subr.mxu0 %v1357_v16  ;;  %3351 = vmatmul.mubr.msk.f32.gmra.mxu1 %vm851_vm8, %v1417_v52 }
 0x3c2   : > { %2345 = vmatpush1.xpose.msra.mxu0 %v1355_v15  ;;  %1745 = vmatprep.mubr.f32.mxu1 %v5394_v19 }
 0x3c3   : > { %2346 = vmatprep.subr.mxu0 %v1351_v17 }
 0x3c5   : > { %3352 = vmatmul.mubr.msk.f32.gmra.mxu1 %vm851_vm8, %v1418_v53 }
 0x3c6   : > { %2347 = vmatpush1.xpose.msra.mxu0 %v1349_v18  ;;  %1751 = vmatprep.mubr.f32.mxu1 %v5394_v19 }
 0x3c9   : > { %3353 = vmatmul.mubr.msk.f32.gmra.mxu1 %vm851_vm8, %v1419_v56 }
 0x3ca   : > { %1757 = vmatprep.mubr.f32.mxu1 %v5394_v19 }
 0x3cd   : > { %3354 = vmatmul.mubr.msk.f32.gmra.mxu1 %vm851_vm8, %v1420_v58 }
 0x3ce   : > { %1763 = vmatprep.mubr.f32.mxu1 %v5394_v19 }
 0x3d1   : > { %3355 = vmatmul.mubr.msk.f32.gmra.mxu1 %vm851_vm8, %v1421_v61 }
 0x3d2   : > { %1769 = vmatprep.mubr.f32.mxu1 %v5394_v19 }
 0x3d5   : > { %3356 = vmatmul.mubr.msk.f32.gmra.mxu1 %vm851_vm8, %v1422_v63 }
 0x419   : > { %v1585_v20 = vpop.f32.mrf.mxu1 }
 0x41a   : > { %v4579_v22 = vmul.f32 0.17677669, %v1585_v20 }
 0x41b   : > { %v1587_v21 = vpop.f32.mrf.mxu1 }
 0x41c   : > { %v4581_v23 = vmul.f32 0.17677669, %v1587_v21 }
 0x41d   : > { %v1591_v0 = vpop.f32.mrf.mxu1 }
 0x41e   : > { %v1840_v2 = vmax.f32 %v4579_v22, %v4581_v23  ;;  %v4585_v24 = vmul.f32 0.17677669, %v1591_v0 }
 0x41f   : > { %v1593_v3 = vpop.f32.mrf.mxu1 }
 0x420   : > { %v4587_v1 = vmul.f32 0.17677669, %v1593_v3  ;;  %1841 = vmax.xlane.f32.xlu0 %v1840_v2 }
 0x421   : > { %v1597_v4 = vpop.f32.mrf.mxu1 }
 0x422   : > { %v1843_v5 = vmax.f32 %v4585_v24, %v4587_v1  ;;  %v4591_v6 = vmul.f32 0.17677669, %v1597_v4 }
 0x423   : > { %v1599_v25 = vpop.f32.mrf.mxu1 }
 0x424   : > { %v4593_v26 = vmul.f32 0.17677669, %v1599_v25  ;;  %1844 = vmax.xlane.f32.xlu1 %v1843_v5 }
 0x425   : > { %v1603_v27 = vpop.f32.mrf.mxu1 }
 0x426   : > { %v1846_v28 = vmax.f32 %v4591_v6, %v4593_v26  ;;  %v4597_v7 = vmul.f32 0.17677669, %v1603_v27 }
 0x427   : > { %v1605_v29 = vpop.f32.mrf.mxu1 }
 0x428   : > { %v4599_v37 = vmul.f32 0.17677669, %v1605_v29  ;;  %1847 = vmax.xlane.f32.xlu0 %v1846_v28 }
 0x429   : > { %v1609_v38 = vpop.f32.mrf.mxu1 }
 0x42a   : > { %v1849_v39 = vmax.f32 %v4597_v7, %v4599_v37  ;;  %v4603_v41 = vmul.f32 0.17677669, %v1609_v38 }
 0x42b   : > { %v1611_v40 = vpop.f32.mrf.mxu1 }
 0x42c   : > { %v4605_v42 = vmul.f32 0.17677669, %v1611_v40  ;;  %1850 = vmax.xlane.f32.xlu1 %v1849_v39 }
 0x42d   : > { %v1615_v43 = vpop.f32.mrf.mxu1 }
 0x42e   : > { %v1852_v44 = vmax.f32 %v4603_v41, %v4605_v42  ;;  %v4609_v46 = vmul.f32 0.17677669, %v1615_v43 }
 0x42f   : > { %v1617_v45 = vpop.f32.mrf.mxu1 }
 0x430   : > { %v4611_v47 = vmul.f32 0.17677669, %v1617_v45  ;;  %1853 = vmax.xlane.f32.xlu0 %v1852_v44 }
 0x431   : > { %v1621_v48 = vpop.f32.mrf.mxu1 }
 0x432   : > { %v1855_v49 = vmax.f32 %v4609_v46, %v4611_v47  ;;  %v4615_v51 = vmul.f32 0.17677669, %v1621_v48 }
 0x433   : > { %v1623_v50 = vpop.f32.mrf.mxu1 }
 0x434   : > { %v4617_v52 = vmul.f32 0.17677669, %v1623_v50  ;;  %1856 = vmax.xlane.f32.xlu1 %v1855_v49 }
 0x435   : > { %v1627_v53 = vpop.f32.mrf.mxu1 }
 0x436   : > { %v1858_v56 = vmax.f32 %v4615_v51, %v4617_v52  ;;  %v4621_v60 = vmul.f32 0.17677669, %v1627_v53 }
 0x437   : > { %v1629_v58 = vpop.f32.mrf.mxu1 }
 0x438   : > { %v4623_v61 = vmul.f32 0.17677669, %v1629_v58  ;;  %1859 = vmax.xlane.f32.xlu0 %v1858_v56 }
 0x439   : > { %v1633_v62 = vpop.f32.mrf.mxu1 }
 0x43a   : > { %v1861_v63 = vmax.f32 %v4621_v60, %v4623_v61  ;;  %v4627_v8 = vmul.f32 0.17677669, %v1633_v62 }
 0x43b   : > { %v1635_v9 = vpop.f32.mrf.mxu1 }
 0x43c   : > { %v4629_v10 = vmul.f32 0.17677669, %v1635_v9  ;;  %1862 = vmax.xlane.f32.xlu1 %v1861_v63 }
 0x43d   : > { %v1639_v14 = vpop.f32.mrf.mxu1 }
 0x43e   : > { %v1864_v15 = vmax.f32 %v4627_v8, %v4629_v10  ;;  %v4633_v16 = vmul.f32 0.17677669, %v1639_v14 }
 0x43f   : > { %v1641_v17 = vpop.f32.mrf.mxu1 }
 0x440   : > { %v4635_v18 = vmul.f32 0.17677669, %v1641_v17  ;;  %1865 = vmax.xlane.f32.xlu0 %v1864_v15 }
 0x441   : > { %v1645_v20 = vpop.f32.mrf.mxu1 }
 0x442   : > { %v1867_v21 = vmax.f32 %v4633_v16, %v4635_v18  ;;  %v4639_v0 = vmul.f32 0.17677669, %v1645_v20 }
 0x443   : > { %v1647_v2 = vpop.f32.mrf.mxu1 }
 0x444   : > { %v4641_v3 = vmul.f32 0.17677669, %v1647_v2  ;;  %1868 = vmax.xlane.f32.xlu1 %v1867_v21 }
 0x445   : > { %v1651_v4 = vpop.f32.mrf.mxu1 }
 0x446   : > { %v1870_v5 = vmax.f32 %v4639_v0, %v4641_v3  ;;  %v4645_v25 = vmul.f32 0.17677669, %v1651_v4 }
 0x447   : > { %v1653_v27 = vpop.f32.mrf.mxu1 }
 0x448   : > { %v4647_v28 = vmul.f32 0.17677669, %v1653_v27  ;;  %1871 = vmax.xlane.f32.xlu0 %v1870_v5 }
 0x449   : > { %v1657_v29 = vpop.f32.mrf.mxu1 }
 0x44a   : > { %v1873_v38 = vmax.f32 %v4645_v25, %v4647_v28  ;;  %v4651_v39 = vmul.f32 0.17677669, %v1657_v29 }
 0x44b   : > { %v1659_v40 = vpop.f32.mrf.mxu1 }
 0x44c   : > { %v4653_v43 = vmul.f32 0.17677669, %v1659_v40  ;;  %1874 = vmax.xlane.f32.xlu1 %v1873_v38 }
 0x44d   : > { %v1663_v44 = vpop.f32.mrf.mxu1 }
 0x44e   : > { %v1876_v45 = vmax.f32 %v4651_v39, %v4653_v43  ;;  %v4657_v48 = vmul.f32 0.17677669, %v1663_v44 }
 0x44f   : > { %v1665_v49 = vpop.f32.mrf.mxu1 }
 0x450   : > { %v4659_v50 = vmul.f32 0.17677669, %v1665_v49  ;;  %1877 = vmax.xlane.f32.xlu0 %v1876_v45 }
 0x451   : > { %v1669_v53 = vpop.f32.mrf.mxu1 }
 0x452   : > { %v1879_v56 = vmax.f32 %v4657_v48, %v4659_v50  ;;  %v4663_v58 = vmul.f32 0.17677669, %v1669_v53 }
 0x453   : > { %v1671_v62 = vpop.f32.mrf.mxu1 }
 0x454   : > { %v4665_v63 = vmul.f32 0.17677669, %v1671_v62  ;;  %1880 = vmax.xlane.f32.xlu1 %v1879_v56 }
 0x455   : > { %v1675_v9 = vpop.f32.mrf.mxu1 }
 0x456   : > { %v1882_v14 = vmax.f32 %v4663_v58, %v4665_v63  ;;  %v4669_v15 = vmul.f32 0.17677669, %v1675_v9 }
 0x457   : > { %v1677_v17 = vpop.f32.mrf.mxu1 }
 0x458   : > { %v4671_v20 = vmul.f32 0.17677669, %v1677_v17  ;;  %1883 = vmax.xlane.f32.xlu0 %v1882_v14 }
 0x459   : > { %v1681_v21 = vpop.f32.mrf.mxu1 }
 0x45a   : > { %v1885_v2 = vmax.f32 %v4669_v15, %v4671_v20  ;;  %v4675_v4 = vmul.f32 0.17677669, %v1681_v21 }
 0x45b   : > { %v1683_v5 = vpop.f32.mrf.mxu1 }
 0x45c   : > { %v4677_v27 = vmul.f32 0.17677669, %v1683_v5  ;;  %1886 = vmax.xlane.f32.xlu1 %v1885_v2 }
 0x45d   : > { %v1687_v29 = vpop.f32.mrf.mxu1 }
 0x45e   : > { %v1888_v38 = vmax.f32 %v4675_v4, %v4677_v27  ;;  %v4681_v40 = vmul.f32 0.17677669, %v1687_v29 }
 0x45f   : > { %v1689_v44 = vpop.f32.mrf.mxu1 }
 0x460   : > { %v4683_v45 = vmul.f32 0.17677669, %v1689_v44  ;;  %1889 = vmax.xlane.f32.xlu0 %v1888_v38 }
 0x461   : > { %v1693_v49 = vpop.f32.mrf.mxu1 }
 0x462   : > { %v1891_v53 = vmax.f32 %v4681_v40, %v4683_v45  ;;  %v4687_v56 = vmul.f32 0.17677669, %v1693_v49 }
 0x463   : > { %v1695_v62 = vpop.f32.mrf.mxu1 }
 0x464   : > { %v4689_v9 = vmul.f32 0.17677669, %v1695_v62  ;;  %1892 = vmax.xlane.f32.xlu1 %v1891_v53 }
 0x465   : > { %v1699_v14 = vpop.f32.mrf.mxu1 }
 0x466   : > { %v1894_v17 = vmax.f32 %v4687_v56, %v4689_v9  ;;  %v4693_v21 = vmul.f32 0.17677669, %v1699_v14 }
 0x467   : > { %v1701_v2 = vpop.f32.mrf.mxu1 }
 0x468   : > { %v4695_v5 = vmul.f32 0.17677669, %v1701_v2  ;;  %1895 = vmax.xlane.f32.xlu0 %v1894_v17  ;;  %v1122_v17 = vld [vmem:[%s5386_s5 + $0x40] sm:$0xff] }
 0x469   : > { %v1705_v29 = vpop.f32.mrf.mxu1 }
 0x46a   : > { %v1897_v38 = vmax.f32 %v4693_v21, %v4695_v5  ;;  %v4699_v44 = vmul.f32 0.17677669, %v1705_v29 }
 0x46b   : > { %v1707_v49 = vpop.f32.mrf.mxu1 }
 0x46c   : > { %v4701_v62 = vmul.f32 0.17677669, %v1707_v49  ;;  %1898 = vmax.xlane.f32.xlu1 %v1897_v38  ;;  %v1123_v49 = vld [vmem:[%s5386_s5 + $0x48] sm:$0xff] }
 0x46d   : > { %v1711_v53 = vpop.f32.mrf.mxu1 }
 0x46e   : > { %5441 = vst [vmem:[#allocation28_spill] sm:$0xff] %v4701_v62  ;;  %v1900_v19 = vmax.f32 %v4699_v44, %v4701_v62  ;;  %v4711_v34 = vmul.f32 0.17677669, %v1711_v53 }
 0x46f   : > { %v1713_v14 = vpop.f32.mrf.mxu1 }
 0x470   : > { %1901 = vmax.xlane.f32.xlu0 %v1900_v19  ;;  %5442 = vst [vmem:[#allocation29_spill] sm:$0xff] %v4711_v34  ;;  %v4713_v11 = vmul.f32 0.17677669, %v1713_v14 }
 0x471   : > { %v1717_v12 = vpop.f32.mrf.mxu1 }
 0x472   : > { %5443 = vst [vmem:[#allocation30_spill] sm:$0xff] %v4713_v11  ;;  %v4715_v36 = vmul.f32 0.17677669, %v1717_v12  ;;  %v1903_v54 = vmax.f32 %v4711_v34, %v4713_v11 }
 0x473   : > { %v1719_v2 = vpop.f32.mrf.mxu1 }
 0x475   : > { %v1723_v13 = vpop.f32.mrf.mxu1 }
 0x476   : > { %v4727_v53 = vmul.f32 0.17677669, %v1723_v13 }
 0x477   : > { %v1725_v29 = vpop.f32.mrf.mxu1 }
 0x478   : > { %5445 = vst [vmem:[#allocation32_spill] sm:$0xff] %v4727_v53  ;;  %v4729_v14 = vmul.f32 0.17677669, %v1725_v29 }
 0x479   : > { %v1729_v38 = vpop.f32.mrf.mxu1 }
 0x47a   : > { %v4721_v55 = vmul.f32 0.17677669, %v1729_v38  ;;  %5446 = vst [vmem:[#allocation33_spill] sm:$0xff] %v4729_v14 }
 0x47b   : > { %v1731_v30 = vpop.f32.mrf.mxu1 }
 0x47d   : > { %1168 = vperm.xlu1 %3530, %v1122_v17   ;;  %v1735_v31 = vpop.f32.mrf.mxu1  ;;  %v4717_v17 = vmul.f32 0.17677669, %v1719_v2 }
 0x47e   : > { %v4739_v11 = vmul.f32 0.17677669, %v1735_v31 }
 0x47f   : > { %v1737_v32 = vpop.f32.mrf.mxu1  ;;  %5444 = vst [vmem:[#allocation31_spill] sm:$0xff] %v4717_v17  ;;  %v1906_v57 = vmax.f32 %v4715_v36, %v4717_v17 }
 0x480   : > { %v4741_v34 = vmul.f32 0.17677669, %v1737_v32 }
 0x481   : > { %v1741_v19 = vpop.f32.mrf.mxu1 }
 0x482   : > { %v4733_v2 = vmul.f32 0.17677669, %v1741_v19  ;;  %5448 = vst [vmem:[#allocation35_spill] sm:$0xff] %v4741_v34 }
 0x483   : > { %v1743_v33 = vpop.f32.mrf.mxu1 }
 0x484   : > { %v4735_v62 = vmul.f32 0.17677669, %v1743_v33 }
 0x485   : > { %v1747_v35 = vpop.f32.mrf.mxu1 }
 0x486   : > { %1173 = vperm.xlu0 %3529, %v1123_v49   ;;  %v4723_v49 = vmul.f32 0.17677669, %v1731_v30  ;;  %5447 = vst [vmem:[#allocation34_spill] sm:$0xff] %v4735_v62  ;;  %v1909_v30 = vmax.f32 %v4727_v53, %v4729_v14  ;;  %v1918_v13 = vmax.f32 %v4733_v2, %v4735_v62  ;;  %v4747_v19 = vmul.f32 0.17677669, %v1747_v35 }
 0x487   : > { %v1749_v59 = vpop.f32.mrf.mxu1 }
 0x488   : > { %v1912_v12 = vmax.f32 %v4721_v55, %v4723_v49  ;;  %v4749_v17 = vmul.f32 0.17677669, %v1749_v59 }
 0x489   : > { %v1753_v38 = vpop.f32.mrf.mxu1 }
 0x48b   : > { %v1755_v29 = vpop.f32.mrf.mxu1 }
 0x48d   : > { %v1759_v14 = vpop.f32.mrf.mxu1 }
 0x4a1   : > { %1904 = vmax.xlane.f32.xlu1 %v1903_v54  ;;  %v1915_v54 = vmax.f32 %v4739_v11, %v4741_v34  ;;  %v4755_v34 = vmul.f32 0.17677669, %v1753_v38 }
 0x4a5   : > { %1907 = vmax.xlane.f32.xlu0 %v1906_v57  ;;  %1913 = vmax.xlane.f32.xlu1 %v1912_v12  ;;  %v1921_v57 = vmax.f32 %v4747_v19, %v4749_v17 }
 0x4a9   : > { %1910 = vmax.xlane.f32.xlu0 %v1909_v30  ;;  %1919 = vmax.xlane.f32.xlu1 %v1918_v13  ;;  %v1842_v33 = vpop.xlane.xlu0 %1841  ;;  %v4757_v30 = vmul.f32 0.17677669, %v1755_v29 }
 0x4aa   : > { %v1936_v31 = vsub.f32 %v4579_v22, %v1842_v33  ;;  %v1937_v32 = vsub.f32 %v4581_v23, %v1842_v33  ;;  %v1761_v22 = vpop.f32.mrf.mxu1 }
 0x4ab   : > { %v1924_v33 = vmax.f32 %v4755_v34, %v4757_v30  ;;  %v4765_v38 = vmul.f32 0.17677669, %v1761_v22 }
 0x4ac   : > { %v2000_v53 = vmul.f32 1.442695, %v1936_v31  ;;  %v2002_v62 = vmul.f32 1.442695, %v1937_v32  ;;  %v4763_v32 = vmul.f32 0.17677669, %v1759_v14 }
 0x4ad   : > { %v1845_v12 = vpop.xlane.xlu1 %1844  ;;  %1916 = vmax.xlane.f32.xlu0 %v1915_v54 }
 0x4ae   : > { %3531 = vpow2.f32 %v2000_v53  ;;  %v1938_v35 = vsub.f32 %v4585_v24, %v1845_v12  ;;  %v1939_v59 = vsub.f32 %v4587_v1, %v1845_v12 }
 0x4af   : > { %3533 = vpow2.f32 %v2002_v62  ;;  %v1927_v62 = vmax.f32 %v4763_v32, %v4765_v38 }
 0x4b0   : > { %v2004_v23 = vmul.f32 1.442695, %v1938_v35  ;;  %v2006_v13 = vmul.f32 1.442695, %v1939_v59 }
 0x4b1   : > { %1922 = vmax.xlane.f32.xlu0 %v1921_v57  ;;  %v1848_v31 = vpop.xlane.xlu0 %1847 }
 0x4b2   : > { %3535 = vpow2.f32 %v2004_v23  ;;  %v1940_v53 = vsub.f32 %v4591_v6, %v1848_v31  ;;  %v1941_v24 = vsub.f32 %v4593_v26, %v1848_v31 }
 0x4b3   : > { %3537 = vpow2.f32 %v2006_v13 }
 0x4b4   : > { %v2008_v1 = vmul.f32 1.442695, %v1940_v53  ;;  %v2010_v29 = vmul.f32 1.442695, %v1941_v24 }
 0x4b5   : > { %v1851_v54 = vpop.xlane.xlu1 %1850  ;;  %1925 = vmax.xlane.f32.xlu0 %v1924_v33 }
 0x4b6   : > { %3539 = vpow2.f32 %v2008_v1  ;;  %v1942_v57 = vsub.f32 %v4597_v7, %v1851_v54  ;;  %v1943_v14 = vsub.f32 %v4599_v37, %v1851_v54 }
 0x4b7   : > { %3541 = vpow2.f32 %v2010_v29  ;;  %v792_v29 = vld [vmem:[%s5383_s2 + $0x68] sm:$0xff] }
 0x4b8   : > { %v2012_v12 = vmul.f32 1.442695, %v1942_v57  ;;  %v2014_v35 = vmul.f32 1.442695, %v1943_v14  ;;  %964 = vmatprep.mubr.f32.mxu0 %v792_v29 }
 0x4b9   : > { %1928 = vmax.xlane.f32.xlu0 %v1927_v62  ;;  %v1854_v6 = vpop.xlane.xlu0 %1853 }
 0x4ba   : > { %3543 = vpow2.f32 %v2012_v12  ;;  %v1944_v26 = vsub.f32 %v4603_v41, %v1854_v6  ;;  %v1945_v59 = vsub.f32 %v4605_v42, %v1854_v6 }
 0x4bb   : > { %v4775_v22 = vpop.eup %3531  ;;  %3545 = vpow2.f32 %v2014_v35 }
 0x4bc   : > { %v4777_v23 = vpop.eup %3533  ;;  %v2016_v13 = vmul.f32 1.442695, %v1944_v26  ;;  %v2018_v33 = vmul.f32 1.442695, %v1945_v59  ;;  %v795_v26 = vld [vmem:[%s5383_s2 + $0x80] sm:$0xff] }
 0x4bd   : > { %v1857_v7 = vpop.xlane.xlu1 %1856  ;;  %v2128_v37 = vadd.f32 %v4777_v23, %v4775_v22 }
 0x4be   : > { %3547 = vpow2.f32 %v2016_v13  ;;  %v1946_v31 = vsub.f32 %v4609_v46, %v1857_v7  ;;  %v1947_v53 = vsub.f32 %v4611_v47, %v1857_v7  ;;  %v791_v46 = vld [vmem:[%s5383_s2 + $0x60] sm:$0xff] }
 0x4bf   : > { %v4783_v24 = vpop.eup %3535  ;;  %3549 = vpow2.f32 %v2018_v33  ;;  %2129 = vadd.xlane.f32.xlu1 %v2128_v37  ;;  %965 = vmatmul.mubr.f32.gmra.mxu0 %v791_v46 }
 0x4c0   : > { %v4785_v41 = vpop.eup %3537  ;;  %v2020_v42 = vmul.f32 1.442695, %v1946_v31  ;;  %v2022_v1 = vmul.f32 1.442695, %v1947_v53  ;;  %970 = vmatprep.mubr.f32.mxu0 %v795_v26 }
 0x4c1   : > { %v1860_v62 = vpop.xlane.xlu0 %1859  ;;  %v2131_v54 = vadd.f32 %v4785_v41, %v4783_v24 }
 0x4c2   : > { %3551 = vpow2.f32 %v2020_v42  ;;  %v1948_v47 = vsub.f32 %v4615_v51, %v1860_v62  ;;  %v1949_v57 = vsub.f32 %v4617_v52, %v1860_v62  ;;  %v794_v51 = vld [vmem:[%s5383_s2 + $0x78] sm:$0xff] }
 0x4c3   : > { %v4797_v14 = vpop.eup %3539  ;;  %3553 = vpow2.f32 %v2022_v1  ;;  %2132 = vadd.xlane.f32.xlu1 %v2131_v54  ;;  %971 = vmatmul.mubr.f32.gmra.mxu0 %v794_v51  ;;  %v798_v42 = vld [vmem:[%s5383_s2 + $0x98] sm:$0xff]  ;;  %v797_v1 = vld [vmem:[%s5383_s2 + $0x90] sm:$0xff] }
 0x4c4   : > { %v4799_v12 = vpop.eup %3541  ;;  %v2024_v35 = vmul.f32 1.442695, %v1948_v47  ;;  %v2026_v6 = vmul.f32 1.442695, %v1949_v57  ;;  %976 = vmatprep.mubr.f32.mxu0 %v798_v42  ;;  %v801_v54 = vld [vmem:[%s5383_s2 + $0xb0] sm:$0xff]  ;;  %v800_v47 = vld [vmem:[%s5383_s2 + $0xa8] sm:$0xff] }
 0x4c5   : > { %v1863_v59 = vpop.xlane.xlu1 %1862  ;;  %v2134_v13 = vadd.f32 %v4799_v12, %v4797_v14 }
 0x4c6   : > { %3555 = vpow2.f32 %v2024_v35  ;;  %v1950_v52 = vsub.f32 %v4621_v60, %v1863_v59  ;;  %v1951_v33 = vsub.f32 %v4623_v61, %v1863_v59 }
 0x4c7   : > { %v4811_v7 = vpop.eup %3543  ;;  %3557 = vpow2.f32 %v2026_v6  ;;  %2135 = vadd.xlane.f32.xlu1 %v2134_v13  ;;  %977 = vmatmul.mubr.f32.gmra.mxu0 %v797_v1  ;;  %v1765_v13 = vpop.f32.mrf.mxu1 }
 0x4c8   : > { %v4813_v37 = vpop.eup %3545  ;;  %v2028_v31 = vmul.f32 1.442695, %v1950_v52  ;;  %v2030_v53 = vmul.f32 1.442695, %v1951_v33  ;;  %982 = vmatprep.mubr.f32.mxu0 %v801_v54 }
 0x4c9   : > { %v1866_v60 = vpop.xlane.xlu0 %1865  ;;  %v2137_v61 = vadd.f32 %v4813_v37, %v4811_v7 }
 0x4ca   : > { %3559 = vpow2.f32 %v2028_v31  ;;  %v1952_v29 = vsub.f32 %v4627_v8, %v1866_v60  ;;  %v1953_v62 = vsub.f32 %v4629_v10, %v1866_v60 }
 0x4cb   : > { %v4828_v46 = vpop.eup %3547  ;;  %3561 = vpow2.f32 %v2030_v53  ;;  %2138 = vadd.xlane.f32.xlu1 %v2137_v61  ;;  %983 = vmatmul.mubr.f32.gmra.mxu0 %v800_v47 }
 0x4cc   : > { %v4833_v57 = vpop.eup %3549  ;;  %v2032_v35 = vmul.f32 1.442695, %v1952_v29  ;;  %v2034_v8 = vmul.f32 1.442695, %v1953_v62 }
 0x4cd   : > { %v1869_v6 = vpop.xlane.xlu1 %1868  ;;  %v2140_v10 = vadd.f32 %v4833_v57, %v4828_v46 }
 0x4ce   : > { %3563 = vpow2.f32 %v2032_v35  ;;  %v1954_v26 = vsub.f32 %v4633_v16, %v1869_v6  ;;  %v1955_v59 = vsub.f32 %v4635_v18, %v1869_v6  ;;  %v1767_v18 = vpop.f32.mrf.mxu1 }
 0x4cf   : > { %v4839_v51 = vpop.eup %3551  ;;  %3565 = vpow2.f32 %v2034_v8  ;;  %2141 = vadd.xlane.f32.xlu1 %v2140_v10 }
 0x4d0   : > { %v4841_v52 = vpop.eup %3553  ;;  %v2036_v33 = vmul.f32 1.442695, %v1954_v26  ;;  %v2038_v31 = vmul.f32 1.442695, %v1955_v59  ;;  %v1771_v8 = vpop.f32.mrf.mxu1  ;;  %v4859_v59 = vmul.f32 0.17677669, %v1765_v13 }
 0x4d1   : > { %v1872_v53 = vpop.xlane.xlu0 %1871  ;;  %v2143_v42 = vadd.f32 %v4841_v52, %v4839_v51 }
 0x4d2   : > { %3567 = vpow2.f32 %v2036_v33  ;;  %v1956_v1 = vsub.f32 %v4639_v0, %v1872_v53  ;;  %v1957_v16 = vsub.f32 %v4641_v3, %v1872_v53  ;;  %v4861_v33 = vmul.f32 0.17677669, %v1767_v18 }
 0x4d3   : > { %v4847_v60 = vpop.eup %3555  ;;  %3569 = vpow2.f32 %v2038_v31  ;;  %2144 = vadd.xlane.f32.xlu1 %v2143_v42  ;;  %v1773_v42 = vpop.f32.mrf.mxu1 }
 0x4d4   : > { %v4849_v61 = vpop.eup %3557  ;;  %v2040_v29 = vmul.f32 1.442695, %v1956_v1  ;;  %v2042_v62 = vmul.f32 1.442695, %v1957_v16  ;;  %v1930_v18 = vmax.f32 %v4859_v59, %v4861_v33 }
 0x4d5   : > { %v1875_v54 = vpop.xlane.xlu1 %1874  ;;  %v2146_v47 = vadd.f32 %v4849_v61, %v4847_v60 }
 0x4d6   : > { %3571 = vpow2.f32 %v2040_v29  ;;  %v1958_v35 = vsub.f32 %v4645_v25, %v1875_v54  ;;  %v1959_v0 = vsub.f32 %v4647_v28, %v1875_v54  ;;  %v4875_v54 = vmul.f32 0.17677669, %v1773_v42 }
 0x4d7   : > { %v4855_v3 = vpop.eup %3559  ;;  %3573 = vpow2.f32 %v2042_v62  ;;  %2147 = vadd.xlane.f32.xlu0 %v2146_v47  ;;  %v4873_v62 = vmul.f32 0.17677669, %v1771_v8 }
 0x4d8   : > { %v4857_v6 = vpop.eup %3561  ;;  %v2044_v10 = vmul.f32 1.442695, %v1958_v35  ;;  %v2046_v26 = vmul.f32 1.442695, %v1959_v0 }
 0x4d9   : > { %v1878_v31 = vpop.xlane.xlu0 %1877  ;;  %v2149_v53 = vadd.f32 %v4857_v6, %v4855_v3 }
 0x4da   : > { %3575 = vpow2.f32 %v2044_v10  ;;  %v1960_v25 = vsub.f32 %v4651_v39, %v1878_v31  ;;  %v1961_v28 = vsub.f32 %v4653_v43, %v1878_v31  ;;  %v1933_v31 = vmax.f32 %v4873_v62, %v4875_v54 }
 0x4db   : > { %v4867_v1 = vpop.eup %3563  ;;  %3577 = vpow2.f32 %v2046_v26  ;;  %2150 = vadd.xlane.f32.xlu0 %v2149_v53 }
 0x4dc   : > { %v4869_v16 = vpop.eup %3565  ;;  %v2048_v13 = vmul.f32 1.442695, %v1960_v25  ;;  %v2050_v29 = vmul.f32 1.442695, %v1961_v28 }
 0x4dd   : > { %v1881_v47 = vpop.xlane.xlu1 %1880  ;;  %v2152_v39 = vadd.f32 %v4869_v16, %v4867_v1 }
 0x4de   : > { %3579 = vpow2.f32 %v2048_v13  ;;  %v1962_v43 = vsub.f32 %v4657_v48, %v1881_v47  ;;  %v1963_v35 = vsub.f32 %v4659_v50, %v1881_v47 }
 0x4df   : > { %v4881_v0 = vpop.eup %3567  ;;  %3581 = vpow2.f32 %v2050_v29  ;;  %1931 = vmax.xlane.f32.xlu0 %v1930_v18  ;;  %2153 = vadd.xlane.f32.xlu1 %v2152_v39 }
 0x4e0   : > { %v4883_v10 = vpop.eup %3569  ;;  %v2052_v8 = vmul.f32 1.442695, %v1962_v43  ;;  %v2054_v26 = vmul.f32 1.442695, %v1963_v35 }
 0x4e1   : > { %v1884_v53 = vpop.xlane.xlu0 %1883  ;;  %v2155_v25 = vadd.f32 %v4883_v10, %v4881_v0 }
 0x4e2   : > { %3583 = vpow2.f32 %v2052_v8  ;;  %v1964_v48 = vsub.f32 %v4663_v58, %v1884_v53  ;;  %v1965_v50 = vsub.f32 %v4665_v63, %v1884_v53 }
 0x4e3   : > { %v4891_v28 = vpop.eup %3571  ;;  %3585 = vpow2.f32 %v2054_v26  ;;  %1934 = vmax.xlane.f32.xlu0 %v1933_v31  ;;  %2156 = vadd.xlane.f32.xlu1 %v2155_v25 }
 0x4e4   : > { %v4893_v42 = vpop.eup %3573  ;;  %v2056_v13 = vmul.f32 1.442695, %v1964_v48  ;;  %v2058_v29 = vmul.f32 1.442695, %v1965_v50 }
 0x4e5   : > { %v1887_v18 = vpop.xlane.xlu1 %1886  ;;  %v2158_v47 = vadd.f32 %v4893_v42, %v4891_v28 }
 0x4e6   : > { %3587 = vpow2.f32 %v2056_v13  ;;  %v1966_v39 = vsub.f32 %v4669_v15, %v1887_v18  ;;  %v1967_v58 = vsub.f32 %v4671_v20, %v1887_v18 }
 0x4e7   : > { %v4899_v43 = vpop.eup %3575  ;;  %3589 = vpow2.f32 %v2058_v29  ;;  %2159 = vadd.xlane.f32.xlu0 %v2158_v47 }
 0x4e8   : > { %v4901_v63 = vpop.eup %3577  ;;  %v2060_v35 = vmul.f32 1.442695, %v1966_v39  ;;  %v2062_v8 = vmul.f32 1.442695, %v1967_v58 }
 0x4e9   : > { %v1890_v26 = vpop.xlane.xlu0 %1889  ;;  %v2161_v31 = vadd.f32 %v4901_v63, %v4899_v43 }
 0x4ea   : > { %3591 = vpow2.f32 %v2060_v35  ;;  %v1968_v53 = vsub.f32 %v4675_v4, %v1890_v26  ;;  %v1969_v25 = vsub.f32 %v4677_v27, %v1890_v26 }
 0x4eb   : > { %v4907_v15 = vpop.eup %3579  ;;  %3593 = vpow2.f32 %v2062_v8  ;;  %2162 = vadd.xlane.f32.xlu1 %v2161_v31 }
 0x4ec   : > { %v4909_v20 = vpop.eup %3581  ;;  %v2064_v48 = vmul.f32 1.442695, %v1968_v53  ;;  %v2066_v50 = vmul.f32 1.442695, %v1969_v25 }
 0x4ed   : > { %v1893_v13 = vpop.xlane.xlu1 %1892  ;;  %v2164_v29 = vadd.f32 %v4909_v20, %v4907_v15 }
 0x4ee   : > { %3595 = vpow2.f32 %v2064_v48  ;;  %v1970_v18 = vsub.f32 %v4681_v40, %v1893_v13  ;;  %v1971_v47 = vsub.f32 %v4683_v45, %v1893_v13 }
 0x4ef   : > { %v4915_v4 = vpop.eup %3583  ;;  %3597 = vpow2.f32 %v2066_v50  ;;  %2165 = vadd.xlane.f32.xlu0 %v2164_v29 }
 0x4f0   : > { %v4917_v27 = vpop.eup %3585  ;;  %v2068_v39 = vmul.f32 1.442695, %v1970_v18  ;;  %v2070_v58 = vmul.f32 1.442695, %v1971_v47 }
 0x4f1   : > { %v1896_v35 = vpop.xlane.xlu0 %1895  ;;  %v2167_v8 = vadd.f32 %v4917_v27, %v4915_v4 }
 0x4f2   : > { %3599 = vpow2.f32 %v2068_v39  ;;  %v1972_v26 = vsub.f32 %v4687_v56, %v1896_v35  ;;  %v1973_v31 = vsub.f32 %v4689_v9, %v1896_v35 }
 0x4f3   : > { %v4923_v40 = vpop.eup %3587  ;;  %3601 = vpow2.f32 %v2070_v58  ;;  %2168 = vadd.xlane.f32.xlu1 %v2167_v8 }
 0x4f4   : > { %v4925_v45 = vpop.eup %3589  ;;  %v2072_v53 = vmul.f32 1.442695, %v1972_v26  ;;  %v2074_v25 = vmul.f32 1.442695, %v1973_v31 }
 0x4f5   : > { %v1899_v48 = vpop.xlane.xlu1 %1898  ;;  %v2170_v50 = vadd.f32 %v4925_v45, %v4923_v40 }
 0x4f6   : > { %3603 = vpow2.f32 %v2072_v53  ;;  %v1974_v13 = vsub.f32 %v4693_v21, %v1899_v48  ;;  %v1975_v29 = vsub.f32 %v4695_v5, %v1899_v48  ;;  %v5451_v21 = vld [vmem:[#allocation28_spill] sm:$0xff] }
 0x4f7   : > { %v4931_v56 = vpop.eup %3591  ;;  %3605 = vpow2.f32 %v2074_v25  ;;  %2171 = vadd.xlane.f32.xlu0 %v2170_v50 }
 0x4f8   : > { %5449 = vst [vmem:[#allocation36_spill] sm:$0xff] %v4931_v56  ;;  %v4933_v9 = vpop.eup %3593  ;;  %v2076_v18 = vmul.f32 1.442695, %v1974_v13  ;;  %v2078_v47 = vmul.f32 1.442695, %v1975_v29 }
 0x4f9   : > { %v1902_v39 = vpop.xlane.xlu0 %1901  ;;  %v2173_v58 = vadd.f32 %v4933_v9, %v4931_v56 }
 0x4fa   : > { %3607 = vpow2.f32 %v2076_v18  ;;  %v1976_v35 = vsub.f32 %v4699_v44, %v1902_v39  ;;  %v1977_v5 = vsub.f32 %v5451_v21, %v1902_v39  ;;  %v1169_v44 = vpop.permute.xlu1 %1168  ;;  %v5455_v18 = vld [vmem:[#allocation26_spill] sm:$0xff]  ;;  %v5456_v39 = vld [vmem:[#allocation27_spill] sm:$0xff] }
 0x4fb   : > { %v4938_v8 = vpop.eup %3595  ;;  %3609 = vpow2.f32 %v2078_v47  ;;  %2174 = vadd.xlane.f32.xlu1 %v2173_v58 }
 0x4fc   : > { %5450 = vst [vmem:[#allocation37_spill] sm:$0xff] %v4938_v8  ;;  %v4941_v26 = vpop.eup %3597  ;;  %v2080_v31 = vmul.f32 1.442695, %v1976_v35  ;;  %v2082_v53 = vmul.f32 1.442695, %v1977_v5  ;;  %v5459_v5 = vld [vmem:[#allocation25_spill] sm:$0xff] }
 0x4fd   : > { %5452 = vst [vmem:[#allocation28_spill] sm:$0xff] %v4941_v26  ;;  %v2176_v25 = vadd.f32 %v4941_v26, %v4938_v8  ;;  %v5467_v8 = vld [vmem:[#allocation31_spill] sm:$0xff] }
 0x4fe   : > { %3611 = vpow2.f32 %v2080_v31  ;;  %v1339_v31 = vadd.f32 %v5459_v5, %v1169_v44  ;;  %v5465_v5 = vld [vmem:[#allocation29_spill] sm:$0xff] }
 0x4ff   : > { %v4945_v48 = vpop.eup %3599  ;;  %3613 = vpow2.f32 %v2082_v53  ;;  %2177 = vadd.xlane.f32.xlu0 %v2176_v25 }
 0x500   : > { %5453 = vst [vmem:[#allocation38_spill] sm:$0xff] %v4945_v48  ;;  %v4947_v50 = vpop.eup %3601 }
 0x501   : > { %5454 = vst [vmem:[#allocation39_spill] sm:$0xff] %v4947_v50  ;;  %v1174_v13 = vpop.permute.xlu0 %1173  ;;  %v2179_v29 = vadd.f32 %v4947_v50, %v4945_v48  ;;  %v5461_v48 = vld [vmem:[#allocation24_spill] sm:$0xff] }
 0x502   : > { %v1343_v47 = vadd.f32 %v5455_v18, %v1174_v13  ;;  %v1345_v58 = vadd.f32 %v5456_v39, %v1174_v13  ;;  %v1337_v50 = vadd.f32 %v5461_v48, %v1169_v44  ;;  %v5466_v48 = vld [vmem:[#allocation30_spill] sm:$0xff] }
 0x503   : > { %v4953_v35 = vpop.eup %3603  ;;  %2180 = vadd.xlane.f32.xlu1 %v2179_v29 }
 0x504   : > { %5457 = vst [vmem:[#allocation26_spill] sm:$0xff] %v4953_v35  ;;  %v4955_v21 = vpop.eup %3605  ;;  %2348 = vmatprep.subr.mxu0 %v1345_v58 }
 0x505   : > { %5458 = vst [vmem:[#allocation27_spill] sm:$0xff] %v4955_v21  ;;  %2349 = vmatpush1.xpose.msra.mxu0 %v1343_v47  ;;  %v2182_v53 = vadd.f32 %v4955_v21, %v4953_v35 }
 0x506   : > { %2350 = vmatprep.subr.mxu0 %v1339_v31 }
 0x507   : > { %v4960_v25 = vpop.eup %3607  ;;  %2183 = vadd.xlane.f32.xlu0 %v2182_v53 }
 0x508   : > { %5460 = vst [vmem:[#allocation25_spill] sm:$0xff] %v4960_v25  ;;  %v4963_v18 = vpop.eup %3609 }
 0x509   : > { %5462 = vst [vmem:[#allocation24_spill] sm:$0xff] %v4963_v18  ;;  %2351 = vmatpush1.xpose.msra.mxu0 %v1337_v50  ;;  %v2185_v13 = vadd.f32 %v4963_v18, %v4960_v25 }
 0x50b   : > { %v4967_v29 = vpop.eup %3611  ;;  %2186 = vadd.xlane.f32.xlu1 %v2185_v13 }
 0x50c   : > { %5463 = vst [vmem:[#allocation40_spill] sm:$0xff] %v4967_v29  ;;  %v4969_v39 = vpop.eup %3613 }
 0x50d   : > { %5464 = vst [vmem:[#allocation41_spill] sm:$0xff] %v4969_v39  ;;  %v2188_v47 = vadd.f32 %v4969_v39, %v4967_v29 }
 0x50f   : > { %2189 = vadd.xlane.f32.xlu0 %v2188_v47 }
 0x52a   : > { %v1905_v58 = vpop.xlane.xlu1 %1904 }
 0x52b   : > { %v1978_v31 = vsub.f32 %v5465_v5, %v1905_v58  ;;  %v1979_v44 = vsub.f32 %v5466_v48, %v1905_v58  ;;  %v5468_v48 = vld [vmem:[#allocation34_spill] sm:$0xff] }
 0x52d   : > { %v2084_v53 = vmul.f32 1.442695, %v1978_v31  ;;  %v2086_v35 = vmul.f32 1.442695, %v1979_v44 }
 0x52e   : > { %v1914_v50 = vpop.xlane.xlu1 %1913  ;;  %v1908_v21 = vpop.xlane.xlu0 %1907 }
 0x52f   : > { %3615 = vpow2.f32 %v2084_v53  ;;  %v1984_v25 = vsub.f32 %v4721_v55, %v1914_v50  ;;  %v1985_v13 = vsub.f32 %v4723_v49, %v1914_v50  ;;  %v1980_v18 = vsub.f32 %v4715_v36, %v1908_v21  ;;  %v5469_v53 = vld [vmem:[#allocation32_spill] sm:$0xff]  ;;  %v5470_v49 = vld [vmem:[#allocation33_spill] sm:$0xff] }
 0x530   : > { %3617 = vpow2.f32 %v2086_v35  ;;  %v1981_v29 = vsub.f32 %v5467_v8, %v1908_v21 }
 0x531   : > { %v2096_v47 = vmul.f32 1.442695, %v1984_v25  ;;  %v2098_v39 = vmul.f32 1.442695, %v1985_v13  ;;  %v2088_v26 = vmul.f32 1.442695, %v1980_v18 }
 0x532   : > { %v2090_v5 = vmul.f32 1.442695, %v1981_v29  ;;  %v1920_v56 = vpop.xlane.xlu1 %1919  ;;  %v1911_v58 = vpop.xlane.xlu0 %1910  ;;  %v5471_v29 = vld [vmem:[#allocation35_spill] sm:$0xff] }
 0x533   : > { %3619 = vpow2.f32 %v2096_v47  ;;  %v1988_v31 = vsub.f32 %v4733_v2, %v1920_v56  ;;  %v1989_v44 = vsub.f32 %v5468_v48, %v1920_v56  ;;  %v1982_v55 = vsub.f32 %v5469_v53, %v1911_v58 }
 0x534   : > { %3621 = vpow2.f32 %v2098_v39  ;;  %v1983_v50 = vsub.f32 %v5470_v49, %v1911_v58 }
 0x535   : > { %3623 = vpow2.f32 %v2088_v26  ;;  %v2104_v36 = vmul.f32 1.442695, %v1988_v31  ;;  %v2106_v35 = vmul.f32 1.442695, %v1989_v44  ;;  %v2092_v8 = vmul.f32 1.442695, %v1982_v55 }
 0x536   : > { %3625 = vpow2.f32 %v2090_v5  ;;  %v2094_v21 = vmul.f32 1.442695, %v1983_v50  ;;  %v1917_v25 = vpop.xlane.xlu0 %1916 }
 0x537   : > { %3627 = vpow2.f32 %v2104_v36  ;;  %v1986_v18 = vsub.f32 %v4739_v11, %v1917_v25  ;;  %v1987_v13 = vsub.f32 %v5471_v29, %v1917_v25 }
 0x538   : > { %3629 = vpow2.f32 %v2106_v35 }
 0x539   : > { %3631 = vpow2.f32 %v2092_v8  ;;  %v2100_v2 = vmul.f32 1.442695, %v1986_v18  ;;  %v2102_v56 = vmul.f32 1.442695, %v1987_v13 }
 0x53a   : > { %3633 = vpow2.f32 %v2094_v21  ;;  %v1923_v39 = vpop.xlane.xlu0 %1922 }
 0x53b   : > { %3635 = vpow2.f32 %v2100_v2  ;;  %v1990_v26 = vsub.f32 %v4747_v19, %v1923_v39  ;;  %v1991_v47 = vsub.f32 %v4749_v17, %v1923_v39 }
 0x53c   : > { %v4987_v58 = vpop.eup %3615  ;;  %3637 = vpow2.f32 %v2102_v56 }
 0x53d   : > { %v4989_v5 = vpop.eup %3617  ;;  %v2108_v31 = vmul.f32 1.442695, %v1990_v26  ;;  %v2110_v11 = vmul.f32 1.442695, %v1991_v47 }
 0x53e   : > { %v1926_v48 = vpop.xlane.xlu0 %1925  ;;  %v2191_v44 = vadd.f32 %v4989_v5, %v4987_v58 }
 0x53f   : > { %3639 = vpow2.f32 %v2108_v31  ;;  %v1992_v53 = vsub.f32 %v4755_v34, %v1926_v48  ;;  %v1993_v55 = vsub.f32 %v4757_v30, %v1926_v48 }
 0x540   : > { %v4995_v49 = vpop.eup %3619  ;;  %3641 = vpow2.f32 %v2110_v11  ;;  %2192 = vadd.xlane.f32.xlu1 %v2191_v44 }
 0x541   : > { %v4997_v17 = vpop.eup %3621  ;;  %v2112_v19 = vmul.f32 1.442695, %v1992_v53  ;;  %v2114_v50 = vmul.f32 1.442695, %v1993_v55 }
 0x542   : > { %v4999_v36 = vpop.eup %3623  ;;  %v1929_v35 = vpop.xlane.xlu0 %1928 }
 0x543   : > { %v5001_v8 = vpop.eup %3625  ;;  %3643 = vpow2.f32 %v2112_v19  ;;  %v1994_v21 = vsub.f32 %v4763_v32, %v1929_v35  ;;  %v1995_v34 = vsub.f32 %v4765_v38, %v1929_v35  ;;  %v2200_v38 = vadd.f32 %v4997_v17, %v4995_v49 }
 0x544   : > { %v5005_v25 = vpop.eup %3627  ;;  %3645 = vpow2.f32 %v2114_v50  ;;  %v2194_v30 = vadd.f32 %v5001_v8, %v4999_v36 }
 0x545   : > { %v5009_v18 = vpop.eup %3629  ;;  %v2116_v29 = vmul.f32 1.442695, %v1994_v21  ;;  %v2118_v13 = vmul.f32 1.442695, %v1995_v34 }
 0x546   : > { %v5011_v2 = vpop.eup %3631  ;;  %2195 = vadd.xlane.f32.xlu0 %v2194_v30  ;;  %v2206_v44 = vadd.f32 %v5009_v18, %v5005_v25 }
 0x547   : > { %v5013_v56 = vpop.eup %3633  ;;  %3647 = vpow2.f32 %v2116_v29 }
 0x548   : > { %v5015_v39 = vpop.eup %3635  ;;  %3649 = vpow2.f32 %v2118_v13  ;;  %v2130_v32 = vpop.xlane.xlu1 %2129  ;;  %v2197_v26 = vadd.f32 %v5013_v56, %v5011_v2 }
 0x549   : > { %v5021_v47 = vpop.eup %3637  ;;  %3651 = vrcp.f32 %v2130_v32 }
 0x54a   : > { %2201 = vadd.xlane.f32.xlu0 %v2200_v38  ;;  %2198 = vadd.xlane.f32.xlu1 %v2197_v26  ;;  %v2203_v31 = vadd.f32 %v5021_v47, %v5015_v39 }
 0x54c   : > { %v5025_v11 = vpop.eup %3639  ;;  %v2133_v48 = vpop.xlane.xlu1 %2132 }
 0x54d   : > { %v5029_v53 = vpop.eup %3641  ;;  %3653 = vrcp.f32 %v2133_v48 }
 0x54e   : > { %2207 = vadd.xlane.f32.xlu0 %v2206_v44  ;;  %2204 = vadd.xlane.f32.xlu1 %v2203_v31  ;;  %v2209_v55 = vadd.f32 %v5029_v53, %v5025_v11 }
 0x550   : > { %v5033_v19 = vpop.eup %3643  ;;  %v2136_v50 = vpop.xlane.xlu1 %2135 }
 0x551   : > { %v5035_v35 = vpop.eup %3645  ;;  %3655 = vrcp.f32 %v2136_v50 }
 0x552   : > { %2210 = vadd.xlane.f32.xlu1 %v2209_v55  ;;  %v2212_v21 = vadd.f32 %v5035_v35, %v5033_v19 }
 0x554   : > { %v5039_v34 = vpop.eup %3647  ;;  %v2139_v30 = vpop.xlane.xlu1 %2138  ;;  %2213 = vadd.xlane.f32.xlu0 %v2212_v21 }
 0x555   : > { %v5041_v29 = vpop.eup %3649  ;;  %3657 = vrcp.f32 %v2139_v30 }
 0x556   : > { %v3652_v13 = vpop.eup %3651  ;;  %v2215_v32 = vadd.f32 %v5041_v29, %v5039_v34 }
 0x557   : > { %v2257_v38 = vmul.f32 %v3652_v13, %v4777_v23  ;;  %v2256_v26 = vmul.f32 %v3652_v13, %v4775_v22 }
 0x558   : > { %v2142_v31 = vpop.xlane.xlu1 %2141  ;;  %2216 = vadd.xlane.f32.xlu1 %v2215_v32 }
 0x559   : > { %3659 = vrcp.f32 %v2142_v31  ;;  %2384 = vmatprep.mubr.f32.mxu0 %v2257_v38 }
 0x55a   : > { %v3654_v48 = vpop.eup %3653  ;;  %2385 = vmatmul.mubr.f32.vlgmr.msra.gmra.mxu0 %v2256_v26 }
 0x55b   : > { %v2259_v44 = vmul.f32 %v3654_v48, %v4785_v41  ;;  %v2258_v55 = vmul.f32 %v3654_v48, %v4783_v24 }
 0x55c   : > { %v2145_v50 = vpop.xlane.xlu1 %2144 }
 0x55d   : > { %3661 = vrcp.f32 %v2145_v50  ;;  %2389 = vmatprep.mubr.f32.mxu0 %v2259_v44 }
 0x55e   : > { %v3656_v21 = vpop.eup %3655  ;;  %2390 = vmatmul.mubr.f32.gmra.mxu0 %v2258_v55 }
 0x55f   : > { %v2261_v30 = vmul.f32 %v3656_v21, %v4799_v12  ;;  %v2260_v23 = vmul.f32 %v3656_v21, %v4797_v14 }
 0x560   : > { %v2148_v22 = vpop.xlane.xlu0 %2147 }
 0x561   : > { %3663 = vrcp.f32 %v2148_v22  ;;  %2394 = vmatprep.mubr.f32.mxu0 %v2261_v30 }
 0x562   : > { %v3658_v13 = vpop.eup %3657  ;;  %2395 = vmatmul.mubr.f32.gmra.mxu0 %v2260_v23 }
 0x563   : > { %v2263_v32 = vmul.f32 %v3658_v13, %v4813_v37  ;;  %v2262_v41 = vmul.f32 %v3658_v13, %v4811_v7 }
 0x564   : > { %v2151_v38 = vpop.xlane.xlu0 %2150 }
 0x565   : > { %3665 = vrcp.f32 %v2151_v38  ;;  %2399 = vmatprep.mubr.f32.mxu0 %v2263_v32 }
 0x566   : > { %v3660_v24 = vpop.eup %3659  ;;  %2400 = vmatmul.mubr.f32.gmra.mxu0 %v2262_v41 }
 0x567   : > { %v2265_v26 = vmul.f32 %v3660_v24, %v4833_v57  ;;  %v2264_v12 = vmul.f32 %v3660_v24, %v4828_v46 }
 0x568   : > { %v2154_v31 = vpop.xlane.xlu1 %2153  ;;  %v1932_v14 = vpop.xlane.xlu0 %1931 }
 0x569   : > { %3667 = vrcp.f32 %v2154_v31  ;;  %v1996_v48 = vsub.f32 %v4859_v59, %v1932_v14  ;;  %v1997_v44 = vsub.f32 %v4861_v33, %v1932_v14  ;;  %2404 = vmatprep.mubr.f32.mxu0 %v2265_v26 }
 0x56a   : > { %v3662_v37 = vpop.eup %3661  ;;  %2405 = vmatmul.mubr.f32.gmra.mxu0 %v2264_v12 }
 0x56b   : > { %v2120_v7 = vmul.f32 1.442695, %v1996_v48  ;;  %v2122_v55 = vmul.f32 1.442695, %v1997_v44  ;;  %v2267_v50 = vmul.f32 %v3662_v37, %v4841_v52  ;;  %v2266_v21 = vmul.f32 %v3662_v37, %v4839_v51 }
 0x56c   : > { %v2157_v30 = vpop.xlane.xlu1 %2156  ;;  %v1935_v57 = vpop.xlane.xlu0 %1934 }
 0x56d   : > { %3669 = vpow2.f32 %v2120_v7  ;;  %v1998_v46 = vsub.f32 %v4873_v62, %v1935_v57  ;;  %v1999_v23 = vsub.f32 %v4875_v54, %v1935_v57  ;;  %2409 = vmatprep.mubr.f32.mxu0 %v2267_v50 }
 0x56e   : > { %v3664_v59 = vpop.eup %3663  ;;  %3671 = vpow2.f32 %v2122_v55  ;;  %2410 = vmatmul.mubr.f32.gmra.mxu0 %v2266_v21 }
 0x56f   : > { %3673 = vrcp.f32 %v2157_v30  ;;  %v2124_v33 = vmul.f32 1.442695, %v1998_v46  ;;  %v2126_v22 = vmul.f32 1.442695, %v1999_v23  ;;  %v2269_v13 = vmul.f32 %v3664_v59, %v4849_v61 }
 0x570   : > { %v2160_v32 = vpop.xlane.xlu0 %2159  ;;  %v2268_v52 = vmul.f32 %v3664_v59, %v4847_v60 }
 0x571   : > { %3675 = vpow2.f32 %v2124_v33  ;;  %2414 = vmatprep.mubr.f32.mxu0 %v2269_v13 }
 0x572   : > { %v3666_v51 = vpop.eup %3665  ;;  %3677 = vpow2.f32 %v2126_v22  ;;  %2415 = vmatmul.mubr.f32.gmra.mxu0 %v2268_v52  ;;  %v808_v52 = vld [vmem:[%s5384_s3 + $0x28] sm:$0xff] }
 0x573   : > { %3679 = vrcp.f32 %v2160_v32  ;;  %v2271_v62 = vmul.f32 %v3666_v51, %v4857_v6  ;;  %v2270_v54 = vmul.f32 %v3666_v51, %v4855_v3  ;;  %v5472_v51 = vld [vmem:[#allocation36_spill] sm:$0xff] }
 0x574   : > { %v2163_v41 = vpop.xlane.xlu1 %2162 }
 0x575   : > { %3681 = vrcp.f32 %v2163_v41  ;;  %2419 = vmatprep.mubr.f32.mxu0 %v2271_v62  ;;  %v5473_v41 = vld [vmem:[#allocation28_spill] sm:$0xff] }
 0x576   : > { %v3668_v38 = vpop.eup %3667  ;;  %2420 = vmatmul.mubr.f32.gmra.mxu0 %v2270_v54 }
 0x577   : > { %v2273_v61 = vmul.f32 %v3668_v38, %v4869_v16  ;;  %v2272_v24 = vmul.f32 %v3668_v38, %v4867_v1 }
 0x578   : > { %v2166_v60 = vpop.xlane.xlu0 %2165 }
 0x579   : > { %3683 = vrcp.f32 %v2166_v60  ;;  %2424 = vmatprep.mubr.f32.mxu0 %v2273_v61  ;;  %v5474_v61 = vld [vmem:[#allocation37_spill] sm:$0xff] }
 0x57a   : > { %v5067_v26 = vpop.eup %3669  ;;  %2425 = vmatmul.mubr.f32.gmra.mxu0 %v2272_v24 }
 0x57b   : > { %v5069_v12 = vpop.eup %3671 }
 0x57c   : > { %v3674_v6 = vpop.eup %3673  ;;  %v2169_v31 = vpop.xlane.xlu1 %2168  ;;  %v2218_v3 = vadd.f32 %v5069_v12, %v5067_v26 }
 0x57d   : > { %3685 = vrcp.f32 %v2169_v31  ;;  %v2275_v14 = vmul.f32 %v3674_v6, %v4883_v10  ;;  %v2274_v16 = vmul.f32 %v3674_v6, %v4881_v0  ;;  %v5475_v6 = vld [vmem:[#allocation39_spill] sm:$0xff] }
 0x57e   : > { %v5075_v48 = vpop.eup %3675  ;;  %2219 = vadd.xlane.f32.xlu0 %v2218_v3  ;;  %v5476_v3 = vld [vmem:[#allocation38_spill] sm:$0xff] }
 0x57f   : > { %v5077_v1 = vpop.eup %3677  ;;  %2429 = vmatprep.mubr.f32.mxu0 %v2275_v14 }
 0x580   : > { %v3680_v44 = vpop.eup %3679  ;;  %2430 = vmatmul.mubr.f32.gmra.mxu0 %v2274_v16  ;;  %v2172_v37 = vpop.xlane.xlu0 %2171  ;;  %v2221_v7 = vadd.f32 %v5077_v1, %v5075_v48 }
 0x581   : > { %3687 = vrcp.f32 %v2172_v37  ;;  %v2277_v55 = vmul.f32 %v3680_v44, %v4893_v42  ;;  %v2276_v50 = vmul.f32 %v3680_v44, %v4891_v28  ;;  %v5477_v44 = vld [vmem:[#allocation27_spill] sm:$0xff] }
 0x582   : > { %v3682_v10 = vpop.eup %3681  ;;  %2222 = vadd.xlane.f32.xlu1 %v2221_v7  ;;  %v5478_v7 = vld [vmem:[#allocation26_spill] sm:$0xff] }
 0x583   : > { %2434 = vmatprep.mubr.f32.mxu0 %v2277_v55  ;;  %v2279_v0 = vmul.f32 %v3682_v10, %v4901_v63  ;;  %v2278_v30 = vmul.f32 %v3682_v10, %v4899_v43  ;;  %v5479_v10 = vld [vmem:[#allocation24_spill] sm:$0xff] }
 0x584   : > { %2435 = vmatmul.mubr.f32.gmra.mxu0 %v2276_v50  ;;  %v2175_v21 = vpop.xlane.xlu1 %2174 }
 0x585   : > { %3689 = vrcp.f32 %v2175_v21  ;;  %2439 = vmatprep.mubr.f32.mxu0 %v2279_v0  ;;  %v5480_v21 = vld [vmem:[#allocation25_spill] sm:$0xff] }
 0x586   : > { %v3684_v57 = vpop.eup %3683 }
 0x587   : > { %v2281_v46 = vmul.f32 %v3684_v57, %v4909_v20  ;;  %v2280_v42 = vmul.f32 %v3684_v57, %v4907_v15  ;;  %v809_v15 = vld [vmem:[%s5384_s3 + $0x30] sm:$0xff] }
 0x588   : > { %2440 = vmatmul.mubr.f32.gmra.mxu0 %v2278_v30  ;;  %v2178_v23 = vpop.xlane.xlu0 %2177 }
 0x589   : > { %3691 = vrcp.f32 %v2178_v23  ;;  %2444 = vmatprep.mubr.f32.mxu0 %v2281_v46  ;;  %v5481_v46 = vld [vmem:[#allocation41_spill] sm:$0xff] }
 0x58a   : > { %v3686_v28 = vpop.eup %3685 }
 0x58b   : > { %v2283_v59 = vmul.f32 %v3686_v28, %v4917_v27  ;;  %v2282_v33 = vmul.f32 %v3686_v28, %v4915_v4  ;;  %v810_v27 = vld [vmem:[%s5384_s3 + $0x38] sm:$0xff] }
 0x58c   : > { %2445 = vmatmul.mubr.f32.gmra.mxu0 %v2280_v42  ;;  %v2181_v63 = vpop.xlane.xlu1 %2180  ;;  %v5482_v42 = vld [vmem:[#allocation40_spill] sm:$0xff] }
 0x58d   : > { %3693 = vrcp.f32 %v2181_v63  ;;  %2449 = vmatprep.mubr.f32.mxu0 %v2283_v59 }
 0x58e   : > { %v3688_v43 = vpop.eup %3687 }
 0x58f   : > { %v2285_v22 = vmul.f32 %v3688_v43, %v4925_v45  ;;  %v2284_v13 = vmul.f32 %v3688_v43, %v4923_v40  ;;  %v807_v40 = vld [vmem:[%s5384_s3 + $0x20] sm:$0xff] }
 0x590   : > { %2450 = vmatmul.mubr.f32.gmra.mxu0 %v2282_v33  ;;  %v2184_v20 = vpop.xlane.xlu0 %2183 }
 0x591   : > { %3695 = vrcp.f32 %v2184_v20  ;;  %2454 = vmatprep.mubr.f32.mxu0 %v2285_v22 }
 0x592   : > { %v3690_v4 = vpop.eup %3689 }
 0x593   : > { %843 = vperm.xlu1 %3530, %v809_v15   ;;  %v2287_v32 = vmul.f32 %v3690_v4, %v4933_v9  ;;  %v2286_v62 = vmul.f32 %v3690_v4, %v5472_v51 }
 0x594   : > { %2455 = vmatmul.mubr.f32.gmra.mxu0 %v2284_v13  ;;  %848 = vperm.xlu0 %3529, %v810_v27   ;;  %v2187_v45 = vpop.xlane.xlu1 %2186 }
 0x595   : > { %3697 = vrcp.f32 %v2187_v45  ;;  %2459 = vmatprep.mubr.f32.mxu0 %v2287_v32 }
 0x596   : > { %v3692_v54 = vpop.eup %3691 }
 0x597   : > { %838 = vperm.xlu1 %3530, %v808_v52   ;;  %v2289_v38 = vmul.f32 %v3692_v54, %v5473_v41  ;;  %v2288_v24 = vmul.f32 %v3692_v54, %v5474_v61 }
 0x598   : > { %2460 = vmatmul.mubr.f32.gmra.mxu0 %v2286_v62  ;;  %833 = vperm.xlu0 %3529, %v807_v40   ;;  %v2190_v9 = vpop.xlane.xlu0 %2189 }
 0x599   : > { %3699 = vrcp.f32 %v2190_v9  ;;  %2464 = vmatprep.mubr.f32.mxu0 %v2289_v38 }
 0x59a   : > { %v3694_v60 = vpop.eup %3693 }
 0x59b   : > { %v2291_v31 = vmul.f32 %v3694_v60, %v5475_v6  ;;  %v2290_v14 = vmul.f32 %v3694_v60, %v5476_v3 }
 0x59c   : > { %2465 = vmatmul.mubr.f32.gmra.mxu0 %v2288_v24 }
 0x59d   : > { %2469 = vmatprep.mubr.f32.mxu0 %v2291_v31  ;;  %v5133_v31 = vpop.f32.mrf.mxu0 }
 0x59e   : > { %v3696_v16 = vpop.eup %3695 }
 0x59f   : > { %v2293_v37 = vmul.f32 %v3696_v16, %v5477_v44  ;;  %v2292_v55 = vmul.f32 %v3696_v16, %v5478_v7 }
 0x5a0   : > { %2470 = vmatmul.mubr.f32.gmra.mxu0 %v2290_v14 }
 0x5a1   : > { %2474 = vmatprep.mubr.f32.mxu0 %v2293_v37 }
 0x5a2   : > { %v3698_v50 = vpop.eup %3697 }
 0x5a3   : > { %v2295_v0 = vmul.f32 %v3698_v50, %v5479_v10  ;;  %v2294_v30 = vmul.f32 %v3698_v50, %v5480_v21 }
 0x5a4   : > { %2475 = vmatmul.mubr.f32.gmra.mxu0 %v2292_v55 }
 0x5a5   : > { %2479 = vmatprep.mubr.f32.mxu0 %v2295_v0 }
 0x5a6   : > { %v3700_v57 = vpop.eup %3699 }
 0x5a7   : > { %v2297_v23 = vmul.f32 %v3700_v57, %v5481_v46  ;;  %v2296_v28 = vmul.f32 %v3700_v57, %v5482_v42 }
 0x5a8   : > { %2480 = vmatmul.mubr.f32.gmra.mxu0 %v2294_v30 }
 0x5a9   : > { %2484 = vmatprep.mubr.f32.mxu0 %v2297_v23 }
 0x5ac   : > { %2485 = vmatmul.mubr.f32.gmra.mxu0 %v2296_v28 }
 0x5c9   : > { %v2193_v59 = vpop.xlane.xlu1 %2192 }
 0x5ca   : > { %3701 = vrcp.f32 %v2193_v59 }
 0x5cf   : > { %v2196_v63 = vpop.xlane.xlu0 %2195 }
 0x5d0   : > { %3703 = vrcp.f32 %v2196_v63 }
 0x5d3   : > { %v2199_v33 = vpop.xlane.xlu1 %2198  ;;  %v2202_v43 = vpop.xlane.xlu0 %2201 }
 0x5d4   : > { %3705 = vrcp.f32 %v2199_v33 }
 0x5d5   : > { %3707 = vrcp.f32 %v2202_v43 }
 0x5d7   : > { %v3702_v22 = vpop.eup %3701  ;;  %v2205_v20 = vpop.xlane.xlu1 %2204 }
 0x5d8   : > { %3709 = vrcp.f32 %v2205_v20  ;;  %v2299_v15 = vmul.f32 %v3702_v22, %v4989_v5  ;;  %v2298_v13 = vmul.f32 %v3702_v22, %v4987_v58  ;;  %v2208_v27 = vpop.xlane.xlu0 %2207 }
 0x5d9   : > { %3711 = vrcp.f32 %v2208_v27 }
 0x5da   : > { %2489 = vmatprep.mubr.f32.mxu0 %v2299_v15 }
 0x5db   : > { %2490 = vmatmul.mubr.f32.gmra.mxu0 %v2298_v13  ;;  %v2211_v32 = vpop.xlane.xlu1 %2210 }
 0x5dc   : > { %3713 = vrcp.f32 %v2211_v32 }
 0x5dd   : > { %v3704_v4 = vpop.eup %3703  ;;  %v2214_v62 = vpop.xlane.xlu0 %2213 }
 0x5de   : > { %v2301_v45 = vmul.f32 %v3704_v4, %v5001_v8  ;;  %v2300_v52 = vmul.f32 %v3704_v4, %v4999_v36  ;;  %3715 = vrcp.f32 %v2214_v62 }
 0x5e0   : > { %2494 = vmatprep.mubr.f32.mxu0 %v2301_v45 }
 0x5e1   : > { %v3706_v51 = vpop.eup %3705  ;;  %2495 = vmatmul.mubr.f32.gmra.mxu0 %v2300_v52  ;;  %v2217_v38 = vpop.xlane.xlu1 %2216 }
 0x5e2   : > { %v3708_v40 = vpop.eup %3707  ;;  %v2303_v5 = vmul.f32 %v3706_v51, %v5013_v56  ;;  %v2302_v58 = vmul.f32 %v3706_v51, %v5011_v2  ;;  %3717 = vrcp.f32 %v2217_v38 }
 0x5e3   : > { %v2305_v54 = vmul.f32 %v3708_v40, %v4997_v17  ;;  %v2304_v36 = vmul.f32 %v3708_v40, %v4995_v49 }
 0x5e4   : > { %2499 = vmatprep.mubr.f32.mxu0 %v2303_v5 }
 0x5e5   : > { %v3710_v41 = vpop.eup %3709  ;;  %2500 = vmatmul.mubr.f32.gmra.mxu0 %v2302_v58 }
 0x5e6   : > { %2504 = vmatprep.mubr.f32.mxu0 %v2305_v54  ;;  %v2307_v8 = vmul.f32 %v3710_v41, %v5021_v47  ;;  %v3712_v9 = vpop.eup %3711  ;;  %v2306_v56 = vmul.f32 %v3710_v41, %v5015_v39 }
 0x5e7   : > { %v2309_v2 = vmul.f32 %v3712_v9, %v5009_v18  ;;  %v2308_v17 = vmul.f32 %v3712_v9, %v5005_v25 }
 0x5e9   : > { %2505 = vmatmul.mubr.f32.gmra.mxu0 %v2304_v36  ;;  %v3714_v61 = vpop.eup %3713 }
 0x5ea   : > { %2509 = vmatprep.mubr.f32.mxu0 %v2307_v8  ;;  %v2311_v24 = vmul.f32 %v3714_v61, %v5029_v53  ;;  %v2310_v49 = vmul.f32 %v3714_v61, %v5025_v11  ;;  %v5135_v53 = vpop.f32.mrf.mxu0 }
 0x5eb   : > { %v3716_v60 = vpop.eup %3715 }
 0x5ec   : > { %v2313_v47 = vmul.f32 %v3716_v60, %v5035_v35  ;;  %v2312_v39 = vmul.f32 %v3716_v60, %v5033_v19  ;;  %v5137_v3 = vpop.f32.mrf.mxu0 }
 0x5ed   : > { %2510 = vmatmul.mubr.f32.gmra.mxu0 %v2306_v56 }
 0x5ee   : > { %2514 = vmatprep.mubr.f32.mxu0 %v2309_v2  ;;  %v5139_v35 = vpop.f32.mrf.mxu0 }
 0x5ef   : > { %v3718_v6 = vpop.eup %3717 }
 0x5f0   : > { %v2315_v18 = vmul.f32 %v3718_v6, %v5041_v29  ;;  %v2314_v25 = vmul.f32 %v3718_v6, %v5039_v34  ;;  %v5141_v16 = vpop.f32.mrf.mxu0  ;;  %v5173_v6 = vld [vmem:[#allocation5] sm:$0xff] }
 0x5f1   : > { %2515 = vmatmul.mubr.f32.gmra.mxu0 %v2308_v17  ;;  %3436 = vmatprep.mubr.msk.f32.mxu1 %vm851_vm8, %v5173_v6 }
 0x5f2   : > { %2519 = vmatprep.mubr.f32.mxu0 %v2311_v24  ;;  %v5143_v19 = vpop.f32.mrf.mxu0 }
 0x5f4   : > { %v5145_v29 = vpop.f32.mrf.mxu0 }
 0x5f5   : > { %2520 = vmatmul.mubr.f32.gmra.mxu0 %v2310_v49 }
 0x5f6   : > { %2524 = vmatprep.mubr.f32.mxu0 %v2313_v47  ;;  %v5149_v7 = vpop.f32.mrf.mxu0 }
 0x5f9   : > { %2525 = vmatmul.mubr.f32.gmra.mxu0 %v2312_v39 }
 0x5fa   : > { %2529 = vmatprep.mubr.f32.mxu0 %v2315_v18 }
 0x5fd   : > { %2530 = vmatmul.mubr.f32.gmra.mxu0 %v2314_v25 }
 0x607   : > { %v2220_v11 = vpop.xlane.xlu0 %2219 }
 0x608   : > { %3719 = vrcp.f32 %v2220_v11 }
 0x60b   : > { %v2223_v14 = vpop.xlane.xlu1 %2222 }
 0x60c   : > { %3721 = vrcp.f32 %v2223_v14 }
 0x615   : > { %v3720_v34 = vpop.eup %3719 }
 0x616   : > { %v2317_v44 = vmul.f32 %v3720_v34, %v5069_v12  ;;  %v2316_v37 = vmul.f32 %v3720_v34, %v5067_v26 }
 0x618   : > { %2534 = vmatprep.mubr.f32.mxu0 %v2317_v44 }
 0x619   : > { %v3722_v55 = vpop.eup %3721  ;;  %2535 = vmatmul.mubr.f32.gmra.mxu0 %v2316_v37 }
 0x61a   : > { %v5151_v50 = vpop.f32.mrf.mxu0  ;;  %v2319_v10 = vmul.f32 %v3722_v55, %v5077_v1  ;;  %v2318_v0 = vmul.f32 %v3722_v55, %v5075_v48 }
 0x61c   : > { %2539 = vmatprep.mubr.f32.mxu0 %v2319_v10  ;;  %v2388_v21 = vpop.f32.mrf.mxu0 }
 0x61d   : > { %2540 = vmatmul.mubr.f32.gmra.mxu0 %v2318_v0 }
 0x61e   : > { %v5155_v30 = vpop.f32.mrf.mxu0 }
 0x620   : > { %v2393_v57 = vpop.f32.mrf.mxu0 }
 0x622   : > { %v5157_v12 = vpop.f32.mrf.mxu0 }
 0x624   : > { %v2398_v26 = vpop.f32.mrf.mxu0 }
 0x626   : > { %v5159_v46 = vpop.f32.mrf.mxu0 }
 0x628   : > { %v2403_v23 = vpop.f32.mrf.mxu0 }
 0x62a   : > { %v5161_v42 = vpop.f32.mrf.mxu0 }
 0x62c   : > { %v2408_v28 = vpop.f32.mrf.mxu0 }
 0x62e   : > { %v5163_v59 = vpop.f32.mrf.mxu0 }
 0x630   : > { %v2413_v1 = vpop.f32.mrf.mxu0 }
 0x632   : > { %v5165_v63 = vpop.f32.mrf.mxu0 }
 0x634   : > { %v2418_v48 = vpop.f32.mrf.mxu0 }
 0x636   : > { %v5167_v33 = vpop.f32.mrf.mxu0 }
 0x638   : > { %v2423_v43 = vpop.f32.mrf.mxu0 }
 0x63a   : > { %v5169_v22 = vpop.f32.mrf.mxu0 }
 0x63c   : > { %v2428_v20 = vpop.f32.mrf.mxu0 }
 0x640   : > { %v2431_v15 = vpop.f32.mrf.mxu0 }
 0x642   : > { %v2433_v13 = vpop.f32.mrf.mxu0 }
 0x644   : > { %v2436_v27 = vpop.f32.mrf.mxu0 }
 0x646   : > { %v2438_v4 = vpop.f32.mrf.mxu0 }
 0x648   : > { %v2441_v32 = vpop.f32.mrf.mxu0 }
 0x64a   : > { %v2443_v45 = vpop.f32.mrf.mxu0 }
 0x64c   : > { %v2446_v52 = vpop.f32.mrf.mxu0 }
 0x64e   : > { %v2448_v51 = vpop.f32.mrf.mxu0 }
 0x650   : > { %v2451_v62 = vpop.f32.mrf.mxu0 }
 0x652   : > { %v2453_v40 = vpop.f32.mrf.mxu0 }
 0x654   : > { %v2456_v5 = vpop.f32.mrf.mxu0 }
 0x656   : > { %v2458_v58 = vpop.f32.mrf.mxu0 }
 0x658   : > { %v2461_v54 = vpop.f32.mrf.mxu0 }
 0x65a   : > { %v2463_v41 = vpop.f32.mrf.mxu0 }
 0x65b   : > { %v5489_v41 = vld [vmem:[#allocation17_spill] sm:$0xff] }
 0x65c   : > { %v5171_v38 = vpop.f32.mrf.mxu0 }
 0x65e   : > { %v2468_v36 = vpop.f32.mrf.mxu0 }
 0x660   : > { %v2471_v8 = vpop.f32.mrf.mxu0 }
 0x662   : > { %v2473_v9 = vpop.f32.mrf.mxu0 }
 0x664   : > { %v2476_v56 = vpop.f32.mrf.mxu0 }
 0x666   : > { %v2478_v2 = vpop.f32.mrf.mxu0 }
 0x668   : > { %v2481_v61 = vpop.f32.mrf.mxu0 }
 0x66a   : > { %v2483_v17 = vpop.f32.mrf.mxu0 }
 0x66c   : > { %v2486_v24 = vpop.f32.mrf.mxu0 }
 0x66e   : > { %v2488_v60 = vpop.f32.mrf.mxu0 }
 0x69b   : > { %v2491_v49 = vpop.f32.mrf.mxu0 }
 0x69d   : > { %v2493_v47 = vpop.f32.mrf.mxu0 }
 0x6a1   : > { %v2496_v39 = vpop.f32.mrf.mxu0 }
 0x6a3   : > { %v2498_v18 = vpop.f32.mrf.mxu0 }
 0x6a5   : > { %v2501_v25 = vpop.f32.mrf.mxu0 }
 0x6a7   : > { %v2503_v11 = vpop.f32.mrf.mxu0 }
 0x6a9   : > { %v2506_v14 = vpop.f32.mrf.mxu0 }
 0x6ab   : > { %v2508_v34 = vpop.f32.mrf.mxu0 }
 0x6ad   : > { %v2511_v44 = vpop.f32.mrf.mxu0 }
 0x6af   : > { %v2513_v37 = vpop.f32.mrf.mxu0 }
 0x6b1   : > { %v2516_v55 = vpop.f32.mrf.mxu0 }
 0x6b3   : > { %v2518_v10 = vpop.f32.mrf.mxu0 }
 0x6b5   : > { %v2521_v0 = vpop.f32.mrf.mxu0 }
 0x6b7   : > { %v2523_v21 = vpop.f32.mrf.mxu0 }
 0x6b9   : > { %v2526_v57 = vpop.f32.mrf.mxu0 }
 0x6bb   : > { %v2528_v26 = vpop.f32.mrf.mxu0 }
 0x6bd   : > { %v2531_v23 = vpop.f32.mrf.mxu0 }
 0x6bf   : > { %v2533_v28 = vpop.f32.mrf.mxu0 }
 0x6d9   : > { %v2536_v1 = vpop.f32.mrf.mxu0 }
 0x6db   : > { %v2538_v48 = vpop.f32.mrf.mxu0 }
 0x6dd   : > { %v2541_v43 = vpop.f32.mrf.mxu0 }
 0x6de   : > { %3404 = vmatprep.subr.msk.mxu1 %vm851_vm8, %v2541_v43 }
 0x6df   : > { %v2543_v20 = vpop.f32.mrf.mxu0  ;;  %3405 = vmatpush3.xpose.msk.msra.mxu1 %vm851_vm8, %v2461_v54 }
 0x6e0   : > { %3406 = vmatprep.subr.msk.mxu1 %vm851_vm8, %v2536_v1 }
 0x6e3   : > { %3407 = vmatpush3.xpose.msk.msra.mxu1 %vm851_vm8, %v2456_v5  ;;  %v5488_v5 = vld [vmem:[#allocation18_spill] sm:$0xff] }
 0x6e4   : > { %3408 = vmatprep.subr.msk.mxu1 %vm851_vm8, %v2531_v23 }
 0x6e7   : > { %3409 = vmatpush3.xpose.msk.msra.mxu1 %vm851_vm8, %v2451_v62 }
 0x6e8   : > { %3410 = vmatprep.subr.msk.mxu1 %vm851_vm8, %v2526_v57 }
 0x6eb   : > { %3411 = vmatpush3.xpose.msk.msra.mxu1 %vm851_vm8, %v2446_v52 }
 0x6ec   : > { %3412 = vmatprep.subr.msk.mxu1 %vm851_vm8, %v2521_v0 }
 0x6ef   : > { %3413 = vmatpush3.xpose.msk.msra.mxu1 %vm851_vm8, %v2441_v32 }
 0x6f0   : > { %3414 = vmatprep.subr.msk.mxu1 %vm851_vm8, %v2516_v55 }
 0x6f3   : > { %3415 = vmatpush3.xpose.msk.msra.mxu1 %vm851_vm8, %v2436_v27  ;;  %v5484_v27 = vld [vmem:[#allocation22_spill] sm:$0xff] }
 0x6f4   : > { %3416 = vmatprep.subr.msk.mxu1 %vm851_vm8, %v2511_v44 }
 0x6f7   : > { %3417 = vmatpush3.xpose.msk.msra.mxu1 %vm851_vm8, %v2431_v15 }
 0x6f8   : > { %3418 = vmatprep.subr.msk.mxu1 %vm851_vm8, %v2506_v14 }
 0x6fb   : > { %3419 = vmatpush3.xpose.msk.msra.mxu1 %vm851_vm8, %v5169_v22  ;;  %v5483_v22 = vld [vmem:[#allocation23_spill] sm:$0xff] }
 0x6fc   : > { %3420 = vmatprep.subr.msk.mxu1 %vm851_vm8, %v2501_v25 }
 0x6ff   : > { %3421 = vmatpush3.xpose.msk.msra.mxu1 %vm851_vm8, %v5167_v33  ;;  %v849_v33 = vpop.permute.xlu0 %848 }
 0x700   : > { %3422 = vmatprep.subr.msk.mxu1 %vm851_vm8, %v2496_v39 }
 0x703   : > { %3423 = vmatpush3.xpose.msk.msra.mxu1 %vm851_vm8, %v5165_v63  ;;  %v844_v63 = vpop.permute.xlu1 %843 }
 0x704   : > { %3424 = vmatprep.subr.msk.mxu1 %vm851_vm8, %v2491_v49 }
 0x707   : > { %3425 = vmatpush3.xpose.msk.msra.mxu1 %vm851_vm8, %v5163_v59  ;;  %v987_v59 = vadd.f32 %v5149_v7, %v849_v33  ;;  %v839_v13 = vpop.permute.xlu1 %838  ;;  %v979_v7 = vadd.f32 %v5141_v16, %v844_v63  ;;  %v5487_v16 = vld [vmem:[#allocation19_spill] sm:$0xff] }
 0x708   : > { %3426 = vmatprep.subr.msk.mxu1 %vm851_vm8, %v2486_v24  ;;  %v975_v45 = vadd.f32 %v5139_v35, %v839_v13  ;;  %v973_v51 = vadd.f32 %v5137_v3, %v839_v13  ;;  %v2548_v35 = vld [vmem:[#allocation5 + $0x18] sm:$0xff] }
 0x709   : > { %v1100_v15 = vadd.f32 %v5483_v22, %v987_v59 }
 0x70a   : > { %v1088_v62 = vadd.f32 %v5487_v16, %v975_v45  ;;  %v1086_v58 = vadd.f32 %v5488_v5, %v973_v51  ;;  %v2551_v45 = vld [vmem:[%s5388_s7 + $0x10] sm:$0xff]  ;;  %v3032_v51 = vld [vmem:[#allocation7 + $0xe0] sm:$0xff]  ;;  %v3031_v16 = vld [vmem:[#allocation7 + $0xd8] sm:$0xff] }
 0x70b   : > { %3427 = vmatpush3.xpose.msk.msra.mxu1 %vm851_vm8, %v5161_v42  ;;  %v985_v42 = vadd.f32 %v5145_v29, %v849_v33  ;;  %v2547_v29 = vld [vmem:[#allocation5 + $0x10] sm:$0xff]  ;;  %v3027_v5 = vld [vmem:[#allocation7 + $0xb8] sm:$0xff] }
 0x70c   : > { %3428 = vmatprep.subr.msk.mxu1 %vm851_vm8, %v2481_v61 }
 0x70d   : > { %v1098_v4 = vadd.f32 %v5484_v27, %v985_v42 }
 0x70f   : > { %3429 = vmatpush3.xpose.msk.msra.mxu1 %vm851_vm8, %v5159_v46  ;;  %v981_v46 = vadd.f32 %v5143_v19, %v844_v63  ;;  %v834_v19 = vpop.permute.xlu0 %833 }
 0x710   : > { %3430 = vmatprep.subr.msk.mxu1 %vm851_vm8, %v2476_v56  ;;  %v969_v40 = vadd.f32 %v5135_v53, %v834_v19  ;;  %v967_v54 = vadd.f32 %v5133_v31, %v834_v19  ;;  %v5490_v53 = vld [vmem:[#allocation16_spill] sm:$0xff]  ;;  %v5491_v31 = vmov 0.0   ;;  %v2552_v19 = vld [vmem:[%s5388_s7 + $0x18] sm:$0xff] }
 0x712   : > { %v1080_v3 = vadd.f32 %v5490_v53, %v967_v54  ;;  %v3025_v54 = vld [vmem:[#allocation7 + $0xa8] sm:$0xff]  ;;  %v3022_v53 = vld [vmem:[#allocation7 + $0x90] sm:$0xff] }
 0x713   : > { %3431 = vmatpush3.xpose.msk.msra.mxu1 %vm851_vm8, %v5157_v12  ;;  %v2546_v12 = vld [vmem:[#allocation5 + $0x8] sm:$0xff] }
 0x714   : > { %3432 = vmatprep.subr.msk.mxu1 %vm851_vm8, %v2471_v8 }
 0x717   : > { %3433 = vmatpush3.xpose.msk.msra.mxu1 %vm851_vm8, %v5155_v30  ;;  %v5485_v30 = vld [vmem:[#allocation21_spill] sm:$0xff] }
 0x718   : > { %3434 = vmatprep.subr.msk.mxu1 %vm851_vm8, %v5171_v38  ;;  %v1094_v32 = vadd.f32 %v5485_v30, %v981_v46  ;;  %v1082_v38 = vadd.f32 %v5489_v41, %v969_v40  ;;  %v2550_v30 = vld [vmem:[%s5388_s7 + $0x8] sm:$0xff]  ;;  %v3024_v41 = vld [vmem:[#allocation7 + $0xa0] sm:$0xff] }
 0x719   : > { %v3029_v40 = vld [vmem:[#allocation7 + $0xc8] sm:$0xff] }
 0x71b   : > { %3435 = vmatpush3.xpose.msk.msra.mxu1 %vm851_vm8, %v5151_v50  ;;  %v5486_v50 = vld [vmem:[#allocation20_spill] sm:$0xff] }
 0x71c   : > { %2794 = vmatprep.subr.mxu1 %v1100_v15  ;;  %v1092_v52 = vadd.f32 %v5486_v50, %v979_v7  ;;  %v3034_v50 = vld [vmem:[#allocation7 + $0xf0] sm:$0xff] }
 0x71e   : > { %3437 = vmatmul.mubr.msk.f32.vlgmr.msra.gmra.mxu1 %vm851_vm8, %v5173_v6 }
 0x71f   : > { %2795 = vmatpush1.xpose.msra.mxu1 %v1098_v4  ;;  %3438 = vmatprep.mubr.msk.f32.mxu1 %vm851_vm8, %v2546_v12 }
 0x720   : > { %2796 = vmatprep.subr.mxu1 %v1094_v32 }
 0x722   : > { %3439 = vmatmul.mubr.msk.f32.gmra.mxu1 %vm851_vm8, %v2546_v12 }
 0x723   : > { %2797 = vmatpush1.xpose.msra.mxu1 %v1092_v52  ;;  %3440 = vmatprep.mubr.msk.f32.mxu1 %vm851_vm8, %v2547_v29 }
 0x724   : > { %2798 = vmatprep.subr.mxu1 %v1088_v62 }
 0x726   : > { %3441 = vmatmul.mubr.msk.f32.gmra.mxu1 %vm851_vm8, %v2547_v29  ;;  %v3035_v29 = vld [vmem:[#allocation7 + $0xf8] sm:$0xff] }
 0x727   : > { %2799 = vmatpush1.xpose.msra.mxu1 %v1086_v58  ;;  %3442 = vmatprep.mubr.msk.f32.mxu1 %vm851_vm8, %v2548_v35 }
 0x728   : > { %2800 = vmatprep.subr.mxu1 %v1082_v38  ;;  %3080 = vmatprep.subr.mxu0 %v3035_v29  ;;  %v3048_v29 = vld [vmem:[#allocation7 + $0x160] sm:$0xff] }
 0x729   : > { %3081 = vmatpush1.msra.mxu0 %v3034_v50  ;;  %v3047_v50 = vld [vmem:[#allocation7 + $0x158] sm:$0xff] }
 0x72a   : > { %3443 = vmatmul.mubr.msk.f32.gmra.mxu1 %vm851_vm8, %v2548_v35  ;;  %v3028_v35 = vld [vmem:[#allocation7 + $0xc0] sm:$0xff] }
 0x72b   : > { %2801 = vmatpush1.xpose.msra.mxu1 %v1080_v3  ;;  %2834 = vmatprep.mubr.f32.mxu1 %v1082_v38 }
 0x72c   : > { %2939 = vmatprep.subr.mxu1 %v1100_v15 }
 0x72e   : > { %2835 = vmatmul.mubr.f32.vlgmr.msra.gmra.mxu1 %v1080_v3 }
 0x72f   : > { %2839 = vmatprep.mubr.f32.mxu1 %v1088_v62  ;;  %2940 = vmatpush1.msra.mxu1 %v1098_v4 }
 0x730   : > { %2941 = vmatprep.subr.mxu1 %v1094_v32 }
 0x731   : > { %2942 = vmatpush1.msra.mxu1 %v1092_v52 }
 0x732   : > { %2840 = vmatmul.mubr.f32.gmra.mxu1 %v1086_v58  ;;  %2943 = vmatprep.subr.mxu1 %v1088_v62  ;;  %v3030_v62 = vld [vmem:[#allocation7 + $0xd0] sm:$0xff] }
 0x733   : > { %2844 = vmatprep.mubr.f32.mxu1 %v1094_v32  ;;  %2944 = vmatpush1.msra.mxu1 %v1086_v58  ;;  %v2549_v32 = vld [vmem:[%s5388_s7] sm:$0xff]  ;;  %v3026_v58 = vld [vmem:[#allocation7 + $0xb0] sm:$0xff] }
 0x734   : > { %2945 = vmatprep.subr.mxu1 %v1082_v38  ;;  %v3023_v38 = vld [vmem:[#allocation7 + $0x98] sm:$0xff] }
 0x735   : > { %2946 = vmatpush1.msra.mxu1 %v1080_v3  ;;  %v3021_v3 = vld [vmem:[#allocation7 + $0x88] sm:$0xff] }
 0x736   : > { %2845 = vmatmul.mubr.f32.gmra.mxu1 %v1092_v52  ;;  %v3033_v52 = vld [vmem:[#allocation7 + $0xe8] sm:$0xff] }
 0x737   : > { %2849 = vmatprep.mubr.f32.mxu1 %v1100_v15  ;;  %3082 = vmatprep.subr.mxu0 %v3033_v52  ;;  %v3046_v52 = vld [vmem:[#allocation7 + $0x150] sm:$0xff] }
 0x738   : > { %3083 = vmatpush1.msra.mxu0 %v3032_v51  ;;  %v3045_v51 = vld [vmem:[#allocation7 + $0x148] sm:$0xff] }
 0x739   : > { %3084 = vmatprep.subr.mxu0 %v3031_v16  ;;  %v3044_v16 = vld [vmem:[#allocation7 + $0x140] sm:$0xff] }
 0x73a   : > { %2850 = vmatmul.mubr.f32.gmra.mxu1 %v1098_v4  ;;  %3085 = vmatpush1.msra.mxu0 %v3030_v62  ;;  %v3043_v62 = vld [vmem:[#allocation7 + $0x138] sm:$0xff] }
 0x73b   : > { %2979 = vmatprep.mubr.f32.mxu1 %v5491_v31  ;;  %3086 = vmatprep.subr.mxu0 %v3029_v40  ;;  %v3042_v40 = vld [vmem:[#allocation7 + $0x130] sm:$0xff] }
 0x73c   : > { %3087 = vmatpush1.msra.mxu0 %v3028_v35  ;;  %v3041_v35 = vld [vmem:[#allocation7 + $0x128] sm:$0xff] }
 0x73d   : > { %3088 = vmatprep.subr.mxu0 %v3027_v5  ;;  %v3040_v5 = vld [vmem:[#allocation7 + $0x120] sm:$0xff] }
 0x73e   : > { %3089 = vmatpush1.msra.mxu0 %v3026_v58 }
 0x73f   : > { %3090 = vmatprep.subr.mxu0 %v3025_v54 }
 0x740   : > { %3091 = vmatpush1.msra.mxu0 %v3024_v41 }
 0x741   : > { %3092 = vmatprep.subr.mxu0 %v3023_v38 }
 0x742   : > { %3093 = vmatpush1.msra.mxu0 %v3022_v53 }
 0x743   : > { %3094 = vmatprep.subr.mxu0 %v3021_v3 }
 0x7de   : > { %v5244_v36 = vpop.f32.mrf.mxu1 }
 0x7e0   : > { %v5246_v8 = vpop.f32.mrf.mxu1 }
 0x7e2   : > { %v5248_v9 = vpop.f32.mrf.mxu1 }
 0x7e4   : > { %v5250_v56 = vpop.f32.mrf.mxu1 }
 0x7e6   : > { %v5252_v2 = vpop.f32.mrf.mxu1 }
 0x7e8   : > { %v5254_v61 = vpop.f32.mrf.mxu1 }
 0x7ea   : > { %v5256_v17 = vpop.f32.mrf.mxu1 }
 0x7ec   : > { %v5258_v24 = vpop.f32.mrf.mxu1 }
 0x7ee   : > { %v2836_v60 = vpop.f32.mrf.mxu1 }
 0x7ef   : > { %v2855_v49 = vmul.f32 0.0625, %v2836_v60  ;;  %v3020_v60 = vld [vmem:[#allocation7 + $0x80] sm:$0xff] }
 0x7f0   : > { %v2838_v47 = vpop.f32.mrf.mxu1  ;;  %3095 = vmatpush1.msra.mxu0 %v3020_v60 }
 0x7f1   : > { %v2859_v6 = vsel %vm851_vm8, %v2855_v49, -inf  ;;  %v3018_v47 = vld [vmem:[#allocation7 + $0x70] sm:$0xff] }
 0x7f2   : > { %2860 = vmax.xlane.f32.xlu1 %v2859_v6  ;;  %v2841_v39 = vpop.f32.mrf.mxu1  ;;  %v3017_v6 = vld [vmem:[#allocation7 + $0x68] sm:$0xff] }
 0x7f3   : > { %v2856_v18 = vmul.f32 0.0625, %v2841_v39  ;;  %v3016_v39 = vld [vmem:[#allocation7 + $0x60] sm:$0xff] }
 0x7f4   : > { %v2843_v25 = vpop.f32.mrf.mxu1 }
 0x7f5   : > { %v2862_v11 = vsel %vm851_vm8, %v2856_v18, -inf  ;;  %v3014_v25 = vld [vmem:[#allocation7 + $0x50] sm:$0xff] }
 0x7f6   : > { %2863 = vmax.xlane.f32.xlu0 %v2862_v11  ;;  %v2846_v14 = vpop.f32.mrf.mxu1  ;;  %v3013_v11 = vld [vmem:[#allocation7 + $0x48] sm:$0xff] }
 0x7f7   : > { %v2857_v34 = vmul.f32 0.0625, %v2846_v14  ;;  %v3012_v14 = vld [vmem:[#allocation7 + $0x40] sm:$0xff] }
 0x7f8   : > { %v2848_v44 = vpop.f32.mrf.mxu1 }
 0x7f9   : > { %v2865_v37 = vsel %vm851_vm8, %v2857_v34, -inf  ;;  %v3010_v44 = vld [vmem:[#allocation7 + $0x30] sm:$0xff] }
 0x7fa   : > { %2866 = vmax.xlane.f32.xlu0 %v2865_v37  ;;  %v2851_v55 = vpop.f32.mrf.mxu1  ;;  %v3009_v37 = vld [vmem:[#allocation7 + $0x28] sm:$0xff] }
 0x7fb   : > { %v2858_v10 = vmul.f32 0.0625, %v2851_v55  ;;  %v3008_v55 = vld [vmem:[#allocation7 + $0x20] sm:$0xff] }
 0x7fc   : > { %v2853_v0 = vpop.f32.mrf.mxu1 }
 0x7fd   : > { %v2868_v21 = vsel %vm851_vm8, %v2858_v10, -inf  ;;  %v3006_v0 = vld [vmem:[#allocation7 + $0x10] sm:$0xff] }
 0x7fe   : > { %2869 = vmax.xlane.f32.xlu1 %v2868_v21  ;;  %v3005_v21 = vld [vmem:[#allocation7 + $0x8] sm:$0xff] }
 0x87b   : > { %v2861_v57 = vpop.xlane.xlu1 %2860 }
 0x87c   : > { %v2871_v26 = vsub.f32 %v2855_v49, %v2861_v57  ;;  %v3019_v49 = vld [vmem:[#allocation7 + $0x78] sm:$0xff]  ;;  %v3004_v57 = vld [vmem:[#allocation7] sm:$0xff] }
 0x87d   : > { %3096 = vmatprep.subr.mxu0 %v3019_v49 }
 0x87e   : > { %v2875_v23 = vmul.f32 1.442695, %v2871_v26  ;;  %3097 = vmatpush1.msra.mxu0 %v3018_v47  ;;  %v3067_v26 = vld [vmem:[#allocation7 + $0x1f8] sm:$0xff] }
 0x87f   : > { %v2864_v28 = vpop.xlane.xlu0 %2863  ;;  %3098 = vmatprep.subr.mxu0 %v3017_v6 }
 0x880   : > { %3723 = vpow2.f32 %v2875_v23  ;;  %v2872_v1 = vsub.f32 %v2856_v18, %v2864_v28  ;;  %v3015_v18 = vld [vmem:[#allocation7 + $0x58] sm:$0xff]  ;;  %3099 = vmatpush1.msra.mxu0 %v3016_v39  ;;  %v3066_v23 = vld [vmem:[#allocation7 + $0x1f0] sm:$0xff]  ;;  %v3065_v28 = vld [vmem:[#allocation7 + $0x1e8] sm:$0xff] }
 0x881   : > { %3100 = vmatprep.subr.mxu0 %v3015_v18  ;;  %v3039_v18 = vld [vmem:[#allocation7 + $0x118] sm:$0xff] }
 0x882   : > { %v2877_v48 = vmul.f32 1.442695, %v2872_v1  ;;  %3101 = vmatpush1.msra.mxu0 %v3014_v25  ;;  %v3064_v1 = vld [vmem:[#allocation7 + $0x1e0] sm:$0xff]  ;;  %v3038_v25 = vld [vmem:[#allocation7 + $0x110] sm:$0xff] }
 0x883   : > { %v2867_v43 = vpop.xlane.xlu0 %2866  ;;  %3102 = vmatprep.subr.mxu0 %v3013_v11  ;;  %v3036_v11 = vld [vmem:[#allocation7 + $0x100] sm:$0xff] }
 0x884   : > { %3725 = vpow2.f32 %v2877_v48  ;;  %v2873_v20 = vsub.f32 %v2857_v34, %v2867_v43  ;;  %v3011_v34 = vld [vmem:[#allocation7 + $0x38] sm:$0xff]  ;;  %3103 = vmatpush1.msra.mxu0 %v3012_v14  ;;  %v3062_v43 = vld [vmem:[#allocation7 + $0x1d0] sm:$0xff] }
 0x885   : > { %3104 = vmatprep.subr.mxu0 %v3011_v34  ;;  %v3063_v48 = vld [vmem:[#allocation7 + $0x1d8] sm:$0xff] }
 0x886   : > { %v2879_v33 = vmul.f32 1.442695, %v2873_v20  ;;  %3105 = vmatpush1.msra.mxu0 %v3010_v44  ;;  %v3061_v20 = vld [vmem:[#allocation7 + $0x1c8] sm:$0xff] }
 0x887   : > { %v2870_v63 = vpop.xlane.xlu1 %2869  ;;  %3106 = vmatprep.subr.mxu0 %v3009_v37 }
 0x888   : > { %3727 = vpow2.f32 %v2879_v33  ;;  %v2874_v59 = vsub.f32 %v2858_v10, %v2870_v63  ;;  %v3007_v10 = vld [vmem:[#allocation7 + $0x18] sm:$0xff]  ;;  %3107 = vmatpush1.msra.mxu0 %v3008_v55  ;;  %v3060_v33 = vld [vmem:[#allocation7 + $0x1c0] sm:$0xff] }
 0x889   : > { %3108 = vmatprep.subr.mxu0 %v3007_v10  ;;  %v3059_v63 = vld [vmem:[#allocation7 + $0x1b8] sm:$0xff]  ;;  %v3068_v10 = vld [vmem:[%s5390_s9] sm:$0x3] }
 0x88a   : > { %v2881_v42 = vmul.f32 1.442695, %v2874_v59  ;;  %3109 = vmatpush1.msra.mxu0 %v3006_v0  ;;  %v3058_v59 = vld [vmem:[#allocation7 + $0x1b0] sm:$0xff]  ;;  %v5492_v0 = vld [vmem:[#allocation15_spill] sm:$0xff] }
 0x88b   : > { %3110 = vmatprep.subr.mxu0 %v3005_v21  ;;  %v3073_v21 = vrot.slane %v3068_v10, %v5492_v0 }
 0x88c   : > { %3729 = vpow2.f32 %v2881_v42  ;;  %3111 = vmatpush1.msra.mxu0 %v3004_v57  ;;  %v3057_v42 = vld [vmem:[#allocation7 + $0x1a8] sm:$0xff] }
 0x88d   : > { %v5264_v46 = vpop.eup %3723  ;;  %3112 = vmatprep.subr.mxu0 %v3067_v26  ;;  %v5493_v26 = vld [vmem:[#allocation14_spill] sm:$0xff] }
 0x88e   : > { %v2883_v22 = vsel %vm851_vm8, %v5264_v46, 0.0  ;;  %3113 = vmatpush2.msra.mxu0 %v3066_v23  ;;  %v3077_v23 = vrot.slane %v3068_v10, %v5493_v26 }
 0x88f   : > { %2884 = vadd.xlane.f32.xlu0 %v2883_v22  ;;  %3114 = vmatprep.subr.mxu0 %v3065_v28  ;;  %v3056_v22 = vld [vmem:[#allocation7 + $0x1a0] sm:$0xff] }
 0x890   : > { %3115 = vmatpush2.msra.mxu0 %v3064_v1 }
 0x891   : > { %v5268_v15 = vpop.eup %3725  ;;  %3116 = vmatprep.subr.mxu0 %v3063_v48 }
 0x892   : > { %v2886_v13 = vsel %vm851_vm8, %v5268_v15, 0.0  ;;  %3117 = vmatpush2.msra.mxu0 %v3062_v43 }
 0x893   : > { %2887 = vadd.xlane.f32.xlu1 %v2886_v13  ;;  %3118 = vmatprep.subr.mxu0 %v3061_v20  ;;  %v3055_v13 = vld [vmem:[#allocation7 + $0x198] sm:$0xff] }
 0x894   : > { %3119 = vmatpush2.msra.mxu0 %v3060_v33 }
 0x895   : > { %v5272_v12 = vpop.eup %3727  ;;  %3120 = vmatprep.subr.mxu0 %v3059_v63 }
 0x896   : > { %v2889_v7 = vsel %vm851_vm8, %v5272_v12, 0.0  ;;  %3121 = vmatpush2.msra.mxu0 %v3058_v59 }
 0x897   : > { %2890 = vadd.xlane.f32.xlu0 %v2889_v7  ;;  %3122 = vmatprep.subr.mxu0 %v3057_v42  ;;  %v3054_v7 = vld [vmem:[#allocation7 + $0x190] sm:$0xff] }
 0x898   : > { %3123 = vmatpush2.msra.mxu0 %v3056_v22 }
 0x899   : > { %v5276_v27 = vpop.eup %3729  ;;  %3124 = vmatprep.subr.mxu0 %v3055_v13 }
 0x89a   : > { %v2892_v4 = vsel %vm851_vm8, %v5276_v27, 0.0  ;;  %3125 = vmatpush2.msra.mxu0 %v3054_v7 }
 0x89b   : > { %2893 = vadd.xlane.f32.xlu1 %v2892_v4  ;;  %v3053_v4 = vld [vmem:[#allocation7 + $0x188] sm:$0xff] }
 0x89c   : > { %3126 = vmatprep.subr.mxu0 %v3053_v4 }
 0x8ac   : > { %2560 = vperm.xlu1 %3530, %v2550_v30   ;;  %v3052_v30 = vld [vmem:[#allocation7 + $0x180] sm:$0xff] }
 0x8ad   : > { %2555 = vperm.xlu0 %3529, %v2549_v32   ;;  %v3051_v32 = vld [vmem:[#allocation7 + $0x178] sm:$0xff]  ;;  %3127 = vmatpush2.msra.mxu0 %v3052_v30 }
 0x8ae   : > { %3128 = vmatprep.subr.mxu0 %v3051_v32 }
 0x8b0   : > { %2565 = vperm.xlu1 %3530, %v2551_v45   ;;  %v3050_v45 = vld [vmem:[#allocation7 + $0x170] sm:$0xff] }
 0x8b1   : > { %2570 = vperm.xlu0 %3529, %v2552_v19   ;;  %v3049_v19 = vld [vmem:[#allocation7 + $0x168] sm:$0xff]  ;;  %3129 = vmatpush2.msra.mxu0 %v3050_v45 }
 0x8b2   : > { %3130 = vmatprep.subr.mxu0 %v3049_v19 }
 0x8b3   : > { %3131 = vmatpush2.msra.mxu0 %v3048_v29 }
 0x8b4   : > { %3132 = vmatprep.subr.mxu0 %v3047_v50 }
 0x8b5   : > { %3133 = vmatpush2.msra.mxu0 %v3046_v52 }
 0x8b6   : > { %3134 = vmatprep.subr.mxu0 %v3045_v51 }
 0x8b7   : > { %3135 = vmatpush2.msra.mxu0 %v3044_v16 }
 0x8b8   : > { %3136 = vmatprep.subr.mxu0 %v3043_v62 }
 0x8b9   : > { %3137 = vmatpush2.msra.mxu0 %v3042_v40 }
 0x8ba   : > { %3138 = vmatprep.subr.mxu0 %v3041_v35 }
 0x8bb   : > { %3139 = vmatpush2.msra.mxu0 %v3040_v5 }
 0x8bc   : > { %3140 = vmatprep.subr.mxu0 %v3039_v18 }
 0x8bd   : > { %3141 = vmatpush2.msra.mxu0 %v3038_v25 }
 0x918   : > { %v2885_v58 = vpop.xlane.xlu0 %2884 }
 0x919   : > { %3731 = vrcp.f32 %v2885_v58 }
 0x91c   : > { %v2888_v54 = vpop.xlane.xlu1 %2887 }
 0x91d   : > { %3733 = vrcp.f32 %v2888_v54 }
 0x920   : > { %v2891_v41 = vpop.xlane.xlu0 %2890 }
 0x921   : > { %3735 = vrcp.f32 %v2891_v41 }
 0x924   : > { %v2894_v38 = vpop.xlane.xlu1 %2893 }
 0x925   : > { %3737 = vrcp.f32 %v2894_v38 }
 0x926   : > { %v3732_v53 = vpop.eup %3731 }
 0x927   : > { %v2899_v3 = vmul.f32 %v3732_v53, %v5264_v46 }
 0x928   : > { %v2556_v57 = vpop.permute.xlu0 %2555  ;;  %v2561_v28 = vpop.permute.xlu1 %2560 }
 0x929   : > { %3393 = vmatmul.mubr.msk.f32.vlgmr.msra.gmra.mxu1 %vm851_vm8, %v2899_v3  ;;  %v2748_v48 = vadd.f32 %v5244_v36, %v2556_v57  ;;  %v2750_v33 = vadd.f32 %v5246_v8, %v2556_v57  ;;  %v2754_v22 = vadd.f32 %v5248_v9, %v2561_v28  ;;  %v2756_v30 = vadd.f32 %v5250_v56, %v2561_v28 }
 0x92a   : > { %v3734_v60 = vpop.eup %3733  ;;  %2985 = vmatprep.mubr.f32.mxu1 %v5491_v31 }
 0x92b   : > { %v2900_v49 = vmul.f32 %v3734_v60, %v5268_v15  ;;  %v3037_v15 = vld [vmem:[#allocation7 + $0x108] sm:$0xff] }
 0x92c   : > { %3142 = vmatprep.subr.mxu0 %v3037_v15  ;;  %v2566_v4 = vpop.permute.xlu1 %2565  ;;  %v2571_v50 = vpop.permute.xlu0 %2570 }
 0x92d   : > { %3394 = vmatmul.mubr.msk.f32.gmra.mxu1 %vm851_vm8, %v2900_v49  ;;  %3143 = vmatpush2.msra.mxu0 %v3036_v11  ;;  %v2760_v9 = vadd.f32 %v5252_v2, %v2566_v4  ;;  %v2762_v51 = vadd.f32 %v5254_v61, %v2566_v4  ;;  %v2766_v40 = vadd.f32 %v5256_v17, %v2571_v50 }
 0x92e   : > { %v3736_v47 = vpop.eup %3735  ;;  %2991 = vmatprep.mubr.f32.mxu1 %v5491_v31  ;;  %v2768_v58 = vadd.f32 %v5258_v24, %v2571_v50 }
 0x92f   : > { %v2901_v6 = vmul.f32 %v3736_v47, %v5272_v12 }
 0x931   : > { %3395 = vmatmul.mubr.msk.f32.gmra.mxu1 %vm851_vm8, %v2901_v6 }
 0x932   : > { %v3738_v39 = vpop.eup %3737  ;;  %2997 = vmatprep.mubr.f32.mxu1 %v5491_v31 }
 0x933   : > { %v2902_v46 = vmul.f32 %v3738_v39, %v5276_v27 }
 0x935   : > { %3396 = vmatmul.mubr.msk.f32.gmra.mxu1 %vm851_vm8, %v2902_v46 }
 0x9e9   : > { %v2981_v14 = vpop.f32.mrf.mxu1 }
 0x9eb   : > { %v2983_v34 = vpop.f32.mrf.mxu1 }
 0x9ec   : > { %3144 = vmatprep.mubr.f32.mxu0 %v2983_v34 }
 0x9ed   : > { %v2987_v12 = vpop.f32.mrf.mxu1  ;;  %3145 = vmatmul.mubr.f32.vlgmr.msra.gmra.mxu0 %v2981_v14 }
 0x9ef   : > { %v2989_v31 = vpop.f32.mrf.mxu1 }
 0x9f0   : > { %3150 = vmatprep.mubr.f32.mxu0 %v2989_v31 }
 0x9f1   : > { %v2993_v27 = vpop.f32.mrf.mxu1  ;;  %3151 = vmatmul.mubr.f32.gmra.mxu0 %v2987_v12 }
 0x9f3   : > { %v2995_v44 = vpop.f32.mrf.mxu1 }
 0x9f4   : > { %3156 = vmatprep.mubr.f32.mxu0 %v2995_v44 }
 0x9f5   : > { %v2999_v37 = vpop.f32.mrf.mxu1  ;;  %3157 = vmatmul.mubr.f32.gmra.mxu0 %v2993_v27 }
 0x9f7   : > { %v3001_v55 = vpop.f32.mrf.mxu1 }
 0x9f8   : > { %3162 = vmatprep.mubr.f32.mxu0 %v3001_v55 }
 0x9f9   : > { %3163 = vmatmul.mubr.f32.gmra.mxu0 %v2999_v37 }
 0xaad   : > { %v3146_v1 = vpop.f32.mrf.mxu0 }
 0xaae   : > { %v3147_v43 = vadd.f32 %v3146_v1, %v3073_v21 }
 0xaaf   : > { %v3148_v20 = vpop.f32.mrf.mxu0 }
 0xab0   : > { %v3169_v63 = vadd.f32 %v3147_v43, %v2748_v48  ;;  %v3149_v59 = vadd.f32 %v3148_v20, %v3077_v23 }
 0xab1   : > { %v3152_v42 = vpop.f32.mrf.mxu0 }
 0xab2   : > { %3177 = vst [vmem:[%s5314_s30] sm:$0xff] %v3169_v63  ;;  %v3170_v13 = vadd.f32 %v3149_v59, %v2750_v33  ;;  %v3153_v7 = vadd.f32 %v3152_v42, %v3073_v21 }
 0xab3   : > { %v3154_v36 = vpop.f32.mrf.mxu0 }
 0xab4   : > { %3178 = vst [vmem:[%s5314_s30 + $0x8] sm:$0xff] %v3170_v13  ;;  %v3171_v8 = vadd.f32 %v3153_v7, %v2754_v22  ;;  %v3155_v32 = vadd.f32 %v3154_v36, %v3077_v23 }
 0xab5   : > { %v3158_v45 = vpop.f32.mrf.mxu0 }
 0xab6   : > { %3179 = vst [vmem:[%s5314_s30 + $0x10] sm:$0xff] %v3171_v8  ;;  %v3172_v19 = vadd.f32 %v3155_v32, %v2756_v30  ;;  %v3159_v29 = vadd.f32 %v3158_v45, %v3073_v21 }
 0xab7   : > { %v3160_v52 = vpop.f32.mrf.mxu0 }
 0xab8   : > { %3180 = vst [vmem:[%s5314_s30 + $0x18] sm:$0xff] %v3172_v19  ;;  %v3173_v56 = vadd.f32 %v3159_v29, %v2760_v9  ;;  %v3161_v16 = vadd.f32 %v3160_v52, %v3077_v23 }
 0xab9   : > { %v3164_v62 = vpop.f32.mrf.mxu0 }
 0xaba   : > { %3181 = vst [vmem:[%s5314_s30 + $0x20] sm:$0xff] %v3173_v56  ;;  %v3174_v2 = vadd.f32 %v3161_v16, %v2762_v51  ;;  %v3165_v35 = vadd.f32 %v3164_v62, %v3073_v21 }
 0xabb   : > { %v3166_v5 = vpop.f32.mrf.mxu0 }
 0xabc   : > { %3182 = vst [vmem:[%s5314_s30 + $0x28] sm:$0xff] %v3174_v2  ;;  %v3175_v61 = vadd.f32 %v3165_v35, %v2766_v40  ;;  %v3167_v54 = vadd.f32 %v3166_v5, %v3077_v23 }
 0xabe   : > { %3183 = vst [vmem:[%s5314_s30 + $0x30] sm:$0xff] %v3175_v61  ;;  %v3176_v17 = vadd.f32 %v3167_v54, %v2768_v58 }
 0xac0   : > { %3184 = vst [vmem:[%s5314_s30 + $0x38] sm:$0xff] %v3176_v17 }
 0xac1   : > { %3830 = shalt.err (!%p3827_p11)
}
 0xac2   : > { %s3831_s28 = scalar_lea.hbm %s5335_s18, 1024  ;;  %s3835_s29 = scalar_lea.hbm %s5391_s10, 2048 }
 0xac3   : > { %p3832_p0 = scmp.ne.s32.totalorder %s5335_s18, %s3831_s28  ;;  %p3836_p3 = scmp.lt.s32.totalorder %s5335_s18, %s5391_s10 }
 0xac4   : > { %p3837_p2 = scmp.lt.s32.totalorder %s3835_s29, %s3831_s28 }
 0xac5   : > { %p3833_p1 = pnand %p3832_p0, %p3999_p5 }
 0xac6   : > { %p3838_p4 = por %p3837_p2, %p3836_p3 }
 0xac7   : > { %p3834_p13 = pneg %p3833_p1 }
 0xac9   : > { %p3839_p10 = pnand %p3838_p4, %p3834_p13 }
 0xacb   : > { %3842 = shalt.err (!%p3839_p10)
}
 0xacc   : > { %s3905_s20 = smov 256  }
 0xacd   : > { %3456 = dma.vmem_to_hbm [thread:$0]  (%p3999_p5), %s5329_s26, 1024, %s5335_s18, %s5340_s17, %s3905_s20, %s3905_s20, %s3896_s11  }
 0xace PF: > { %p3478_p12 = scmp.ge.s32.totalorder %s3885_s16, 2  ;;  %s3214_s21 = sand.u32 1, %s3873_s13  }
 0xacf   : > { %p5494_p7 = scmp.ne.s32.totalorder %s5420_s24, 0  ;;  %s3215_s15 = scalar_lea.sflag [#allocation4], %s3214_s21 }
 0xad1   : > { %p3469_p6 = pnand %p3478_p12, %p5494_p7 }
 0xad3   : > { %p3470_p9 = pneg %p3469_p6 }
 0xad5   : > { %3868 = dma.done.wait (%p3470_p9), %s3215_s15, 1024  }
 0xad6   : > { %3870 = vsyncadd (%p3470_p9), %s3215_s15, 4294966272  ;;  %s5495_s23 = sld [smem:[#allocation12_spill]]  ;;  %p22_p8 = scmp.ge.s32.totalorder %s3986_s19, 4  }
 0xad7   : > { %s5496_s15 = sld [smem:[#allocation13_spill]]  ;;  %s5497_s13 = smov %s3877_s14 }
 0xad8   : > { %s5499_s16 = smov %s3986_s19  ;;  %24 = sbr.rel (!%p22_p8) target bundleno = 5 (0x5), region = 115 }
 0xadc   : > { %s5498_s14 = smov %s5495_s23 }
 0xadd   :  { %3220 = vsyncpa [#allocation3], 1 }
 0xade   :  { %3222 = vsyncpa [#allocation3 + $0x1], 1 }
 0xadf   :  { %3223 = vsyncpa [#allocation6], 1 }
 0xae0   :  { %3224 = vsyncpa [#allocation4], 1 }
 0xae1   :  { %3226 = vsyncpa [#allocation4 + $0x1], 1 }

</bundles_post_ra>
